<compile_context>
chip_gen: v7x
topology: tpu7x:2x2x1
jax: 0.10.0
libtpu: 0.0.40
codegen_flags: <defaults>
</compile_context>

<pallas_src>
import functools

import jax
import jax.numpy as jnp
import numpy as np
from jax.experimental import pallas as pl
from jax.experimental.pallas import tpu as pltpu

N_LAYERS = 3  # config['lightGCN_n_layers']


# ---------------------------------------------------------------------------
# Sizing helpers
# ---------------------------------------------------------------------------
def _round_up(n, m):
    return ((n + m - 1) // m) * m


def _vmem_limit_bytes():
    """Per-generation scoped-VMEM limit: ~3/4 of physical capacity.

    128 MiB parts (v5e/v6e) -> 96 MiB, 64 MiB parts (v7x) -> 48 MiB.
    """
    try:
        cap = int(pltpu.get_tpu_info().vmem_capacity_bytes)
    except Exception:
        cap = 64 * 1024 * 1024  # conservative (v7x-sized) fallback
    return min((cap * 3) // 4, 100 * 1024 * 1024)


def _pick_row_tile(n_rows):
    """Row (M) tile: up to 512 while keeping >= 2 tiles for megacore."""
    for cand in (512, 256, 128):
        if n_rows % cand == 0 and n_rows // cand >= 2:
            return cand
    return 128 if n_rows % 128 == 0 else n_rows


def _pick_k_tile(n_k, tm, d, fixed_bytes, budget, emb_streamed):
    """Largest 128-multiple contraction tile whose per-step footprint fits."""
    for cand in range(n_k, 127, -128):
        if n_k % cand:
            continue
        step = 2 * tm * cand * 2              # bf16 graph tile, double-buffered
        if emb_streamed:
            step += 2 * cand * d * 2          # bf16 embedding K-tile, double-buffered
        if fixed_bytes + step <= budget:
            return cand
    return 128


# ---------------------------------------------------------------------------
# Kernel 1: users_emb = Graph_UI @ item_emb
#   Accumulate directly into the VMEM-resident f32 output block (no scratch).
# ---------------------------------------------------------------------------
def ui_proj_kernel(gui_ref, item_ref, out_ref, *, tk, emb_resident):
    k = pl.program_id(1)

    @pl.when(k == 0)
    def _():
        out_ref[...] = jnp.zeros_like(out_ref)

    if emb_resident:
        emb = item_ref[pl.ds(pl.multiple_of(k * tk, tk), tk), :]
    else:
        emb = item_ref[...]
    out_ref[...] += jnp.dot(gui_ref[...], emb, preferred_element_type=jnp.float32)


def _ui_projection(graph_ui_bf16, item_bf16, *, tm, tk, emb_resident, vmem_limit):
    U, I = graph_ui_bf16.shape
    D = item_bf16.shape[1]
    if emb_resident:
        emb_spec = pl.BlockSpec((I, D), lambda i, k: (0, 0))     # DMA'd once, resident
    else:
        emb_spec = pl.BlockSpec((tk, D), lambda i, k: (k, 0))    # streamed K-tile
    return pl.pallas_call(
        functools.partial(ui_proj_kernel, tk=tk, emb_resident=emb_resident),
        out_shape=jax.ShapeDtypeStruct((U, D), jnp.float32),
        grid_spec=pltpu.PrefetchScalarGridSpec(
            num_scalar_prefetch=0,
            grid=(U // tm, I // tk),
            in_specs=[pl.BlockSpec((tm, tk), lambda i, k: (i, k)),  # Graph_UI tile
                      emb_spec],                                    # item_emb (bf16)
            out_specs=pl.BlockSpec((tm, D), lambda i, k: (i, 0)),
        ),
        compiler_params=pltpu.CompilerParams(
            dimension_semantics=("parallel", "arbitrary"),
            vmem_limit_bytes=vmem_limit,
        ),
    )(graph_ui_bf16, item_bf16)


# ---------------------------------------------------------------------------
# Kernel 2: one LightGCN attention layer (tiled M x K + fused epilogue)
#   att      = tanh(r_emb @ w^T + b)              (row-local)
#   all_new  = (Graph_U2 @ all_emb) * att         (emitted as bf16 stream)
#   r_new    = all_new + r_emb                    (f32)
#   uacc_new = (uacc + all_new) * scale           (scale = 1/(L+1) last layer)
# ---------------------------------------------------------------------------
def layer_kernel(g_ref, all_ref, r_ref, uacc_ref, w_ref, b_ref,
                 all_out_ref, r_out_ref, uacc_out_ref, acc_ref,
                 *, tk, emb_resident, scale):
    k = pl.program_id(1)

    @pl.when(k == 0)
    def _():
        acc_ref[...] = jnp.zeros_like(acc_ref)

    if emb_resident:
        emb = all_ref[pl.ds(pl.multiple_of(k * tk, tk), tk), :]
    else:
        emb = all_ref[...]
    acc_ref[...] += jnp.dot(g_ref[...], emb, preferred_element_type=jnp.float32)

    @pl.when(k == pl.num_programs(1) - 1)
    def _():
        r_old = r_ref[...]                               # (tm, D) f32
        w = w_ref[...]                                   # (1, D)  f32
        b = b_ref[0]                                     # SMEM scalar
        # row-local attention: VPU mul + lane reduce (XLU) + tanh (EUP)
        logits = jnp.sum(r_old * w, axis=1, keepdims=True) + b
        att = jnp.tanh(logits)                           # (tm, 1)
        new_all = acc_ref[...] * att                     # f32
        all_out_ref[...] = new_all.astype(all_out_ref.dtype)   # bf16 stream, cast once
        r_out_ref[...] = new_all + r_old
        uacc_new = uacc_ref[...] + new_all
        if scale != 1.0:
            uacc_new = uacc_new * scale
        uacc_out_ref[...] = uacc_new


def _layer_call(graph_u2_bf16, all_emb_bf16, r_emb, uacc, w_row, b,
                *, scale, tm, tk, emb_resident, vmem_limit):
    U = graph_u2_bf16.shape[0]
    D = all_emb_bf16.shape[1]
    row_spec = pl.BlockSpec((tm, D), lambda i, k: (i, 0))
    if emb_resident:
        emb_spec = pl.BlockSpec((U, D), lambda i, k: (0, 0))
    else:
        emb_spec = pl.BlockSpec((tk, D), lambda i, k: (k, 0))
    out_shapes = (jax.ShapeDtypeStruct((U, D), jnp.bfloat16),   # next layer's all_emb
                  jax.ShapeDtypeStruct((U, D), jnp.float32),    # r_emb
                  jax.ShapeDtypeStruct((U, D), jnp.float32))    # user-mean accumulator
    return pl.pallas_call(
        functools.partial(layer_kernel, tk=tk, emb_resident=emb_resident, scale=scale),
        out_shape=out_shapes,
        grid_spec=pltpu.PrefetchScalarGridSpec(
            num_scalar_prefetch=0,
            grid=(U // tm, U // tk),
            in_specs=[
                pl.BlockSpec((tm, tk), lambda i, k: (i, k)),          # Graph_U2 tile
                emb_spec,                                             # all_emb (bf16)
                row_spec,                                             # r_emb (f32)
                row_spec,                                             # uacc (f32)
                pl.BlockSpec((1, D), lambda i, k: (0, 0)),            # att weight row
                pl.BlockSpec(memory_space=pltpu.MemorySpace.SMEM),    # att bias (1,)
            ],
            out_specs=(row_spec, row_spec, row_spec),
            scratch_shapes=[pltpu.VMEM((tm, D), jnp.float32)],        # f32 accumulator
        ),
        compiler_params=pltpu.CompilerParams(
            dimension_semantics=("parallel", "arbitrary"),
            vmem_limit_bytes=vmem_limit,
        ),
    )(graph_u2_bf16, all_emb_bf16, r_emb, uacc, w_row, b)


# ---------------------------------------------------------------------------
# Module wrappers
# ---------------------------------------------------------------------------
def computer(graph_ui, item_emb, graph_u2, att_w, att_b):
    U, I = graph_ui.shape
    D = item_emb.shape[1]
    U_p, I_p = _round_up(U, 128), _round_up(I, 128)

    # Zero padding is exact for these matmuls; padded user rows stay zero
    # through every layer and are sliced off at the end.
    gui = jnp.pad(graph_ui, ((0, U_p - U), (0, I_p - I))).astype(jnp.bfloat16)
    gu2 = jnp.pad(graph_u2, ((0, U_p - U), (0, U_p - U))).astype(jnp.bfloat16)
    item_bf16 = jnp.pad(item_emb, ((0, I_p - I), (0, 0))).astype(jnp.bfloat16)

    vmem_limit = _vmem_limit_bytes()
    budget = int(vmem_limit * 0.8)      # per-step footprint budget (headroom)

    tm = _pick_row_tile(U_p)

    # ---- users_emb = Graph_UI @ item_emb -------------------------------------
    ui_fixed = 2 * tm * D * 4                           # f32 output row tile (2 bufs)
    ui_emb_bytes = 2 * I_p * D * 2                      # resident item emb (bf16)
    ui_resident = ui_fixed + ui_emb_bytes + 2 * tm * 128 * 2 <= budget
    if ui_resident:
        ui_fixed += ui_emb_bytes
    tk_i = _pick_k_tile(I_p, tm, D, ui_fixed, budget, emb_streamed=not ui_resident)
    users_emb = _ui_projection(gui, item_bf16, tm=tm, tk=tk_i,
                               emb_resident=ui_resident, vmem_limit=vmem_limit)

    # ---- layer loop -----------------------------------------------------------
    all_emb = users_emb.astype(jnp.bfloat16)            # bf16 matmul stream, cast once
    r_emb = users_emb                                    # f32
    uacc = users_emb                                     # f32 running sum (u_embs[0])

    ly_fixed = (2 * 2 * tm * D * 4                       # r_emb + uacc input row tiles
                + 2 * tm * D * (2 + 4 + 4)               # all(bf16)/r/uacc output tiles
                + tm * D * 4                             # f32 accumulator scratch
                + 2 * D * 4)                             # attention weight row
    ly_emb_bytes = 2 * U_p * D * 2                       # resident all_emb (bf16)
    ly_resident = ly_fixed + ly_emb_bytes + 2 * tm * 128 * 2 <= budget
    if ly_resident:
        ly_fixed += ly_emb_bytes
    tk_u = _pick_k_tile(U_p, tm, D, ly_fixed, budget, emb_streamed=not ly_resident)

    # Layer recursion needs the FULL previous all_emb -> layer loop stays
    # outermost; Graph_U2 is streamed once per layer.
    for layer in range(N_LAYERS):
        w_row = att_w[layer][None, :]                    # (1, D)
        b = att_b[layer]                                 # (1,)
        scale = 1.0 / float(N_LAYERS + 1) if layer == N_LAYERS - 1 else 1.0
        all_emb, r_emb, uacc = _layer_call(
            gu2, all_emb, r_emb, uacc, w_row, b,
            scale=scale, tm=tm, tk=tk_u, emb_resident=ly_resident,
            vmem_limit=vmem_limit)

    # all_items is the item embedding table itself; no kernel round trip.
    return uacc[:U], item_emb


@jax.jit
def n2_lightgcn_forward(users, items, graph_ui, item_emb, graph_u2, att_w, att_b):
    all_users, all_items = computer(graph_ui, item_emb, graph_u2, att_w, att_b)
    users_emb = all_users[users]     # embedding gather: index glue, plain JAX
    items_emb = all_items[items]
    # Batch-sized per-row dot product: left to XLA (fuses with the gathers,
    # far below pallas_call launch overhead).
    return jnp.sum(users_emb * items_emb, axis=1)


def reference_forward(users, items, graph_ui, item_emb, graph_u2, att_w, att_b):
    users_emb = graph_ui @ item_emb
    all_emb, r_emb = users_emb, users_emb
    u_embs = [all_emb]
    for layer in range(N_LAYERS):
        att = jnp.tanh(r_emb @ att_w[layer][:, None] + att_b[layer, 0])
        all_emb = (graph_u2 @ all_emb) * att
        r_emb = all_emb + r_emb
        u_embs.append(all_emb)
    all_users = jnp.mean(jnp.stack(u_embs, axis=1), axis=1)
    return jnp.sum(all_users[users] * item_emb[items], axis=1)


if __name__ == "__main__":
    # Small but grid-exercising shapes (multiple row tiles on the parallel axis).
    n_users, n_items, latent_dim, batch = 512, 384, 64, 8

    key = jax.random.PRNGKey(0)
    k_item, k_gui, k_gu2, k_w, k_b, k_u, k_i = jax.random.split(key, 7)

    # nn.init.normal_(embedding_item.weight, std=0.1)
    item_emb = 0.1 * jax.random.normal(k_item, (n_items, latent_dim), jnp.float32)
    # Deterministic dense stand-ins for the normalized sparse graphs.
    graph_ui = jax.random.uniform(k_gui, (n_users, n_items), jnp.float32) / n_items
    graph_u2 = jax.random.uniform(k_gu2, (n_users, n_users), jnp.float32) / n_users
    # nn.Linear(latent_dim, 1) per layer: weight (1, D) -> stacked (L, D), bias (L, 1)
    bound = 1.0 / np.sqrt(latent_dim)
    att_w = jax.random.uniform(k_w, (N_LAYERS, latent_dim), jnp.float32,
                               minval=-bound, maxval=bound)
    att_b = jax.random.uniform(k_b, (N_LAYERS, 1), jnp.float32,
                               minval=-bound, maxval=bound)

    users = jax.random.randint(k_u, (batch,), 0, n_users, jnp.int32)
    items = jax.random.randint(k_i, (batch,), 0, n_items, jnp.int32)

    gamma = n2_lightgcn_forward(users, items, graph_ui, item_emb, graph_u2,
                                att_w, att_b)
    jax.block_until_ready(gamma)

    gamma_ref = reference_forward(users, items, graph_ui, item_emb, graph_u2,
                                  att_w, att_b)
    # bf16 graph / all_emb operands (f32 accumulation) -> loosened tolerance.
    np.testing.assert_allclose(np.asarray(gamma), np.asarray(gamma_ref),
                               rtol=3e-2, atol=1e-4)
    print("KERNEL_OK")
</pallas_src>

<mosaic_0001>
module attributes {stable_mosaic.version = 11 : i64} {
  func.func @ui_proj_kernel(%arg0: i32, %arg1: i32, %arg2: memref<256x384xbf16, #tpu.memory_space<vmem>>, %arg3: memref<384x64xbf16, #tpu.memory_space<vmem>>, %arg4: memref<256x64xf32, #tpu.memory_space<vmem>>) attributes {dimension_semantics = [#tpu.dimension_semantics<parallel>, #tpu.dimension_semantics<arbitrary>], iteration_bounds = array<i64: 2, 1>, scalar_prefetch = 0 : i64, scratch_operands = 0 : i64, tpu.core_type = #tpu.core_type<tc>, window_params = [{transform_indices = @transform_0, window_bounds = array<i64: 256, 384>}, {pipeline_mode = #tpu.pipeline_mode<synchronous>, transform_indices = @transform_1, window_bounds = array<i64: 384, 64>}, {transform_indices = @transform_2, window_bounds = array<i64: 256, 64>}]} {
    %c0_i32 = arith.constant 0 : i32
    %0 = arith.cmpi eq, %arg1, %c0_i32 : i32
    %1 = arith.extui %0 : i1 to i32
    %c0_i32_0 = arith.constant 0 : i32
    %2 = arith.cmpi ne, %1, %c0_i32_0 : i32
    scf.if %2 {
      %cst_7 = arith.constant 0.000000e+00 : f32
      %12 = vector.broadcast %cst_7 : f32 to vector<256x64xf32>
      %c0_8 = arith.constant 0 : index
      %c0_9 = arith.constant 0 : index
      %13 = vector.load %arg4[%c0_8, %c0_9] : memref<256x64xf32, #tpu.memory_space<vmem>>, vector<256x64xf32>
      tpu.vector_store %arg4[%c0_8, %c0_9], %12 {strides = array<i32>} : memref<256x64xf32, #tpu.memory_space<vmem>>, vector<256x64xf32>,
    } else {
    }
    %c384_i32 = arith.constant 384 : i32
    %3 = arith.muli %arg1, %c384_i32 : i32
    %4 = tpu.assume_multiple %3, 384 : i32
    %5 = arith.index_cast %4 : i32 to index
    %c0 = arith.constant 0 : index
    %6 = vector.load %arg3[%5, %c0] : memref<384x64xbf16, #tpu.memory_space<vmem>>, vector<384x64xbf16>
    %c0_1 = arith.constant 0 : index
    %c0_2 = arith.constant 0 : index
    %7 = vector.load %arg4[%c0_1, %c0_2] : memref<256x64xf32, #tpu.memory_space<vmem>>, vector<256x64xf32>
    %c0_3 = arith.constant 0 : index
    %c0_4 = arith.constant 0 : index
    %8 = vector.load %arg2[%c0_3, %c0_4] : memref<256x384xbf16, #tpu.memory_space<vmem>>, vector<256x384xbf16>
    %cst = arith.constant dense<0.000000e+00> : vector<256x64xf32>
    %9 = tpu.matmul %8, %6, %cst {dimension_numbers = #tpu.dot_dimension_numbers<[1], [0], [0], [1], [0, 0, 1, 1], [], []>} : vector<256x384xbf16>, vector<384x64xbf16>, vector<256x64xf32> -> vector<256x64xf32>
    %10 = arith.addf %7, %9 : vector<256x64xf32>
    %c0_5 = arith.constant 0 : index
    %c0_6 = arith.constant 0 : index
    %11 = vector.load %arg4[%c0_5, %c0_6] : memref<256x64xf32, #tpu.memory_space<vmem>>, vector<256x64xf32>
    tpu.vector_store %arg4[%c0_5, %c0_6], %10 {strides = array<i32>} : memref<256x64xf32, #tpu.memory_space<vmem>>, vector<256x64xf32>,
    return
  }
  func.func @transform_0(%arg0: i32, %arg1: i32) -> (i32, i32) {
    %c0_i32 = arith.constant 0 : i32
    return %arg0, %arg1 : i32, i32
  }
  func.func @transform_1(%arg0: i32, %arg1: i32) -> (i32, i32) {
    %c0_i32 = arith.constant 0 : i32
    %c0_i32_0 = arith.constant 0 : i32
    %c0_i32_1 = arith.constant 0 : i32
    return %c0_i32, %c0_i32_0 : i32, i32
  }
  func.func @transform_2(%arg0: i32, %arg1: i32) -> (i32, i32) {
    %c0_i32 = arith.constant 0 : i32
    %c0_i32_0 = arith.constant 0 : i32
    return %arg0, %c0_i32 : i32, i32
  }
}

module attributes {stable_mosaic.version = 11 : i64} {
  func.func @layer_kernel(%arg0: i32, %arg1: i32, %arg2: memref<256x512xbf16, #tpu.memory_space<vmem>>, %arg3: memref<512x64xbf16, #tpu.memory_space<vmem>>, %arg4: memref<256x64xf32, #tpu.memory_space<vmem>>, %arg5: memref<256x64xf32, #tpu.memory_space<vmem>>, %arg6: memref<1x64xf32, #tpu.memory_space<vmem>>, %arg7: memref<1xf32, #tpu.memory_space<smem>>, %arg8: memref<256x64xbf16, #tpu.memory_space<vmem>>, %arg9: memref<256x64xf32, #tpu.memory_space<vmem>>, %arg10: memref<256x64xf32, #tpu.memory_space<vmem>>, %arg11: memref<256x64xf32, #tpu.memory_space<vmem>>) attributes {dimension_semantics = [#tpu.dimension_semantics<parallel>, #tpu.dimension_semantics<arbitrary>], iteration_bounds = array<i64: 2, 1>, scalar_prefetch = 0 : i64, scratch_operands = 1 : i64, tpu.core_type = #tpu.core_type<tc>, window_params = [{transform_indices = @transform_0, window_bounds = array<i64: 256, 512>}, {pipeline_mode = #tpu.pipeline_mode<synchronous>, transform_indices = @transform_1, window_bounds = array<i64: 512, 64>}, {transform_indices = @transform_2, window_bounds = array<i64: 256, 64>}, {transform_indices = @transform_3, window_bounds = array<i64: 256, 64>}, {pipeline_mode = #tpu.pipeline_mode<synchronous>, transform_indices = @transform_4, window_bounds = array<i64: 1, 64>}, {transform_indices = @transform_5, window_bounds = array<i64: 1>}, {transform_indices = @transform_6, window_bounds = array<i64: 256, 64>}, {transform_indices = @transform_7, window_bounds = array<i64: 256, 64>}, {transform_indices = @transform_8, window_bounds = array<i64: 256, 64>}]} {
    %c0_i32 = arith.constant 0 : i32
    %0 = arith.cmpi eq, %arg1, %c0_i32 : i32
    %1 = arith.extui %0 : i1 to i32
    %c0_i32_0 = arith.constant 0 : i32
    %2 = arith.cmpi ne, %1, %c0_i32_0 : i32
    scf.if %2 {
      %cst_9 = arith.constant 0.000000e+00 : f32
      %15 = vector.broadcast %cst_9 : f32 to vector<256x64xf32>
      %c0_10 = arith.constant 0 : index
      %c0_11 = arith.constant 0 : index
      %16 = vector.load %arg11[%c0_10, %c0_11] : memref<256x64xf32, #tpu.memory_space<vmem>>, vector<256x64xf32>
      tpu.vector_store %arg11[%c0_10, %c0_11], %15 {strides = array<i32>} : memref<256x64xf32, #tpu.memory_space<vmem>>, vector<256x64xf32>,
    } else {
    }
    %c512_i32 = arith.constant 512 : i32
    %3 = arith.muli %arg1, %c512_i32 : i32
    %4 = tpu.assume_multiple %3, 512 : i32
    %5 = arith.index_cast %4 : i32 to index
    %c0 = arith.constant 0 : index
    %6 = vector.load %arg3[%5, %c0] : memref<512x64xbf16, #tpu.memory_space<vmem>>, vector<512x64xbf16>
    %c0_1 = arith.constant 0 : index
    %c0_2 = arith.constant 0 : index
    %7 = vector.load %arg11[%c0_1, %c0_2] : memref<256x64xf32, #tpu.memory_space<vmem>>, vector<256x64xf32>
    %c0_3 = arith.constant 0 : index
    %c0_4 = arith.constant 0 : index
    %8 = vector.load %arg2[%c0_3, %c0_4] : memref<256x512xbf16, #tpu.memory_space<vmem>>, vector<256x512xbf16>
    %cst = arith.constant dense<0.000000e+00> : vector<256x64xf32>
    %9 = tpu.matmul %8, %6, %cst {dimension_numbers = #tpu.dot_dimension_numbers<[1], [0], [0], [1], [0, 0, 1, 1], [], []>} : vector<256x512xbf16>, vector<512x64xbf16>, vector<256x64xf32> -> vector<256x64xf32>
    %10 = arith.addf %7, %9 : vector<256x64xf32>
    %c0_5 = arith.constant 0 : index
    %c0_6 = arith.constant 0 : index
    %11 = vector.load %arg11[%c0_5, %c0_6] : memref<256x64xf32, #tpu.memory_space<vmem>>, vector<256x64xf32>
    tpu.vector_store %arg11[%c0_5, %c0_6], %10 {strides = array<i32>} : memref<256x64xf32, #tpu.memory_space<vmem>>, vector<256x64xf32>,
    %c0_i32_7 = arith.constant 0 : i32
    %12 = arith.cmpi eq, %arg1, %c0_i32_7 : i32
    %13 = arith.extui %12 : i1 to i32
    %c0_i32_8 = arith.constant 0 : i32
    %14 = arith.cmpi ne, %13, %c0_i32_8 : i32
    scf.if %14 {
      %c0_9 = arith.constant 0 : index
      %c0_10 = arith.constant 0 : index
      %15 = vector.load %arg4[%c0_9, %c0_10] : memref<256x64xf32, #tpu.memory_space<vmem>>, vector<256x64xf32>
      %c0_11 = arith.constant 0 : index
      %c0_12 = arith.constant 0 : index
      %16 = vector.load %arg6[%c0_11, %c0_12] : memref<1x64xf32, #tpu.memory_space<vmem>>, vector<1x64xf32>
      %c0_13 = arith.constant 0 : index
      %17 = memref.load %arg7[%c0_13] : memref<1xf32, #tpu.memory_space<smem>>
      %18 = vector.broadcast %16 : vector<1x64xf32> to vector<256x64xf32>
      %19 = arith.mulf %15, %18 : vector<256x64xf32>
      %cst_14 = arith.constant dense<0.000000e+00> : vector<256xf32>
      %20 = vector.multi_reduction <add>, %19, %cst_14 [1] : vector<256x64xf32> to vector<256xf32>
      %21 = vector.shape_cast %20 : vector<256xf32> to vector<256x1xf32>
      %22 = vector.broadcast %17 : f32 to vector<256x1xf32>
      %23 = arith.addf %21, %22 : vector<256x1xf32>
      %24 = math.tanh %23 : vector<256x1xf32>
      %c0_15 = arith.constant 0 : index
      %c0_16 = arith.constant 0 : index
      %25 = vector.load %arg11[%c0_15, %c0_16] : memref<256x64xf32, #tpu.memory_space<vmem>>, vector<256x64xf32>
      %26 = vector.broadcast %24 : vector<256x1xf32> to vector<256x64xf32>
      %27 = arith.mulf %25, %26 : vector<256x64xf32>
      %28 = arith.truncf %27 : vector<256x64xf32> to vector<256x64xbf16>
      %c0_17 = arith.constant 0 : index
      %c0_18 = arith.constant 0 : index
      %29 = vector.load %arg8[%c0_17, %c0_18] : memref<256x64xbf16, #tpu.memory_space<vmem>>, vector<256x64xbf16>
      tpu.vector_store %arg8[%c0_17, %c0_18], %28 {strides = array<i32>} : memref<256x64xbf16, #tpu.memory_space<vmem>>, vector<256x64xbf16>,
      %30 = arith.addf %27, %15 : vector<256x64xf32>
      %c0_19 = arith.constant 0 : index
      %c0_20 = arith.constant 0 : index
      %31 = vector.load %arg9[%c0_19, %c0_20] : memref<256x64xf32, #tpu.memory_space<vmem>>, vector<256x64xf32>
      tpu.vector_store %arg9[%c0_19, %c0_20], %30 {strides = array<i32>} : memref<256x64xf32, #tpu.memory_space<vmem>>, vector<256x64xf32>,
      %c0_21 = arith.constant 0 : index
      %c0_22 = arith.constant 0 : index
      %32 = vector.load %arg5[%c0_21, %c0_22] : memref<256x64xf32, #tpu.memory_space<vmem>>, vector<256x64xf32>
      %33 = arith.addf %32, %27 : vector<256x64xf32>
      %c0_23 = arith.constant 0 : index
      %c0_24 = arith.constant 0 : index
      %34 = vector.load %arg10[%c0_23, %c0_24] : memref<256x64xf32, #tpu.memory_space<vmem>>, vector<256x64xf32>
      tpu.vector_store %arg10[%c0_23, %c0_24], %33 {strides = array<i32>} : memref<256x64xf32, #tpu.memory_space<vmem>>, vector<256x64xf32>,
    } else {
    }
    return
  }
  func.func @transform_0(%arg0: i32, %arg1: i32) -> (i32, i32) {
    %c0_i32 = arith.constant 0 : i32
    return %arg0, %arg1 : i32, i32
  }
  func.func @transform_1(%arg0: i32, %arg1: i32) -> (i32, i32) {
    %c0_i32 = arith.constant 0 : i32
    %c0_i32_0 = arith.constant 0 : i32
    %c0_i32_1 = arith.constant 0 : i32
    return %c0_i32, %c0_i32_0 : i32, i32
  }
  func.func @transform_2(%arg0: i32, %arg1: i32) -> (i32, i32) {
    %c0_i32 = arith.constant 0 : i32
    %c0_i32_0 = arith.constant 0 : i32
    return %arg0, %c0_i32 : i32, i32
  }
  func.func @transform_3(%arg0: i32, %arg1: i32) -> (i32, i32) {
    %c0_i32 = arith.constant 0 : i32
    %c0_i32_0 = arith.constant 0 : i32
    return %arg0, %c0_i32 : i32, i32
  }
  func.func @transform_4(%arg0: i32, %arg1: i32) -> (i32, i32) {
    %c0_i32 = arith.constant 0 : i32
    %c0_i32_0 = arith.constant 0 : i32
    %c0_i32_1 = arith.constant 0 : i32
    return %c0_i32, %c0_i32_0 : i32, i32
  }
  func.func @transform_5(%arg0: i32, %arg1: i32) -> i32 {
    %c0_i32 = arith.constant 0 : i32
    %c0_i32_0 = arith.constant 0 : i32
    return %c0_i32 : i32
  }
  func.func @transform_6(%arg0: i32, %arg1: i32) -> (i32, i32) {
    %c0_i32 = arith.constant 0 : i32
    %c0_i32_0 = arith.constant 0 : i32
    return %arg0, %c0_i32 : i32, i32
  }
  func.func @transform_7(%arg0: i32, %arg1: i32) -> (i32, i32) {
    %c0_i32 = arith.constant 0 : i32
    %c0_i32_0 = arith.constant 0 : i32
    return %arg0, %c0_i32 : i32, i32
  }
  func.func @transform_8(%arg0: i32, %arg1: i32) -> (i32, i32) {
    %c0_i32 = arith.constant 0 : i32
    %c0_i32_0 = arith.constant 0 : i32
    return %arg0, %c0_i32 : i32, i32
  }
}

module attributes {stable_mosaic.version = 11 : i64} {
  func.func @layer_kernel(%arg0: i32, %arg1: i32, %arg2: memref<256x512xbf16, #tpu.memory_space<vmem>>, %arg3: memref<512x64xbf16, #tpu.memory_space<vmem>>, %arg4: memref<256x64xf32, #tpu.memory_space<vmem>>, %arg5: memref<256x64xf32, #tpu.memory_space<vmem>>, %arg6: memref<1x64xf32, #tpu.memory_space<vmem>>, %arg7: memref<1xf32, #tpu.memory_space<smem>>, %arg8: memref<256x64xbf16, #tpu.memory_space<vmem>>, %arg9: memref<256x64xf32, #tpu.memory_space<vmem>>, %arg10: memref<256x64xf32, #tpu.memory_space<vmem>>, %arg11: memref<256x64xf32, #tpu.memory_space<vmem>>) attributes {dimension_semantics = [#tpu.dimension_semantics<parallel>, #tpu.dimension_semantics<arbitrary>], iteration_bounds = array<i64: 2, 1>, scalar_prefetch = 0 : i64, scratch_operands = 1 : i64, tpu.core_type = #tpu.core_type<tc>, window_params = [{transform_indices = @transform_0, window_bounds = array<i64: 256, 512>}, {pipeline_mode = #tpu.pipeline_mode<synchronous>, transform_indices = @transform_1, window_bounds = array<i64: 512, 64>}, {transform_indices = @transform_2, window_bounds = array<i64: 256, 64>}, {transform_indices = @transform_3, window_bounds = array<i64: 256, 64>}, {pipeline_mode = #tpu.pipeline_mode<synchronous>, transform_indices = @transform_4, window_bounds = array<i64: 1, 64>}, {transform_indices = @transform_5, window_bounds = array<i64: 1>}, {transform_indices = @transform_6, window_bounds = array<i64: 256, 64>}, {transform_indices = @transform_7, window_bounds = array<i64: 256, 64>}, {transform_indices = @transform_8, window_bounds = array<i64: 256, 64>}]} {
    %c0_i32 = arith.constant 0 : i32
    %0 = arith.cmpi eq, %arg1, %c0_i32 : i32
    %1 = arith.extui %0 : i1 to i32
    %c0_i32_0 = arith.constant 0 : i32
    %2 = arith.cmpi ne, %1, %c0_i32_0 : i32
    scf.if %2 {
      %cst_9 = arith.constant 0.000000e+00 : f32
      %15 = vector.broadcast %cst_9 : f32 to vector<256x64xf32>
      %c0_10 = arith.constant 0 : index
      %c0_11 = arith.constant 0 : index
      %16 = vector.load %arg11[%c0_10, %c0_11] : memref<256x64xf32, #tpu.memory_space<vmem>>, vector<256x64xf32>
      tpu.vector_store %arg11[%c0_10, %c0_11], %15 {strides = array<i32>} : memref<256x64xf32, #tpu.memory_space<vmem>>, vector<256x64xf32>,
    } else {
    }
    %c512_i32 = arith.constant 512 : i32
    %3 = arith.muli %arg1, %c512_i32 : i32
    %4 = tpu.assume_multiple %3, 512 : i32
    %5 = arith.index_cast %4 : i32 to index
    %c0 = arith.constant 0 : index
    %6 = vector.load %arg3[%5, %c0] : memref<512x64xbf16, #tpu.memory_space<vmem>>, vector<512x64xbf16>
    %c0_1 = arith.constant 0 : index
    %c0_2 = arith.constant 0 : index
    %7 = vector.load %arg11[%c0_1, %c0_2] : memref<256x64xf32, #tpu.memory_space<vmem>>, vector<256x64xf32>
    %c0_3 = arith.constant 0 : index
    %c0_4 = arith.constant 0 : index
    %8 = vector.load %arg2[%c0_3, %c0_4] : memref<256x512xbf16, #tpu.memory_space<vmem>>, vector<256x512xbf16>
    %cst = arith.constant dense<0.000000e+00> : vector<256x64xf32>
    %9 = tpu.matmul %8, %6, %cst {dimension_numbers = #tpu.dot_dimension_numbers<[1], [0], [0], [1], [0, 0, 1, 1], [], []>} : vector<256x512xbf16>, vector<512x64xbf16>, vector<256x64xf32> -> vector<256x64xf32>
    %10 = arith.addf %7, %9 : vector<256x64xf32>
    %c0_5 = arith.constant 0 : index
    %c0_6 = arith.constant 0 : index
    %11 = vector.load %arg11[%c0_5, %c0_6] : memref<256x64xf32, #tpu.memory_space<vmem>>, vector<256x64xf32>
    tpu.vector_store %arg11[%c0_5, %c0_6], %10 {strides = array<i32>} : memref<256x64xf32, #tpu.memory_space<vmem>>, vector<256x64xf32>,
    %c0_i32_7 = arith.constant 0 : i32
    %12 = arith.cmpi eq, %arg1, %c0_i32_7 : i32
    %13 = arith.extui %12 : i1 to i32
    %c0_i32_8 = arith.constant 0 : i32
    %14 = arith.cmpi ne, %13, %c0_i32_8 : i32
    scf.if %14 {
      %c0_9 = arith.constant 0 : index
      %c0_10 = arith.constant 0 : index
      %15 = vector.load %arg4[%c0_9, %c0_10] : memref<256x64xf32, #tpu.memory_space<vmem>>, vector<256x64xf32>
      %c0_11 = arith.constant 0 : index
      %c0_12 = arith.constant 0 : index
      %16 = vector.load %arg6[%c0_11, %c0_12] : memref<1x64xf32, #tpu.memory_space<vmem>>, vector<1x64xf32>
      %c0_13 = arith.constant 0 : index
      %17 = memref.load %arg7[%c0_13] : memref<1xf32, #tpu.memory_space<smem>>
      %18 = vector.broadcast %16 : vector<1x64xf32> to vector<256x64xf32>
      %19 = arith.mulf %15, %18 : vector<256x64xf32>
      %cst_14 = arith.constant dense<0.000000e+00> : vector<256xf32>
      %20 = vector.multi_reduction <add>, %19, %cst_14 [1] : vector<256x64xf32> to vector<256xf32>
      %21 = vector.shape_cast %20 : vector<256xf32> to vector<256x1xf32>
      %22 = vector.broadcast %17 : f32 to vector<256x1xf32>
      %23 = arith.addf %21, %22 : vector<256x1xf32>
      %24 = math.tanh %23 : vector<256x1xf32>
      %c0_15 = arith.constant 0 : index
      %c0_16 = arith.constant 0 : index
      %25 = vector.load %arg11[%c0_15, %c0_16] : memref<256x64xf32, #tpu.memory_space<vmem>>, vector<256x64xf32>
      %26 = vector.broadcast %24 : vector<256x1xf32> to vector<256x64xf32>
      %27 = arith.mulf %25, %26 : vector<256x64xf32>
      %28 = arith.truncf %27 : vector<256x64xf32> to vector<256x64xbf16>
      %c0_17 = arith.constant 0 : index
      %c0_18 = arith.constant 0 : index
      %29 = vector.load %arg8[%c0_17, %c0_18] : memref<256x64xbf16, #tpu.memory_space<vmem>>, vector<256x64xbf16>
      tpu.vector_store %arg8[%c0_17, %c0_18], %28 {strides = array<i32>} : memref<256x64xbf16, #tpu.memory_space<vmem>>, vector<256x64xbf16>,
      %30 = arith.addf %27, %15 : vector<256x64xf32>
      %c0_19 = arith.constant 0 : index
      %c0_20 = arith.constant 0 : index
      %31 = vector.load %arg9[%c0_19, %c0_20] : memref<256x64xf32, #tpu.memory_space<vmem>>, vector<256x64xf32>
      tpu.vector_store %arg9[%c0_19, %c0_20], %30 {strides = array<i32>} : memref<256x64xf32, #tpu.memory_space<vmem>>, vector<256x64xf32>,
      %c0_21 = arith.constant 0 : index
      %c0_22 = arith.constant 0 : index
      %32 = vector.load %arg5[%c0_21, %c0_22] : memref<256x64xf32, #tpu.memory_space<vmem>>, vector<256x64xf32>
      %33 = arith.addf %32, %27 : vector<256x64xf32>
      %cst_23 = arith.constant 2.500000e-01 : f32
      %34 = vector.broadcast %cst_23 : f32 to vector<256x64xf32>
      %35 = arith.mulf %33, %34 : vector<256x64xf32>
      %c0_24 = arith.constant 0 : index
      %c0_25 = arith.constant 0 : index
      %36 = vector.load %arg10[%c0_24, %c0_25] : memref<256x64xf32, #tpu.memory_space<vmem>>, vector<256x64xf32>
      tpu.vector_store %arg10[%c0_24, %c0_25], %35 {strides = array<i32>} : memref<256x64xf32, #tpu.memory_space<vmem>>, vector<256x64xf32>,
    } else {
    }
    return
  }
  func.func @transform_0(%arg0: i32, %arg1: i32) -> (i32, i32) {
    %c0_i32 = arith.constant 0 : i32
    return %arg0, %arg1 : i32, i32
  }
  func.func @transform_1(%arg0: i32, %arg1: i32) -> (i32, i32) {
    %c0_i32 = arith.constant 0 : i32
    %c0_i32_0 = arith.constant 0 : i32
    %c0_i32_1 = arith.constant 0 : i32
    return %c0_i32, %c0_i32_0 : i32, i32
  }
  func.func @transform_2(%arg0: i32, %arg1: i32) -> (i32, i32) {
    %c0_i32 = arith.constant 0 : i32
    %c0_i32_0 = arith.constant 0 : i32
    return %arg0, %c0_i32 : i32, i32
  }
  func.func @transform_3(%arg0: i32, %arg1: i32) -> (i32, i32) {
    %c0_i32 = arith.constant 0 : i32
    %c0_i32_0 = arith.constant 0 : i32
    return %arg0, %c0_i32 : i32, i32
  }
  func.func @transform_4(%arg0: i32, %arg1: i32) -> (i32, i32) {
    %c0_i32 = arith.constant 0 : i32
    %c0_i32_0 = arith.constant 0 : i32
    %c0_i32_1 = arith.constant 0 : i32
    return %c0_i32, %c0_i32_0 : i32, i32
  }
  func.func @transform_5(%arg0: i32, %arg1: i32) -> i32 {
    %c0_i32 = arith.constant 0 : i32
    %c0_i32_0 = arith.constant 0 : i32
    return %c0_i32 : i32
  }
  func.func @transform_6(%arg0: i32, %arg1: i32) -> (i32, i32) {
    %c0_i32 = arith.constant 0 : i32
    %c0_i32_0 = arith.constant 0 : i32
    return %arg0, %c0_i32 : i32, i32
  }
  func.func @transform_7(%arg0: i32, %arg1: i32) -> (i32, i32) {
    %c0_i32 = arith.constant 0 : i32
    %c0_i32_0 = arith.constant 0 : i32
    return %arg0, %c0_i32 : i32, i32
  }
  func.func @transform_8(%arg0: i32, %arg1: i32) -> (i32, i32) {
    %c0_i32 = arith.constant 0 : i32
    %c0_i32_0 = arith.constant 0 : i32
    return %arg0, %c0_i32 : i32, i32
  }
}

</mosaic_0001>

<bundles_post_ra>
// kernel: n2_lightgcn_forward.4
= control target key start
LH: loop header
LB: loop body
LE: loop exit
PB: predicated region body
PF: predicated region fallthrough
CT: control target
= control target key end

     0   :  { %s1662_s9 = smov 0   ;;  %s1664_s10 = smov 0   ;;  %s2013_s0 = inlined_call_operand.vmem [shape: bf16[512,384], index: 0, kind: input, shape index: {}]   ;;  %s2014_s1 = inlined_call_operand.vmem [shape: bf16[384,64], index: 1, kind: input, shape index: {}]   ;;  %s2015_s2 = inlined_call_operand.vmem [shape: f32[512,64], index: 2, kind: output, shape index: {}]  }
   0x1   :  { %s1666_s11 = smov 0  }
   0x2 LB: > { %s24_s12 = sadd.s32 1, %s1640_s10  ;;  %p1229_p0 = scmp.ge.s32.totalorder %s1644_s11, 1  ;;  %s1644_s11 = sphi %s1666_s11, %s12_s11   ;;  %s1640_s10 = sphi %s1664_s10, %s2017_s10   ;;  %s1636_s9 = sphi %s1662_s9, %s2016_s9  }
   0x3   : > { %p26_p1 = scmp.ge.s32.totalorder %s24_s12, 2  ;;  %p133_p2 = scmp.lt.s32.totalorder %s1644_s11, 3 }
   0x5   : > { %s2019_s12 = smov (%p26_p1, %s24_s12), 0  ;;  %p134_p3 = pnand %p1229_p0, %p133_p2 }
   0x6   : > { %v1534_v0 = vld [vmem:[%s2014_s1 + $0x40] sm:$0xff] (!%p134_p3)   ;;  %s1230_s15 = sshll.u32 (!%p134_p3), %s1636_s9, 5  ;;  %v1536_v2 = vld [vmem:[%s2014_s1 + $0x48] sm:$0xff] (!%p134_p3)   ;;  %v1538_v4 = vld [vmem:[%s2014_s1 + $0x50] sm:$0xff] (!%p134_p3)   ;;  %vm183_vm0 = vcmask (!%p134_p3), 523264  }
   0x7   : > { %137 = sbr.rel (%p134_p3) target bundleno = 349 (0x15d), region = 28  ;;  %v1535_v1 = vld [vmem:[%s2014_s1] sm:$0xff] (!%p134_p3)   ;;  %1308 = vmatprep.subr.bf16.mxu0 (!%p134_p3), %v1534_v0  ;;  %1492 = vmatprep.subr.bf16.mxu1 (!%p134_p3), %v1534_v0  ;;  %p162_p4 = scmp.lt.s32.totalorder (!%p134_p3), %s1230_s15, 63  ;;  %v1537_v3 = vld [vmem:[%s2014_s1 + $0x8] sm:$0xff] (!%p134_p3)   ;;  %v1539_v5 = vld [vmem:[%s2014_s1 + $0x10] sm:$0xff] (!%p134_p3)  }
   0x8   : > { %1309 = vmatpush3.bf16.msra.mxu0 (!%p134_p3), %v1535_v1  ;;  %1500 = vmatpush3.bf16.msra.mxu1 (!%p134_p3), %v1535_v1  ;;  %v1540_v6 = vld [vmem:[%s2014_s1 + $0x58] sm:$0xff] (!%p134_p3)   ;;  %v1542_v8 = vld [vmem:[%s2014_s1 + $0x60] sm:$0xff] (!%p134_p3)   ;;  %v1544_v10 = vld [vmem:[%s2014_s1 + $0x68] sm:$0xff] (!%p134_p3)  }
   0x9   : > { %1310 = vmatprep.subr.bf16.mxu0 (!%p134_p3), %v1536_v2  ;;  %1493 = vmatprep.subr.bf16.mxu1 (!%p134_p3), %v1536_v2  ;;  %v1541_v7 = vld [vmem:[%s2014_s1 + $0x18] sm:$0xff] (!%p134_p3)   ;;  %v1543_v9 = vld [vmem:[%s2014_s1 + $0x20] sm:$0xff] (!%p134_p3)   ;;  %v1545_v13 = vld [vmem:[%s2014_s1 + $0x28] sm:$0xff] (!%p134_p3)  }
   0xa   : > { %v1546_v14 = vld [vmem:[%s2014_s1 + $0x70] sm:$0xff] (!%p134_p3)   ;;  %v1548_v16 = vld [vmem:[%s2014_s1 + $0x78] sm:$0xff] (!%p134_p3)   ;;  %v1556_v18 = vld [vmem:[%s2014_s1 + $0x80] sm:$0xff] (!%p134_p3)  }
   0xb   : > { %v1547_v15 = vld [vmem:[%s2014_s1 + $0x30] sm:$0xff] (!%p134_p3)   ;;  %v1549_v17 = vld [vmem:[%s2014_s1 + $0x38] sm:$0xff] (!%p134_p3)   ;;  %v1557_v22 = vld [vmem:[%s2014_s1 + $0x88] sm:$0xff] (!%p134_p3)  }
   0xc   : > { %1311 = vmatpush3.bf16.msra.mxu0 (!%p134_p3), %v1537_v3  ;;  %1501 = vmatpush3.bf16.msra.mxu1 (!%p134_p3), %v1537_v3  ;;  %v1564_v25 = vld [vmem:[%s2014_s1 + $0x90] sm:$0xff] (!%p134_p3)   ;;  %v1565_v27 = vld [vmem:[%s2014_s1 + $0x98] sm:$0xff] (!%p134_p3)   ;;  %v1572_v30 = vld [vmem:[%s2014_s1 + $0xa0] sm:$0xff] (!%p134_p3)  }
   0xd   : > { %1312 = vmatprep.subr.bf16.mxu0 (!%p134_p3), %v1538_v4  ;;  %1494 = vmatprep.subr.bf16.mxu1 (!%p134_p3), %v1538_v4  ;;  %v1573_v33 = vld [vmem:[%s2014_s1 + $0xa8] sm:$0xff] (!%p134_p3)   ;;  %v1580_v36 = vld [vmem:[%s2014_s1 + $0xb0] sm:$0xff] (!%p134_p3)   ;;  %v1581_v40 = vld [vmem:[%s2014_s1 + $0xb8] sm:$0xff] (!%p134_p3)  }
   0xe   : > { %s2021_s15 = smov (!%p162_p4, %s1230_s15), 63 }
   0xf   : > { %s1508_s28 = smul.u32 12, %s2021_s15  ;;  %s1233_s19 = sshll.u32 %s2021_s15, 3 }
  0x10   : > { %1313 = vmatpush3.bf16.msra.mxu0 %v1539_v5  ;;  %1502 = vmatpush3.bf16.msra.mxu1 %v1539_v5  ;;  %s1812_s22 = scalar_lea.vmem %s2015_s2, %s1233_s19 }
  0x11   : > { %1314 = vmatprep.subr.bf16.mxu0 %v1540_v6  ;;  %1495 = vmatprep.subr.bf16.mxu1 %v1540_v6  ;;  %s1713_s7 = scalar_lea.vmem %s2013_s0, %s1508_s28 }
  0x12   : > { %v1552_v11 = vld [vmem:[%s1713_s7 + $0x4] ss:$12 sps:$4 sm:$0xff]   ;;  %v1550_v19 = vld [vmem:[%s1713_s7] ss:$12 sps:$4 sm:$0xff]   ;;  %v1558_v21 = vld [vmem:[%s1713_s7 + $0x1c] ss:$12 sps:$4 sm:$0xff]  }
  0x13   : > { %v1555_v12 = vld [vmem:[%s1713_s7 + $0x124] ss:$12 sps:$4 sm:$0xff]   ;;  %797 = vmatprep.mubr.bf16.mxu0 %v1552_v11  ;;  %v1553_v20 = vld [vmem:[%s1713_s7 + $0x120] ss:$12 sps:$4 sm:$0xff]   ;;  %v1560_v23 = vld [vmem:[%s1713_s7 + $0x13c] ss:$12 sps:$4 sm:$0xff]  }
  0x14   : > { %1315 = vmatpush3.bf16.msra.mxu0 %v1541_v7  ;;  %1503 = vmatpush3.bf16.msra.mxu1 %v1541_v7  ;;  %v1562_v24 = vld [vmem:[%s1713_s7 + $0x18] ss:$12 sps:$4 sm:$0xff]   ;;  %v1566_v28 = vld [vmem:[%s1713_s7 + $0x34] ss:$12 sps:$4 sm:$0xff]   ;;  %v1570_v31 = vld [vmem:[%s1713_s7 + $0x30] ss:$12 sps:$4 sm:$0xff]  }
  0x15   : > { %1316 = vmatprep.subr.bf16.mxu0 %v1542_v8  ;;  %1496 = vmatprep.subr.bf16.mxu1 %v1542_v8  ;;  %v1563_v26 = vld [vmem:[%s1713_s7 + $0x138] ss:$12 sps:$4 sm:$0xff]   ;;  %v1568_v29 = vld [vmem:[%s1713_s7 + $0x154] ss:$12 sps:$4 sm:$0xff]   ;;  %v1571_v32 = vld [vmem:[%s1713_s7 + $0x150] ss:$12 sps:$4 sm:$0xff]  }
  0x16   : > { %893 = vmatprep.mubr.bf16.mxu1 %v1555_v12  ;;  %v1574_v34 = vld [vmem:[%s1713_s7 + $0x4c] ss:$12 sps:$4 sm:$0xff]   ;;  %v1578_v37 = vld [vmem:[%s1713_s7 + $0x48] ss:$12 sps:$4 sm:$0xff]   ;;  %v1582_v39 = vld [vmem:[%s1713_s7 + $0x64] ss:$12 sps:$4 sm:$0xff]  }
  0x17   : > { %v1576_v35 = vld [vmem:[%s1713_s7 + $0x16c] ss:$12 sps:$4 sm:$0xff]   ;;  %v1579_v38 = vld [vmem:[%s1713_s7 + $0x168] ss:$12 sps:$4 sm:$0xff]   ;;  %v1591_v47 = vld [vmem:[%s1713_s7 + $0x50] ss:$12 sps:$4 sm:$0xff]  }
  0x18   : > { %1317 = vmatpush3.bf16.msra.mxu0 %v1543_v9  ;;  %1504 = vmatpush3.bf16.msra.mxu1 %v1543_v9  ;;  %v1584_v41 = vld [vmem:[%s1713_s7 + $0x8] ss:$12 sps:$4 sm:$0xff]   ;;  %v1585_v42 = vld [vmem:[%s1713_s7 + $0x60] ss:$12 sps:$4 sm:$0xff]   ;;  %v1589_v45 = vld [vmem:[%s1713_s7 + $0x38] ss:$12 sps:$4 sm:$0xff]  }
  0x19   : > { %1318 = vmatprep.subr.bf16.mxu0 %v1544_v10  ;;  %1497 = vmatprep.subr.bf16.mxu1 %v1544_v10  ;;  %v1586_v43 = vld [vmem:[%s1713_s7 + $0x20] ss:$12 sps:$4 sm:$0xff]   ;;  %v1587_v44 = vld [vmem:[%s1713_s7 + $0x7c] ss:$12 sps:$4 sm:$0xff]   ;;  %v1590_v46 = vld [vmem:[%s1713_s7 + $0x78] ss:$12 sps:$4 sm:$0xff]  }
  0x1a   : > { %v1592_v48 = vld [vmem:[%s1713_s7 + $0x94] ss:$12 sps:$4 sm:$0xff]   ;;  %v1595_v50 = vld [vmem:[%s1713_s7 + $0x90] ss:$12 sps:$4 sm:$0xff]   ;;  %v1597_v52 = vld [vmem:[%s1713_s7 + $0xac] ss:$12 sps:$4 sm:$0xff]  }
  0x1b   : > { %v1594_v49 = vld [vmem:[%s1713_s7 + $0x68] ss:$12 sps:$4 sm:$0xff]   ;;  %v1596_v51 = vld [vmem:[%s1713_s7 + $0x80] ss:$12 sps:$4 sm:$0xff]   ;;  %v1599_v53 = vld [vmem:[%s1713_s7 + $0x98] ss:$12 sps:$4 sm:$0xff]  }
  0x1c   : > { %1319 = vmatpush3.bf16.msra.mxu0 %v1545_v13  ;;  %1505 = vmatpush3.bf16.msra.mxu1 %v1545_v13  ;;  %v1600_v54 = vld [vmem:[%s1713_s7 + $0xa8] ss:$12 sps:$4 sm:$0xff]   ;;  %v1601_v55 = vld [vmem:[%s1713_s7 + $0xb0] ss:$12 sps:$4 sm:$0xff]   ;;  %v1605_v58 = vld [vmem:[%s1713_s7 + $0xc0] ss:$12 sps:$4 sm:$0xff]  }
  0x1d   : > { %1320 = vmatprep.subr.bf16.mxu0 %v1546_v14  ;;  %1498 = vmatprep.subr.bf16.mxu1 %v1546_v14  ;;  %v1602_v56 = vld [vmem:[%s1713_s7 + $0xc4] ss:$12 sps:$4 sm:$0xff]   ;;  %v1604_v57 = vld [vmem:[%s1713_s7 + $0xc8] ss:$12 sps:$4 sm:$0xff]   ;;  %v1606_v59 = vld [vmem:[%s1713_s7 + $0xe0] ss:$12 sps:$4 sm:$0xff]  }
  0x1e   : > { %v1607_v60 = vld [vmem:[%s1713_s7 + $0xdc] ss:$12 sps:$4 sm:$0xff]   ;;  %v1609_v61 = vld [vmem:[%s1713_s7 + $0xf8] ss:$12 sps:$4 sm:$0xff]   ;;  %v1612_v0 = vld [vmem:[%s1713_s7 + $0xf4] ss:$12 sps:$4 sm:$0xff]  }
  0x1f   : > { %v1610_v62 = vld [vmem:[%s1713_s7 + $0xd8] ss:$12 sps:$4 sm:$0xff]   ;;  %v1611_v63 = vld [vmem:[%s1713_s7 + $0x110] ss:$12 sps:$4 sm:$0xff]   ;;  %v1614_v1 = vld [vmem:[%s1713_s7 + $0x128] ss:$12 sps:$4 sm:$0xff]  }
  0x20   : > { %1321 = vmatpush3.bf16.msra.mxu0 %v1547_v15  ;;  %1506 = vmatpush3.bf16.msra.mxu1 %v1547_v15  ;;  %v1615_v2 = vld [vmem:[%s1713_s7 + $0xf0] ss:$12 sps:$4 sm:$0xff]   ;;  %v1616_v3 = vld [vmem:[%s1713_s7 + $0x140] ss:$12 sps:$4 sm:$0xff]   ;;  %v1619_v5 = vld [vmem:[%s1713_s7 + $0x158] ss:$12 sps:$4 sm:$0xff]  }
  0x21   : > { %1322 = vmatprep.subr.bf16.mxu0 %v1548_v16  ;;  %1499 = vmatprep.subr.bf16.mxu1 %v1548_v16  ;;  %v1617_v4 = vld [vmem:[%s1713_s7 + $0x10c] ss:$12 sps:$4 sm:$0xff]   ;;  %v1620_v6 = vld [vmem:[%s1713_s7 + $0x108] ss:$12 sps:$4 sm:$0xff]   ;;  %v1621_v7 = vld [vmem:[%s1713_s7 + $0x170] ss:$12 sps:$4 sm:$0xff]  }
  0x22   : > { %v1646_v8 = vmov 0.0  }
  0x23   : > { %186 = vst.msk [vmem:[%s1812_s22 + $0x10] sm:$0xff] %vm183_vm0, %v1646_v8  ;;  %184 = vst.msk [vmem:[%s1812_s22] sm:$0xff] %vm183_vm0, %v1646_v8 }
  0x24   : > { %1323 = vmatpush3.bf16.msra.mxu0 %v1549_v17  ;;  %1507 = vmatpush3.bf16.msra.mxu1 %v1549_v17  ;;  %185 = vst.msk [vmem:[%s1812_s22 + $0x8] sm:$0xff] %vm183_vm0, %v1646_v8  ;;  %187 = vst.msk [vmem:[%s1812_s22 + $0x18] sm:$0xff] %vm183_vm0, %v1646_v8 }
  0x25   : > { %1444 = vmatprep.subr.bf16.mxu1 %v1556_v18  ;;  %188 = vst.msk [vmem:[%s1812_s22 + $0x20] sm:$0xff] %vm183_vm0, %v1646_v8  ;;  %189 = vst.msk [vmem:[%s1812_s22 + $0x28] sm:$0xff] %vm183_vm0, %v1646_v8 }
  0x26   : > { %190 = vst.msk [vmem:[%s1812_s22 + $0x30] sm:$0xff] %vm183_vm0, %v1646_v8  ;;  %191 = vst.msk [vmem:[%s1812_s22 + $0x38] sm:$0xff] %vm183_vm0, %v1646_v8 }
  0x27   : > { %798 = vmatmul.mubr.bf16.vlgmr.msra.gmra.mrb[0].mxu0 %v1550_v19  ;;  %894 = vmatmul.mubr.bf16.vlgmr.msra.gmra.mrb[0].mxu1 %v1553_v20  ;;  %192 = vst.msk [vmem:[%s1812_s22 + $0x40] sm:$0xff] %vm183_vm0, %v1646_v8  ;;  %193 = vst.msk [vmem:[%s1812_s22 + $0x48] sm:$0xff] %vm183_vm0, %v1646_v8 }
  0x28   : > { %1445 = vmatpush3.bf16.msra.mxu1 %v1556_v18  ;;  %805 = vmatprep.mubr.bf16.mxu0 %v1558_v21  ;;  %194 = vst.msk [vmem:[%s1812_s22 + $0x50] sm:$0xff] %vm183_vm0, %v1646_v8  ;;  %195 = vst.msk [vmem:[%s1812_s22 + $0x58] sm:$0xff] %vm183_vm0, %v1646_v8 }
  0x29   : > { %1446 = vmatprep.subr.bf16.mxu1 %v1557_v22  ;;  %901 = vmatprep.mubr.bf16.mxu1 %v1560_v23  ;;  %196 = vst.msk [vmem:[%s1812_s22 + $0x60] sm:$0xff] %vm183_vm0, %v1646_v8  ;;  %197 = vst.msk [vmem:[%s1812_s22 + $0x68] sm:$0xff] %vm183_vm0, %v1646_v8 }
  0x2a   : > { %198 = vst.msk [vmem:[%s1812_s22 + $0x70] sm:$0xff] %vm183_vm0, %v1646_v8  ;;  %199 = vst.msk [vmem:[%s1812_s22 + $0x78] sm:$0xff] %vm183_vm0, %v1646_v8 }
  0x2b   : > { %200 = vst.msk [vmem:[%s1812_s22 + $0x80] sm:$0xff] %vm183_vm0, %v1646_v8  ;;  %201 = vst.msk [vmem:[%s1812_s22 + $0x88] sm:$0xff] %vm183_vm0, %v1646_v8 }
  0x2c   : > { %1447 = vmatpush3.bf16.msra.mxu1 %v1557_v22  ;;  %202 = vst.msk [vmem:[%s1812_s22 + $0x90] sm:$0xff] %vm183_vm0, %v1646_v8  ;;  %203 = vst.msk [vmem:[%s1812_s22 + $0x98] sm:$0xff] %vm183_vm0, %v1646_v8 }
  0x2d   : > { %1448 = vmatprep.subr.bf16.mxu1 %v1564_v25  ;;  %204 = vst.msk [vmem:[%s1812_s22 + $0xa0] sm:$0xff] %vm183_vm0, %v1646_v8  ;;  %205 = vst.msk [vmem:[%s1812_s22 + $0xa8] sm:$0xff] %vm183_vm0, %v1646_v8 }
  0x2e   : > { %206 = vst.msk [vmem:[%s1812_s22 + $0xb0] sm:$0xff] %vm183_vm0, %v1646_v8  ;;  %207 = vst.msk [vmem:[%s1812_s22 + $0xb8] sm:$0xff] %vm183_vm0, %v1646_v8 }
  0x2f   : > { %806 = vmatmul.mubr.bf16.gmra.mrb[4].mxu0 %v1562_v24  ;;  %902 = vmatmul.mubr.bf16.gmra.mrb[4].mxu1 %v1563_v26  ;;  %208 = vst.msk [vmem:[%s1812_s22 + $0xc0] sm:$0xff] %vm183_vm0, %v1646_v8  ;;  %209 = vst.msk [vmem:[%s1812_s22 + $0xc8] sm:$0xff] %vm183_vm0, %v1646_v8 }
  0x30   : > { %1449 = vmatpush3.bf16.msra.mxu1 %v1564_v25  ;;  %813 = vmatprep.mubr.bf16.mxu0 %v1566_v28  ;;  %210 = vst.msk [vmem:[%s1812_s22 + $0xd0] sm:$0xff] %vm183_vm0, %v1646_v8  ;;  %211 = vst.msk [vmem:[%s1812_s22 + $0xd8] sm:$0xff] %vm183_vm0, %v1646_v8 }
  0x31   : > { %1450 = vmatprep.subr.bf16.mxu1 %v1565_v27  ;;  %909 = vmatprep.mubr.bf16.mxu1 %v1568_v29  ;;  %212 = vst.msk [vmem:[%s1812_s22 + $0xe0] sm:$0xff] %vm183_vm0, %v1646_v8  ;;  %213 = vst.msk [vmem:[%s1812_s22 + $0xe8] sm:$0xff] %vm183_vm0, %v1646_v8 }
  0x32   : > { %214 = vst.msk [vmem:[%s1812_s22 + $0xf0] sm:$0xff] %vm183_vm0, %v1646_v8  ;;  %215 = vst.msk [vmem:[%s1812_s22 + $0xf8] sm:$0xff] %vm183_vm0, %v1646_v8  ;;  %v270_v8 = vld [vmem:[%s1812_s22 + $0x8] sm:$0xff] }
  0x34   : > { %1451 = vmatpush3.bf16.msra.mxu1 %v1565_v27 }
  0x35   : > { %1452 = vmatprep.subr.bf16.mxu1 %v1572_v30 }
  0x37   : > { %814 = vmatmul.mubr.bf16.gmra.mrb[8].mxu0 %v1570_v31  ;;  %910 = vmatmul.mubr.bf16.gmra.mrb[8].mxu1 %v1571_v32 }
  0x38   : > { %1453 = vmatpush3.bf16.msra.mxu1 %v1572_v30  ;;  %821 = vmatprep.mubr.bf16.mxu0 %v1574_v34 }
  0x39   : > { %1454 = vmatprep.subr.bf16.mxu1 %v1573_v33  ;;  %917 = vmatprep.mubr.bf16.mxu1 %v1576_v35 }
  0x3c   : > { %1455 = vmatpush3.bf16.msra.mxu1 %v1573_v33 }
  0x3d   : > { %1456 = vmatprep.subr.bf16.mxu1 %v1580_v36 }
  0x3f   : > { %822 = vmatmul.mubr.bf16.gmra.mrb[12].mxu0 %v1578_v37  ;;  %918 = vmatmul.mubr.bf16.gmra.mrb[12].mxu1 %v1579_v38 }
  0x40   : > { %1457 = vmatpush3.bf16.msra.mxu1 %v1580_v36  ;;  %829 = vmatprep.mubr.bf16.mxu0 %v1582_v39 }
  0x41   : > { %1458 = vmatprep.subr.bf16.mxu1 %v1581_v40  ;;  %1460 = vmatprep.mubr.bf16.mxu1 %v1584_v41 }
  0x44   : > { %1459 = vmatpush3.bf16.msra.mxu1 %v1581_v40 }
  0x47   : > { %830 = vmatmul.mubr.bf16.gmra.mrb[16].mxu0 %v1585_v42  ;;  %1461 = vmatmul.mubr.bf16.vlgmr.msra.gmra.mrb[16].mxu1 %v1586_v43 }
  0x48   : > { %837 = vmatprep.mubr.bf16.mxu0 %v1587_v44  ;;  %1464 = vmatprep.mubr.bf16.mxu1 %v1589_v45 }
  0x4f   : > { %838 = vmatmul.mubr.bf16.gmra.mrb[20].mxu0 %v1590_v46  ;;  %1465 = vmatmul.mubr.bf16.gmra.mrb[20].mxu1 %v1591_v47 }
  0x50   : > { %845 = vmatprep.mubr.bf16.mxu0 %v1592_v48  ;;  %1468 = vmatprep.mubr.bf16.mxu1 %v1594_v49 }
  0x57   : > { %846 = vmatmul.mubr.bf16.gmra.mrb[24].mxu0 %v1595_v50  ;;  %1469 = vmatmul.mubr.bf16.gmra.mrb[24].mxu1 %v1596_v51 }
  0x58   : > { %853 = vmatprep.mubr.bf16.mxu0 %v1597_v52  ;;  %1472 = vmatprep.mubr.bf16.mxu1 %v1599_v53 }
  0x5f   : > { %854 = vmatmul.mubr.bf16.gmra.mrb[28].mxu0 %v1600_v54  ;;  %1473 = vmatmul.mubr.bf16.gmra.mrb[28].mxu1 %v1601_v55 }
  0x60   : > { %861 = vmatprep.mubr.bf16.mxu0 %v1602_v56  ;;  %1476 = vmatprep.mubr.bf16.mxu1 %v1604_v57 }
  0x67   : > { %862 = vmatmul.mubr.bf16.gmra.mrb[32].mxu0 %v1605_v58  ;;  %1477 = vmatmul.mubr.bf16.gmra.mrb[32].mxu1 %v1606_v59  ;;  %v271_v58 = vld [vmem:[%s1812_s22 + $0x10] sm:$0xff] }
  0x68   : > { %869 = vmatprep.mubr.bf16.mxu0 %v1607_v60  ;;  %1480 = vmatprep.mubr.bf16.mxu1 %v1609_v61 }
  0x6f   : > { %870 = vmatmul.mubr.bf16.gmra.mrb[36].mxu0 %v1610_v62  ;;  %1481 = vmatmul.mubr.bf16.gmra.mrb[36].mxu1 %v1611_v63  ;;  %v269_v62 = vld [vmem:[%s1812_s22] sm:$0xff] }
  0x70   : > { %877 = vmatprep.mubr.bf16.mxu0 %v1612_v0  ;;  %1484 = vmatprep.mubr.bf16.mxu1 %v1614_v1 }
  0x77   : > { %878 = vmatmul.mubr.bf16.gmra.mrb[40].mxu0 %v1615_v2  ;;  %1485 = vmatmul.mubr.bf16.gmra.mrb[40].mxu1 %v1616_v3  ;;  %v272_v3 = vld [vmem:[%s1812_s22 + $0x18] sm:$0xff] }
  0x78   : > { %885 = vmatprep.mubr.bf16.mxu0 %v1617_v4  ;;  %1488 = vmatprep.mubr.bf16.mxu1 %v1619_v5 }
  0x7f   : > { %886 = vmatmul.mubr.bf16.gmra.mrb[44].mxu0 %v1620_v6  ;;  %1489 = vmatmul.mubr.bf16.gmra.mrb[44].mxu1 %v1621_v7 }
  0xfa   : > { %v1324_v9 = vpop.f32.mrb[0].mxu0  ;;  %v1396_v10 = vpop.f32.mrb[0].mxu1 }
  0xfb   : > { %v1325_v11 = vpop.f32.mrb[1].mxu0  ;;  %v1397_v12 = vpop.f32.mrb[1].mxu1 }
  0xfc   : > { %v1326_v13 = vadd.f32 %v1325_v11, %v1324_v9  ;;  %v1878_v14 = vadd.f32 %v1397_v12, %v1396_v10  ;;  %v1327_v15 = vpop.f32.mrb[2].mxu0  ;;  %v1399_v16 = vpop.f32.mrb[2].mxu1 }
  0xfd   : > { %v1328_v17 = vpop.f32.mrb[3].mxu0  ;;  %v1400_v18 = vpop.f32.mrb[3].mxu1 }
  0xfe   : > { %v1329_v19 = vadd.f32 %v1328_v17, %v1327_v15  ;;  %v1880_v20 = vadd.f32 %v1400_v18, %v1399_v16  ;;  %v275_v17 = vld [vmem:[%s1812_s22 + $0x30] sm:$0xff] }
 0x102   : > { %v1330_v21 = vpop.f32.mrb[4].mxu0  ;;  %v1402_v22 = vpop.f32.mrb[4].mxu1 }
 0x103   : > { %v1331_v23 = vpop.f32.mrb[5].mxu0  ;;  %v1403_v24 = vpop.f32.mrb[5].mxu1 }
 0x104   : > { %v1332_v25 = vadd.f32 %v1331_v23, %v1330_v21  ;;  %v1882_v26 = vadd.f32 %v1403_v24, %v1402_v22  ;;  %v1333_v27 = vpop.f32.mrb[6].mxu0  ;;  %v1405_v28 = vpop.f32.mrb[6].mxu1  ;;  %v273_v23 = vld [vmem:[%s1812_s22 + $0x20] sm:$0xff] }
 0x105   : > { %v1334_v29 = vpop.f32.mrb[7].mxu0  ;;  %v1406_v30 = vpop.f32.mrb[7].mxu1 }
 0x106   : > { %v1335_v31 = vadd.f32 %v1334_v29, %v1333_v27  ;;  %v1884_v32 = vadd.f32 %v1406_v30, %v1405_v28  ;;  %v276_v28 = vld [vmem:[%s1812_s22 + $0x38] sm:$0xff] }
 0x10a   : > { %v1336_v33 = vpop.f32.mrb[8].mxu0  ;;  %v1408_v34 = vpop.f32.mrb[8].mxu1 }
 0x10b   : > { %v1337_v35 = vpop.f32.mrb[9].mxu0  ;;  %v1409_v36 = vpop.f32.mrb[9].mxu1 }
 0x10c   : > { %v1338_v37 = vadd.f32 %v1337_v35, %v1336_v33  ;;  %v1886_v38 = vadd.f32 %v1409_v36, %v1408_v34  ;;  %v1339_v39 = vpop.f32.mrb[10].mxu0  ;;  %v1411_v40 = vpop.f32.mrb[10].mxu1  ;;  %v274_v34 = vld [vmem:[%s1812_s22 + $0x28] sm:$0xff] }
 0x10d   : > { %v1340_v41 = vpop.f32.mrb[11].mxu0  ;;  %v1412_v42 = vpop.f32.mrb[11].mxu1 }
 0x10e   : > { %v1341_v43 = vadd.f32 %v1340_v41, %v1339_v39  ;;  %v1888_v44 = vadd.f32 %v1412_v42, %v1411_v40 }
 0x112   : > { %v1342_v45 = vpop.f32.mrb[12].mxu0  ;;  %v1414_v46 = vpop.f32.mrb[12].mxu1 }
 0x113   : > { %v1343_v47 = vpop.f32.mrb[13].mxu0  ;;  %v1415_v48 = vpop.f32.mrb[13].mxu1 }
 0x114   : > { %v1344_v49 = vadd.f32 %v1343_v47, %v1342_v45  ;;  %v1890_v50 = vadd.f32 %v1415_v48, %v1414_v46  ;;  %v1345_v51 = vpop.f32.mrb[14].mxu0  ;;  %v1417_v52 = vpop.f32.mrb[14].mxu1  ;;  %v279_v45 = vld [vmem:[%s1812_s22 + $0x50] sm:$0xff] }
 0x115   : > { %v1346_v53 = vpop.f32.mrb[15].mxu0  ;;  %v1418_v54 = vpop.f32.mrb[15].mxu1 }
 0x116   : > { %v1347_v55 = vadd.f32 %v1346_v53, %v1345_v51  ;;  %v1892_v56 = vadd.f32 %v1418_v54, %v1417_v52  ;;  %v280_v54 = vld [vmem:[%s1812_s22 + $0x58] sm:$0xff] }
 0x11a   : > { %v1348_v57 = vpop.f32.mrb[16].mxu0  ;;  %v1462_v59 = vpop.f32.mrb[16].mxu1 }
 0x11b   : > { %v969_v60 = vadd.f32 %v1462_v59, %v1332_v25  ;;  %v1349_v61 = vpop.f32.mrb[17].mxu0  ;;  %v960_v63 = vpop.f32.mrb[17].mxu1 }
 0x11c   : > { %v1350_v0 = vadd.f32 %v1349_v61, %v1348_v57  ;;  %v961_v1 = vadd.f32 %v1326_v13, %v960_v63  ;;  %v1351_v2 = vpop.f32.mrb[18].mxu0  ;;  %v1463_v4 = vpop.f32.mrb[18].mxu1 }
 0x11d   : > { %v1089_v5 = vadd.f32 %v969_v60, %v271_v58  ;;  %v972_v6 = vadd.f32 %v1463_v4, %v1335_v31  ;;  %v1352_v7 = vpop.f32.mrb[19].mxu0  ;;  %v963_v9 = vpop.f32.mrb[19].mxu1  ;;  %v278_v60 = vld [vmem:[%s1812_s22 + $0x48] sm:$0xff] }
 0x11e   : > { %v1087_v10 = vadd.f32 %v961_v1, %v269_v62  ;;  %v1353_v11 = vadd.f32 %v1352_v7, %v1351_v2  ;;  %v964_v12 = vadd.f32 %v1329_v19, %v963_v9 }
 0x11f   : > { %1122 = vst.msk [vmem:[%s1812_s22 + $0x10] sm:$0xff] %vm183_vm0, %v1089_v5  ;;  %v1090_v15 = vadd.f32 %v972_v6, %v272_v3  ;;  %v281_v6 = vld [vmem:[%s1812_s22 + $0x60] sm:$0xff] }
 0x120   : > { %1120 = vst.msk [vmem:[%s1812_s22] sm:$0xff] %vm183_vm0, %v1087_v10  ;;  %v1088_v13 = vadd.f32 %v964_v12, %v270_v8  ;;  %v283_v12 = vld [vmem:[%s1812_s22 + $0x70] sm:$0xff] }
 0x121   : > { %1123 = vst.msk [vmem:[%s1812_s22 + $0x18] sm:$0xff] %vm183_vm0, %v1090_v15 }
 0x122   : > { %1121 = vst.msk [vmem:[%s1812_s22 + $0x8] sm:$0xff] %vm183_vm0, %v1088_v13  ;;  %v1354_v16 = vpop.f32.mrb[20].mxu0  ;;  %v1466_v18 = vpop.f32.mrb[20].mxu1  ;;  %v282_v13 = vld [vmem:[%s1812_s22 + $0x68] sm:$0xff] }
 0x123   : > { %v985_v21 = vadd.f32 %v1466_v18, %v1344_v49  ;;  %v1355_v22 = vpop.f32.mrb[21].mxu0  ;;  %v976_v19 = vpop.f32.mrb[21].mxu1  ;;  %v277_v49 = vld [vmem:[%s1812_s22 + $0x40] sm:$0xff] }
 0x124   : > { %v1356_v24 = vadd.f32 %v1355_v22, %v1354_v16  ;;  %v977_v25 = vadd.f32 %v1338_v37, %v976_v19  ;;  %v1357_v27 = vpop.f32.mrb[22].mxu0  ;;  %v1467_v29 = vpop.f32.mrb[22].mxu1 }
 0x125   : > { %v1093_v30 = vadd.f32 %v985_v21, %v275_v17  ;;  %v988_v31 = vadd.f32 %v1467_v29, %v1347_v55  ;;  %v1358_v33 = vpop.f32.mrb[23].mxu0  ;;  %v979_v35 = vpop.f32.mrb[23].mxu1 }
 0x126   : > { %v1091_v36 = vadd.f32 %v977_v25, %v273_v23  ;;  %v1359_v39 = vadd.f32 %v1358_v33, %v1357_v27  ;;  %v980_v40 = vadd.f32 %v1341_v43, %v979_v35  ;;  %v284_v23 = vld [vmem:[%s1812_s22 + $0x78] sm:$0xff] }
 0x127   : > { %1126 = vst.msk [vmem:[%s1812_s22 + $0x30] sm:$0xff] %vm183_vm0, %v1093_v30  ;;  %v1094_v41 = vadd.f32 %v988_v31, %v276_v28 }
 0x128   : > { %1124 = vst.msk [vmem:[%s1812_s22 + $0x20] sm:$0xff] %vm183_vm0, %v1091_v36  ;;  %v1092_v37 = vadd.f32 %v980_v40, %v274_v34  ;;  %v285_v36 = vld [vmem:[%s1812_s22 + $0x80] sm:$0xff] }
 0x129   : > { %1127 = vst.msk [vmem:[%s1812_s22 + $0x38] sm:$0xff] %vm183_vm0, %v1094_v41 }
 0x12a   : > { %1125 = vst.msk [vmem:[%s1812_s22 + $0x28] sm:$0xff] %vm183_vm0, %v1092_v37  ;;  %v1360_v42 = vpop.f32.mrb[24].mxu0  ;;  %v1470_v46 = vpop.f32.mrb[24].mxu1 }
 0x12b   : > { %v1001_v47 = vadd.f32 %v1470_v46, %v1356_v24  ;;  %v1361_v48 = vpop.f32.mrb[25].mxu0  ;;  %v992_v43 = vpop.f32.mrb[25].mxu1 }
 0x12c   : > { %v1362_v51 = vadd.f32 %v1361_v48, %v1360_v42  ;;  %v993_v52 = vadd.f32 %v1350_v0, %v992_v43  ;;  %v1363_v53 = vpop.f32.mrb[26].mxu0  ;;  %v1471_v55 = vpop.f32.mrb[26].mxu1  ;;  %v286_v42 = vld [vmem:[%s1812_s22 + $0x88] sm:$0xff] }
 0x12d   : > { %v1097_v57 = vadd.f32 %v1001_v47, %v279_v45  ;;  %v1004_v58 = vadd.f32 %v1471_v55, %v1359_v39  ;;  %v1364_v59 = vpop.f32.mrb[27].mxu0  ;;  %v995_v61 = vpop.f32.mrb[27].mxu1  ;;  %v287_v55 = vld [vmem:[%s1812_s22 + $0x90] sm:$0xff] }
 0x12e   : > { %v1095_v62 = vadd.f32 %v993_v52, %v277_v49  ;;  %v1365_v63 = vadd.f32 %v1364_v59, %v1363_v53  ;;  %v996_v1 = vadd.f32 %v1353_v11, %v995_v61  ;;  %v288_v61 = vld [vmem:[%s1812_s22 + $0x98] sm:$0xff] }
 0x12f   : > { %1130 = vst.msk [vmem:[%s1812_s22 + $0x50] sm:$0xff] %vm183_vm0, %v1097_v57  ;;  %v1098_v2 = vadd.f32 %v1004_v58, %v280_v54 }
 0x130   : > { %1128 = vst.msk [vmem:[%s1812_s22 + $0x40] sm:$0xff] %vm183_vm0, %v1095_v62  ;;  %v1096_v0 = vadd.f32 %v996_v1, %v278_v60 }
 0x131   : > { %1131 = vst.msk [vmem:[%s1812_s22 + $0x58] sm:$0xff] %vm183_vm0, %v1098_v2 }
 0x132   : > { %1129 = vst.msk [vmem:[%s1812_s22 + $0x48] sm:$0xff] %vm183_vm0, %v1096_v0  ;;  %v1366_v3 = vpop.f32.mrb[28].mxu0  ;;  %v1474_v4 = vpop.f32.mrb[28].mxu1  ;;  %v295_v0 = vld [vmem:[%s1812_s22 + $0xd0] sm:$0xff] }
 0x133   : > { %v1367_v5 = vpop.f32.mrb[29].mxu0  ;;  %v1008_v7 = vpop.f32.mrb[29].mxu1 }
 0x134   : > { %v1368_v8 = vadd.f32 %v1367_v5, %v1366_v3  ;;  %v1009_v9 = vadd.f32 %v1362_v51, %v1008_v7  ;;  %v1369_v10 = vpop.f32.mrb[30].mxu0  ;;  %v1475_v11 = vpop.f32.mrb[30].mxu1 }
 0x135   : > { %v1370_v15 = vpop.f32.mrb[31].mxu0  ;;  %v1011_v16 = vpop.f32.mrb[31].mxu1 }
 0x136   : > { %v1017_v17 = vadd.f32 %v1474_v4, %v1368_v8  ;;  %v1099_v18 = vadd.f32 %v1009_v9, %v281_v6  ;;  %v1371_v21 = vadd.f32 %v1370_v15, %v1369_v10  ;;  %v1012_v22 = vadd.f32 %v1365_v63, %v1011_v16  ;;  %v293_v6 = vld [vmem:[%s1812_s22 + $0xc0] sm:$0xff] }
 0x138   : > { %v1101_v19 = vadd.f32 %v1017_v17, %v283_v12  ;;  %1132 = vst.msk [vmem:[%s1812_s22 + $0x60] sm:$0xff] %vm183_vm0, %v1099_v18  ;;  %v1020_v24 = vadd.f32 %v1475_v11, %v1371_v21  ;;  %v1100_v25 = vadd.f32 %v1012_v22, %v282_v13  ;;  %v296_v11 = vld [vmem:[%s1812_s22 + $0xd8] sm:$0xff]  ;;  %v289_v13 = vld [vmem:[%s1812_s22 + $0xa0] sm:$0xff]  ;;  %v294_v17 = vld [vmem:[%s1812_s22 + $0xc8] sm:$0xff] }
 0x13a   : > { %1134 = vst.msk [vmem:[%s1812_s22 + $0x70] sm:$0xff] %vm183_vm0, %v1101_v19  ;;  %v1102_v27 = vadd.f32 %v1020_v24, %v284_v23  ;;  %1133 = vst.msk [vmem:[%s1812_s22 + $0x68] sm:$0xff] %vm183_vm0, %v1100_v25  ;;  %v1372_v28 = vpop.f32.mrb[32].mxu0  ;;  %v1478_v29 = vpop.f32.mrb[32].mxu1  ;;  %v290_v24 = vld [vmem:[%s1812_s22 + $0xa8] sm:$0xff] }
 0x13b   : > { %v1373_v30 = vpop.f32.mrb[33].mxu0  ;;  %v1024_v31 = vpop.f32.mrb[33].mxu1 }
 0x13c   : > { %1135 = vst.msk [vmem:[%s1812_s22 + $0x78] sm:$0xff] %vm183_vm0, %v1102_v27  ;;  %v1374_v33 = vadd.f32 %v1373_v30, %v1372_v28  ;;  %v1375_v34 = vpop.f32.mrb[34].mxu0  ;;  %v1479_v35 = vpop.f32.mrb[34].mxu1 }
 0x13d   : > { %v1376_v39 = vpop.f32.mrb[35].mxu0  ;;  %v1027_v40 = vpop.f32.mrb[35].mxu1 }
 0x13e   : > { %v1025_v41 = vadd.f32 %v1374_v33, %v1024_v31  ;;  %v1377_v37 = vadd.f32 %v1376_v39, %v1375_v34  ;;  %v297_v34 = vld [vmem:[%s1812_s22 + $0xe0] sm:$0xff] }
 0x140   : > { %v1103_v45 = vadd.f32 %v1025_v41, %v285_v36  ;;  %v1028_v46 = vadd.f32 %v1377_v37, %v1027_v40  ;;  %v300_v41 = vld [vmem:[%s1812_s22 + $0xf8] sm:$0xff] }
 0x142   : > { %1136 = vst.msk [vmem:[%s1812_s22 + $0x80] sm:$0xff] %vm183_vm0, %v1103_v45  ;;  %v1104_v47 = vadd.f32 %v1028_v46, %v286_v42  ;;  %v1378_v48 = vpop.f32.mrb[36].mxu0  ;;  %v1946_v49 = vpop.f32.mrb[36].mxu1  ;;  %v291_v45 = vld [vmem:[%s1812_s22 + $0xb0] sm:$0xff] }
 0x143   : > { %v1379_v43 = vpop.f32.mrb[37].mxu0  ;;  %v1040_v51 = vpop.f32.mrb[37].mxu1 }
 0x144   : > { %1137 = vst.msk [vmem:[%s1812_s22 + $0x88] sm:$0xff] %vm183_vm0, %v1104_v47  ;;  %v1380_v52 = vadd.f32 %v1379_v43, %v1378_v48  ;;  %v1381_v53 = vpop.f32.mrb[38].mxu0  ;;  %v1950_v54 = vpop.f32.mrb[38].mxu1  ;;  %v298_v47 = vld [vmem:[%s1812_s22 + $0xe8] sm:$0xff] }
 0x145   : > { %v1382_v57 = vpop.f32.mrb[39].mxu0  ;;  %v1043_v58 = vpop.f32.mrb[39].mxu1 }
 0x146   : > { %v1033_v59 = vadd.f32 %v1478_v29, %v1380_v52  ;;  %v1383_v60 = vadd.f32 %v1382_v57, %v1381_v53  ;;  %v299_v29 = vld [vmem:[%s1812_s22 + $0xf0] sm:$0xff] }
 0x148   : > { %v1105_v62 = vadd.f32 %v1033_v59, %v287_v55  ;;  %v1036_v63 = vadd.f32 %v1479_v35, %v1383_v60  ;;  %v292_v55 = vld [vmem:[%s1812_s22 + $0xb8] sm:$0xff] }
 0x14a   : > { %1138 = vst.msk [vmem:[%s1812_s22 + $0x90] sm:$0xff] %vm183_vm0, %v1105_v62  ;;  %v1106_v1 = vadd.f32 %v1036_v63, %v288_v61  ;;  %v1384_v2 = vpop.f32.mrb[40].mxu0  ;;  %v1486_v3 = vpop.f32.mrb[40].mxu1 }
 0x14b   : > { %v1065_v4 = vadd.f32 %v1486_v3, %v1882_v26  ;;  %v1385_v5 = vpop.f32.mrb[41].mxu0  ;;  %v1056_v7 = vpop.f32.mrb[41].mxu1 }
 0x14c   : > { %1139 = vst.msk [vmem:[%s1812_s22 + $0x98] sm:$0xff] %vm183_vm0, %v1106_v1  ;;  %v1386_v8 = vadd.f32 %v1385_v5, %v1384_v2  ;;  %v1057_v9 = vadd.f32 %v1878_v14, %v1056_v7  ;;  %v1387_v10 = vpop.f32.mrb[42].mxu0  ;;  %v1487_v12 = vpop.f32.mrb[42].mxu1 }
 0x14d   : > { %v1113_v15 = vadd.f32 %v1065_v4, %v295_v0  ;;  %v1068_v16 = vadd.f32 %v1487_v12, %v1884_v32  ;;  %v1388_v26 = vpop.f32.mrb[43].mxu0  ;;  %v1059_v18 = vpop.f32.mrb[43].mxu1 }
 0x14e   : > { %v1041_v21 = vadd.f32 %v1386_v8, %v1040_v51  ;;  %v1111_v22 = vadd.f32 %v1057_v9, %v293_v6  ;;  %v1389_v23 = vadd.f32 %v1388_v26, %v1387_v10  ;;  %v1060_v14 = vadd.f32 %v1880_v20, %v1059_v18 }
 0x14f   : > { %1146 = vst.msk [vmem:[%s1812_s22 + $0xd0] sm:$0xff] %vm183_vm0, %v1113_v15  ;;  %v1114_v19 = vadd.f32 %v1068_v16, %v296_v11 }
 0x150   : > { %v1107_v25 = vadd.f32 %v1041_v21, %v289_v13  ;;  %1144 = vst.msk [vmem:[%s1812_s22 + $0xc0] sm:$0xff] %vm183_vm0, %v1111_v22  ;;  %v1044_v32 = vadd.f32 %v1389_v23, %v1043_v58  ;;  %v1112_v27 = vadd.f32 %v1060_v14, %v294_v17 }
 0x151   : > { %1147 = vst.msk [vmem:[%s1812_s22 + $0xd8] sm:$0xff] %vm183_vm0, %v1114_v19 }
 0x152   : > { %1140 = vst.msk [vmem:[%s1812_s22 + $0xa0] sm:$0xff] %vm183_vm0, %v1107_v25  ;;  %v1108_v28 = vadd.f32 %v1044_v32, %v290_v24  ;;  %1145 = vst.msk [vmem:[%s1812_s22 + $0xc8] sm:$0xff] %vm183_vm0, %v1112_v27  ;;  %v1390_v20 = vpop.f32.mrb[44].mxu0  ;;  %v1490_v30 = vpop.f32.mrb[44].mxu1 }
 0x153   : > { %v1081_v31 = vadd.f32 %v1490_v30, %v1890_v50  ;;  %v1391_v33 = vpop.f32.mrb[45].mxu0  ;;  %v1072_v35 = vpop.f32.mrb[45].mxu1 }
 0x154   : > { %1141 = vst.msk [vmem:[%s1812_s22 + $0xa8] sm:$0xff] %vm183_vm0, %v1108_v28  ;;  %v1392_v36 = vadd.f32 %v1391_v33, %v1390_v20  ;;  %v1073_v39 = vadd.f32 %v1886_v38, %v1072_v35  ;;  %v1393_v40 = vpop.f32.mrb[46].mxu0  ;;  %v1491_v37 = vpop.f32.mrb[46].mxu1 }
 0x155   : > { %v1117_v42 = vadd.f32 %v1081_v31, %v299_v29  ;;  %v1084_v46 = vadd.f32 %v1491_v37, %v1892_v56  ;;  %v1394_v50 = vpop.f32.mrb[47].mxu0  ;;  %v1075_v48 = vpop.f32.mrb[47].mxu1 }
 0x156   : > { %v1049_v43 = vadd.f32 %v1946_v49, %v1392_v36  ;;  %v1115_v51 = vadd.f32 %v1073_v39, %v297_v34  ;;  %v1395_v38 = vadd.f32 %v1394_v50, %v1393_v40  ;;  %v1076_v52 = vadd.f32 %v1888_v44, %v1075_v48 }
 0x157   : > { %1150 = vst.msk [vmem:[%s1812_s22 + $0xf0] sm:$0xff] %vm183_vm0, %v1117_v42  ;;  %v1118_v53 = vadd.f32 %v1084_v46, %v300_v41 }
 0x158   : > { %v1109_v57 = vadd.f32 %v1049_v43, %v291_v45  ;;  %1148 = vst.msk [vmem:[%s1812_s22 + $0xe0] sm:$0xff] %vm183_vm0, %v1115_v51  ;;  %v1052_v56 = vadd.f32 %v1950_v54, %v1395_v38  ;;  %v1116_v58 = vadd.f32 %v1076_v52, %v298_v47 }
 0x159   : > { %1151 = vst.msk [vmem:[%s1812_s22 + $0xf8] sm:$0xff] %vm183_vm0, %v1118_v53 }
 0x15a   : > { %1142 = vst.msk [vmem:[%s1812_s22 + $0xb0] sm:$0xff] %vm183_vm0, %v1109_v57  ;;  %v1110_v59 = vadd.f32 %v1052_v56, %v292_v55  ;;  %1149 = vst.msk [vmem:[%s1812_s22 + $0xe8] sm:$0xff] %vm183_vm0, %v1116_v58 }
 0x15c   : > { %1143 = vst.msk [vmem:[%s1812_s22 + $0xb8] sm:$0xff] %vm183_vm0, %v1110_v59 }
 0x15d PF: > { %s12_s11 = sadd.s32 1, %s1644_s11   ;;  %s2016_s9 = smov %s1640_s10 }
 0x15e   : > { %p9_p5 = scmp.ge.s32.totalorder %s12_s11, 4   ;;  %s2017_s10 = smov %s2019_s12 }
 0x160   :  { %11 = sbr.rel (!%p9_p5) target bundleno = 2 (0x2), region = 63 }

// kernel: n2_lightgcn_forward.5
= control target key start
LH: loop header
LB: loop body
LE: loop exit
PB: predicated region body
PF: predicated region fallthrough
CT: control target
= control target key end

     0   :  { %s3018_s29 = smov 0   ;;  %s3020_s30 = smov 0   ;;  %s3734_s0 = inlined_call_operand.vmem [shape: bf16[512,512], index: 0, kind: input, shape index: {}]   ;;  %s3735_s1 = inlined_call_operand.vmem [shape: bf16[512,64], index: 1, kind: input, shape index: {}]   ;;  %s3736_s2 = inlined_call_operand.vmem [shape: f32[512,64], index: 2, kind: input, shape index: {}, may-alias: {2,3}]   ;;  %s3737_s3 = inlined_call_operand.vmem [shape: f32[512,64], index: 3, kind: input, shape index: {}, may-alias: {2,3}]   ;;  %s3738_s4 = inlined_call_operand.vmem [shape: f32[1,64], index: 4, kind: input, shape index: {}]   ;;  %s3739_s5 = inlined_call_operand.<no memory space> [shape: f32[1], index: 5, kind: input, shape index: {}]   ;;  %s3740_s6 = inlined_call_operand.vmem [shape: bf16[512,64], index: 6, kind: output, shape index: {0}]   ;;  %s3741_s7 = inlined_call_operand.vmem [shape: f32[512,64], index: 7, kind: output, shape index: {1}]   ;;  %s3742_s8 = inlined_call_operand.vmem [shape: f32[512,64], index: 8, kind: output, shape index: {2}]  }
   0x1   :  { %14 = sst [smem:[#allocation3]] %s3739_s5  ;;  %s3022_s9 = smov 0  }
   0x2 LB: > { %s32_s5 = sadd.s32 1, %s2963_s30  ;;  %p2304_p0 = scmp.ge.s32.totalorder %s2967_s9, 1  ;;  %s2967_s9 = sphi %s3022_s9, %s20_s9   ;;  %s2963_s30 = sphi %s3020_s30, %s3744_s30   ;;  %s2959_s29 = sphi %s3018_s29, %s3743_s29  }
   0x3   : > { %p34_p1 = scmp.ge.s32.totalorder %s32_s5, 2  ;;  %p311_p2 = scmp.lt.s32.totalorder %s2967_s9, 3 }
   0x5   : > { %s3746_s5 = smov (%p34_p1, %s32_s5), 0  ;;  %p312_p3 = pnand %p2304_p0, %p311_p2 }
   0x6   : > { %v2731_v0 = vld [vmem:[%s3735_s1 + $0x40] sm:$0xff] (!%p312_p3)   ;;  %v2735_v4 = vld [vmem:[%s3735_s1 + $0x48] sm:$0xff] (!%p312_p3)   ;;  %v2739_v8 = vld [vmem:[%s3735_s1 + $0x50] sm:$0xff] (!%p312_p3)   ;;  %s2305_s23 = sshll.u32 (!%p312_p3), %s2959_s29, 5  ;;  %vm417_vm0 = vcmask (!%p312_p3), 523264   ;;  %s1550_s28 = sld [smem:[#allocation3]] (!%p312_p3) }
   0x7   : > { %315 = sbr.rel (%p312_p3) target bundleno = 397 (0x18d), region = 44  ;;  %v2732_v1 = vld [vmem:[%s3735_s1 + $0xc0] sm:$0xff] (!%p312_p3)   ;;  %2482 = vmatprep.subr.bf16.mxu0 (!%p312_p3), %v2731_v0  ;;  %v2736_v5 = vld [vmem:[%s3735_s1 + $0xc8] sm:$0xff] (!%p312_p3)   ;;  %v2740_v9 = vld [vmem:[%s3735_s1 + $0xd0] sm:$0xff] (!%p312_p3)   ;;  %p372_p4 = scmp.lt.s32.totalorder (!%p312_p3), %s2305_s23, 63  ;;  %vm1942_vm1 = vcmask (!%p312_p3), 519168  }
   0x8   : > { %v2733_v2 = vld [vmem:[%s3735_s1] sm:$0xff] (!%p312_p3)   ;;  %2594 = vmatprep.subr.bf16.mxu1 (!%p312_p3), %v2732_v1  ;;  %v2737_v6 = vld [vmem:[%s3735_s1 + $0x8] sm:$0xff] (!%p312_p3)   ;;  %v2741_v10 = vld [vmem:[%s3735_s1 + $0x10] sm:$0xff] (!%p312_p3)  }
   0x9   : > { %v2734_v3 = vld [vmem:[%s3735_s1 + $0x80] sm:$0xff] (!%p312_p3)   ;;  %2483 = vmatpush3.bf16.msra.mxu0 (!%p312_p3), %v2733_v2  ;;  %v2738_v7 = vld [vmem:[%s3735_s1 + $0x88] sm:$0xff] (!%p312_p3)   ;;  %v2742_v11 = vld [vmem:[%s3735_s1 + $0x90] sm:$0xff] (!%p312_p3)  }
   0xa   : > { %2595 = vmatpush3.bf16.msra.mxu1 (!%p312_p3), %v2734_v3  ;;  %2484 = vmatprep.subr.bf16.mxu0 (!%p312_p3), %v2735_v4  ;;  %v2743_v12 = vld [vmem:[%s3735_s1 + $0x58] sm:$0xff] (!%p312_p3)   ;;  %v2747_v16 = vld [vmem:[%s3735_s1 + $0x60] sm:$0xff] (!%p312_p3)   ;;  %v2751_v20 = vld [vmem:[%s3735_s1 + $0x68] sm:$0xff] (!%p312_p3)  }
   0xb   : > { %2596 = vmatprep.subr.bf16.mxu1 (!%p312_p3), %v2736_v5  ;;  %v2744_v13 = vld [vmem:[%s3735_s1 + $0xd8] sm:$0xff] (!%p312_p3)   ;;  %v2748_v17 = vld [vmem:[%s3735_s1 + $0xe0] sm:$0xff] (!%p312_p3)   ;;  %v2752_v21 = vld [vmem:[%s3735_s1 + $0xe8] sm:$0xff] (!%p312_p3)  }
   0xc   : > { %v2745_v14 = vld [vmem:[%s3735_s1 + $0x18] sm:$0xff] (!%p312_p3)   ;;  %v2749_v18 = vld [vmem:[%s3735_s1 + $0x20] sm:$0xff] (!%p312_p3)   ;;  %v2753_v22 = vld [vmem:[%s3735_s1 + $0x28] sm:$0xff] (!%p312_p3)  }
   0xd   : > { %2485 = vmatpush3.bf16.msra.mxu0 (!%p312_p3), %v2737_v6  ;;  %v2746_v15 = vld [vmem:[%s3735_s1 + $0x98] sm:$0xff] (!%p312_p3)   ;;  %v2750_v19 = vld [vmem:[%s3735_s1 + $0xa0] sm:$0xff] (!%p312_p3)   ;;  %v2754_v23 = vld [vmem:[%s3735_s1 + $0xa8] sm:$0xff] (!%p312_p3)  }
   0xe   : > { %2597 = vmatpush3.bf16.msra.mxu1 %v2738_v7  ;;  %2486 = vmatprep.subr.bf16.mxu0 %v2739_v8  ;;  %s3748_s23 = smov (!%p372_p4, %s2305_s23), 63  ;;  %v2755_v24 = vld [vmem:[%s3735_s1 + $0x70] sm:$0xff]   ;;  %v2759_v28 = vld [vmem:[%s3735_s1 + $0x78] sm:$0xff]   ;;  %v3174_v49 = vld [vmem:[%s3738_s4] ss:$0 sm:$0xff] }
   0xf   : > { %2598 = vmatprep.subr.bf16.mxu1 %v2740_v9  ;;  %v2756_v25 = vld [vmem:[%s3735_s1 + $0xf0] sm:$0xff]   ;;  %s2449_s27 = sshll.u32 %s3748_s23, 4  ;;  %v2760_v29 = vld [vmem:[%s3735_s1 + $0xf8] sm:$0xff]   ;;  %s3158_s21 = sshll.u32 %s3748_s23, 3 }
  0x10   : > { %v2757_v26 = vld [vmem:[%s3735_s1 + $0x30] sm:$0xff]   ;;  %s3135_s16 = scalar_lea.vmem %s3734_s0, %s2449_s27  ;;  %v2761_v30 = vld [vmem:[%s3735_s1 + $0x38] sm:$0xff]   ;;  %s3164_s25 = scalar_lea.vmem %s3736_s2, %s3158_s21 }
  0x11   : > { %2487 = vmatpush3.bf16.msra.mxu0 %v2741_v10  ;;  %v2758_v27 = vld [vmem:[%s3735_s1 + $0xb0] sm:$0xff]   ;;  %v2762_v31 = vld [vmem:[%s3735_s1 + $0xb8] sm:$0xff]   ;;  %v3169_v48 = vld [vmem:[%s3164_s25] sm:$0xff]  ;;  %s3391_s12 = scalar_lea.vmem %s3737_s3, %s3158_s21  ;;  %s2313_s29 = sshll.u32 %s3748_s23, 2 }
  0x12   : > { %2599 = vmatpush3.bf16.msra.mxu1 %v2742_v11  ;;  %2488 = vmatprep.subr.bf16.mxu0 %v2743_v12  ;;  %v2763_v32 = vld [vmem:[%s3135_s16] ss:$16 sps:$4 sm:$0xff]   ;;  %v2765_v33 = vld [vmem:[%s3135_s16 + $0x4] ss:$16 sps:$4 sm:$0xff]   ;;  %v2766_v34 = vld [vmem:[%s3135_s16 + $0x8] ss:$16 sps:$4 sm:$0xff]   ;;  %v1557_v51 = vmul.f32 %v3174_v49, %v3169_v48  ;;  %s3399_s15 = scalar_lea.vmem %s3740_s6, %s2313_s29  ;;  %s3406_s17 = scalar_lea.vmem %s3741_s7, %s3158_s21 }
  0x13   : > { %2600 = vmatprep.subr.bf16.mxu1 %v2744_v13  ;;  %v2768_v35 = vld [vmem:[%s3135_s16 + $0xc] ss:$16 sps:$4 sm:$0xff]   ;;  %1159 = vmatprep.mubr.bf16.mxu0 %v2765_v33  ;;  %v2769_v36 = vld [vmem:[%s3135_s16 + $0x24] ss:$16 sps:$4 sm:$0xff]   ;;  %v2773_v38 = vld [vmem:[%s3135_s16 + $0x20] ss:$16 sps:$4 sm:$0xff]   ;;  %s3412_s20 = scalar_lea.vmem %s3742_s8, %s3158_s21 }
  0x14   : > { %1320 = vmatprep.mubr.bf16.mxu1 %v2768_v35  ;;  %v2771_v37 = vld [vmem:[%s3135_s16 + $0x2c] ss:$16 sps:$4 sm:$0xff]   ;;  %v2774_v39 = vld [vmem:[%s3135_s16 + $0x28] ss:$16 sps:$4 sm:$0xff]   ;;  %v2775_v40 = vld [vmem:[%s3135_s16 + $0x44] ss:$16 sps:$4 sm:$0xff]  }
  0x15   : > { %2489 = vmatpush3.bf16.msra.mxu0 %v2745_v14  ;;  %v2777_v41 = vld [vmem:[%s3135_s16 + $0x4c] ss:$16 sps:$4 sm:$0xff]   ;;  %v2779_v42 = vld [vmem:[%s3135_s16 + $0x40] ss:$16 sps:$4 sm:$0xff]   ;;  %v2780_v43 = vld [vmem:[%s3135_s16 + $0x48] ss:$16 sps:$4 sm:$0xff]  }
  0x16   : > { %2601 = vmatpush3.bf16.msra.mxu1 %v2746_v15  ;;  %2490 = vmatprep.subr.bf16.mxu0 %v2747_v16  ;;  %v2781_v44 = vld [vmem:[%s3135_s16 + $0x64] ss:$16 sps:$4 sm:$0xff]   ;;  %v2783_v45 = vld [vmem:[%s3135_s16 + $0x6c] ss:$16 sps:$4 sm:$0xff]   ;;  %v2785_v46 = vld [vmem:[%s3135_s16 + $0x60] ss:$16 sps:$4 sm:$0xff]  }
  0x17   : > { %2602 = vmatprep.subr.bf16.mxu1 %v2748_v17  ;;  %v2786_v47 = vld [vmem:[%s3135_s16 + $0x68] ss:$16 sps:$4 sm:$0xff]   ;;  %v2787_v50 = vld [vmem:[%s3135_s16 + $0x84] ss:$16 sps:$4 sm:$0xff]   ;;  %v2789_v52 = vld [vmem:[%s3135_s16 + $0x8c] ss:$16 sps:$4 sm:$0xff]  }
  0x18   : > { %v1589_v53 = vsel %vm417_vm0, %v1557_v51, 0.0  ;;  %v3182_v54 = vld [vmem:[%s3164_s25 + $0x8] sm:$0xff]  ;;  %v3185_v55 = vld [vmem:[%s3164_s25 + $0x10] sm:$0xff]  ;;  %v3194_v60 = vld [vmem:[%s3164_s25 + $0x18] sm:$0xff] }
  0x19   : > { %2491 = vmatpush3.bf16.msra.mxu0 %v2749_v18  ;;  %1590 = vadd.xlane.f32.xlu0 %v1589_v53  ;;  %v1558_v56 = vmul.f32 %v3174_v49, %v3182_v54  ;;  %v1559_v57 = vmul.f32 %v3174_v49, %v3185_v55  ;;  %v2791_v61 = vld [vmem:[%s3135_s16 + $0x80] ss:$16 sps:$4 sm:$0xff]   ;;  %v1560_v62 = vmul.f32 %v3174_v49, %v3194_v60  ;;  %v2792_v63 = vld [vmem:[%s3135_s16 + $0x88] ss:$16 sps:$4 sm:$0xff]   ;;  %v2793_v0 = vld [vmem:[%s3135_s16 + $0xa4] ss:$16 sps:$4 sm:$0xff]  }
  0x1a   : > { %2603 = vmatpush3.bf16.msra.mxu1 %v2750_v19  ;;  %2492 = vmatprep.subr.bf16.mxu0 %v2751_v20  ;;  %v3202_v1 = vld [vmem:[%s3164_s25 + $0x20] sm:$0xff]  ;;  %v2795_v2 = vld [vmem:[%s3135_s16 + $0xac] ss:$16 sps:$4 sm:$0xff]   ;;  %v3215_v8 = vld [vmem:[%s3164_s25 + $0x30] sm:$0xff] }
  0x1b   : > { %2604 = vmatprep.subr.bf16.mxu1 %v2752_v21  ;;  %v1592_v58 = vsel %vm417_vm0, %v1558_v56, 0.0  ;;  %v1595_v59 = vsel %vm417_vm0, %v1559_v57, 0.0  ;;  %v1598_v3 = vsel %vm417_vm0, %v1560_v62, 0.0  ;;  %v1561_v4 = vmul.f32 %v3174_v49, %v3202_v1  ;;  %v3209_v5 = vld [vmem:[%s3164_s25 + $0x28] sm:$0xff]  ;;  %v3221_v11 = vld [vmem:[%s3164_s25 + $0x38] sm:$0xff]  ;;  %v3231_v18 = vld [vmem:[%s3164_s25 + $0x40] sm:$0xff] }
  0x1c   : > { %1596 = vadd.xlane.f32.xlu1 %v1595_v59  ;;  %v1562_v6 = vmul.f32 %v3174_v49, %v3209_v5  ;;  %v1563_v10 = vmul.f32 %v3174_v49, %v3215_v8  ;;  %v1564_v12 = vmul.f32 %v3174_v49, %v3221_v11  ;;  %v2797_v13 = vld [vmem:[%s3135_s16 + $0xa0] ss:$16 sps:$4 sm:$0xff]   ;;  %v2798_v15 = vld [vmem:[%s3135_s16 + $0xa8] ss:$16 sps:$4 sm:$0xff]   ;;  %v2799_v16 = vld [vmem:[%s3135_s16 + $0xc4] ss:$16 sps:$4 sm:$0xff]   ;;  %v1565_v19 = vmul.f32 %v3174_v49, %v3231_v18 }
  0x1d   : > { %2493 = vmatpush3.bf16.msra.mxu0 %v2753_v22  ;;  %1593 = vadd.xlane.f32.xlu0 %v1592_v58  ;;  %v1601_v7 = vsel %vm417_vm0, %v1561_v4, 0.0  ;;  %v3236_v20 = vld [vmem:[%s3164_s25 + $0x48] sm:$0xff]  ;;  %v2803_v33 = vld [vmem:[%s3135_s16 + $0xc0] ss:$16 sps:$4 sm:$0xff]   ;;  %v2811_v58 = vld [vmem:[%s3135_s16 + $0x104] ss:$16 sps:$4 sm:$0xff]  }
  0x1e   : > { %2605 = vmatpush3.bf16.msra.mxu1 %v2754_v23  ;;  %2494 = vmatprep.subr.bf16.mxu0 %v2755_v24  ;;  %v1604_v9 = vsel %vm417_vm0, %v1562_v6, 0.0  ;;  %v1607_v14 = vsel %vm417_vm0, %v1563_v10, 0.0  ;;  %v1610_v17 = vsel %vm417_vm0, %v1564_v12, 0.0  ;;  %v2801_v21 = vld [vmem:[%s3135_s16 + $0xcc] ss:$16 sps:$4 sm:$0xff]   ;;  %v1566_v22 = vmul.f32 %v3174_v49, %v3236_v20  ;;  %v1527_v24 = vld [vmem:[%s3164_s25 + $0x50] sm:$0xff] }
  0x1f   : > { %2606 = vmatprep.subr.bf16.mxu1 %v2756_v25  ;;  %v1613_v23 = vsel %vm417_vm0, %v1565_v19, 0.0  ;;  %v2809_v51 = vld [vmem:[%s3135_s16 + $0xe0] ss:$16 sps:$4 sm:$0xff]   ;;  %v2810_v57 = vld [vmem:[%s3135_s16 + $0xe8] ss:$16 sps:$4 sm:$0xff]  }
  0x20   : > { %1599 = vadd.xlane.f32.xlu1 %v1598_v3  ;;  %v1616_v25 = vsel %vm417_vm0, %v1566_v22, 0.0  ;;  %v1535_v56 = vld [vmem:[%s3164_s25 + $0x90] sm:$0xff]  ;;  %v1536_v59 = vld [vmem:[%s3164_s25 + $0x98] sm:$0xff]  ;;  %v1537_v3 = vld [vmem:[%s3164_s25 + $0xa0] sm:$0xff] }
  0x21   : > { %2495 = vmatpush3.bf16.msra.mxu0 %v2757_v26  ;;  %1602 = vadd.xlane.f32.xlu0 %v1601_v7  ;;  %v1567_v26 = vmul.f32 %v3174_v49, %v1527_v24  ;;  %v1538_v4 = vld [vmem:[%s3164_s25 + $0xa8] sm:$0xff]  ;;  %v1577_v7 = vmul.f32 %v3174_v49, %v1537_v3  ;;  %v1541_v24 = vld [vmem:[%s3164_s25 + $0xc0] sm:$0xff] }
  0x22   : > { %2607 = vmatpush3.bf16.msra.mxu1 %v2758_v27  ;;  %2496 = vmatprep.subr.bf16.mxu0 %v2759_v28  ;;  %v1528_v27 = vld [vmem:[%s3164_s25 + $0x58] sm:$0xff]  ;;  %v1578_v12 = vmul.f32 %v3174_v49, %v1538_v4  ;;  %v2839_v4 = vld [vmem:[%s3135_s16 + $0x180] ss:$16 sps:$4 sm:$0xff]  }
  0x23   : > { %2608 = vmatprep.subr.bf16.mxu1 %v2760_v29  ;;  %v1568_v28 = vmul.f32 %v3174_v49, %v1528_v27  ;;  %v1529_v29 = vld [vmem:[%s3164_s25 + $0x60] sm:$0xff]  ;;  %v1649_v19 = vsel %vm417_vm0, %v1577_v7, 0.0  ;;  %v1581_v27 = vmul.f32 %v3174_v49, %v1541_v24  ;;  %v2837_v3 = vld [vmem:[%s3135_s16 + $0x18c] ss:$16 sps:$4 sm:$0xff]   ;;  %v3379_v24 = vstv %s1550_s28 }
  0x24   : > { %1605 = vadd.xlane.f32.xlu1 %v1604_v9  ;;  %v2815_v9 = vld [vmem:[%s3135_s16 + $0x100] ss:$16 sps:$4 sm:$0xff]   ;;  %v1652_v22 = vsel %vm417_vm0, %v1578_v12, 0.0  ;;  %v2841_v7 = vld [vmem:[%s3135_s16 + $0x1a4] ss:$16 sps:$4 sm:$0xff]  }
  0x25   : > { %2497 = vmatpush3.bf16.msra.mxu0 %v2761_v30  ;;  %1608 = vadd.xlane.f32.xlu0 %v1607_v14  ;;  %v1619_v30 = vsel %vm417_vm0, %v1567_v26, 0.0  ;;  %v2816_v14 = vld [vmem:[%s3135_s16 + $0x108] ss:$16 sps:$4 sm:$0xff]  }
  0x26   : > { %2609 = vmatpush3.bf16.msra.mxu1 %v2762_v31  ;;  %v1569_v31 = vmul.f32 %v3174_v49, %v1529_v29  ;;  %v2846_v12 = vld [vmem:[%s3135_s16 + $0x1a8] ss:$16 sps:$4 sm:$0xff]  }
  0x28   : > { %1160 = vmatmul.mubr.bf16.vlgmr.msra.gmra.mrb[0].mxu0 %v2763_v32  ;;  %1611 = vadd.xlane.f32.xlu1 %v1610_v17  ;;  %v1530_v32 = vld [vmem:[%s3164_s25 + $0x68] sm:$0xff] }
  0x29   : > { %1321 = vmatmul.mubr.bf16.vlgmr.msra.gmra.mrb[0].mxu1 %v2766_v34  ;;  %1167 = vmatprep.mubr.bf16.mxu0 %v2769_v36  ;;  %v1622_v34 = vsel %vm417_vm0, %v1568_v28, 0.0  ;;  %v1570_v35 = vmul.f32 %v3174_v49, %v1530_v32  ;;  %v1531_v36 = vld [vmem:[%s3164_s25 + $0x70] sm:$0xff]  ;;  %v2819_v17 = vld [vmem:[%s3135_s16 + $0x12c] ss:$16 sps:$4 sm:$0xff]   ;;  %v2822_v32 = vld [vmem:[%s3135_s16 + $0x128] ss:$16 sps:$4 sm:$0xff]  }
  0x2a   : > { %1328 = vmatprep.mubr.bf16.mxu1 %v2771_v37  ;;  %1614 = vadd.xlane.f32.xlu0 %v1613_v23  ;;  %v2804_v37 = vld [vmem:[%s3135_s16 + $0xc8] ss:$16 sps:$4 sm:$0xff]   ;;  %v2821_v28 = vld [vmem:[%s3135_s16 + $0x120] ss:$16 sps:$4 sm:$0xff]  }
  0x2c   : > { %1617 = vadd.xlane.f32.xlu1 %v1616_v25  ;;  %v1542_v25 = vld [vmem:[%s3164_s25 + $0xc8] sm:$0xff] }
  0x2e   : > { %1620 = vadd.xlane.f32.xlu0 %v1619_v30  ;;  %v1582_v30 = vmul.f32 %v3174_v49, %v1542_v25 }
  0x30   : > { %1168 = vmatmul.mubr.bf16.gmra.mrb[4].mxu0 %v2773_v38  ;;  %v2805_v38 = vld [vmem:[%s3135_s16 + $0xe4] ss:$16 sps:$4 sm:$0xff]   ;;  %1623 = vadd.xlane.f32.xlu1 %v1622_v34  ;;  %v1544_v34 = vld [vmem:[%s3164_s25 + $0xd8] sm:$0xff] }
  0x31   : > { %1329 = vmatmul.mubr.bf16.gmra.mrb[4].mxu1 %v2774_v39  ;;  %1175 = vmatprep.mubr.bf16.mxu0 %v2775_v40  ;;  %v1532_v39 = vld [vmem:[%s3164_s25 + $0x78] sm:$0xff] }
  0x32   : > { %1336 = vmatprep.mubr.bf16.mxu1 %v2777_v41  ;;  %v2807_v40 = vld [vmem:[%s3135_s16 + $0xec] ss:$16 sps:$4 sm:$0xff]   ;;  %v1625_v41 = vsel %vm417_vm0, %v1569_v31, 0.0  ;;  %v1543_v31 = vld [vmem:[%s3164_s25 + $0xd0] sm:$0xff] }
  0x33   : > { %1626 = vadd.xlane.f32.xlu0 %v1625_v41  ;;  %v1546_v41 = vld [vmem:[%s3164_s25 + $0xe8] sm:$0xff] }
  0x38   : > { %1176 = vmatmul.mubr.bf16.gmra.mrb[8].mxu0 %v2779_v42  ;;  %v1571_v42 = vmul.f32 %v3174_v49, %v1531_v36  ;;  %v1661_v36 = vsel %vm417_vm0, %v1581_v27, 0.0 }
  0x39   : > { %1337 = vmatmul.mubr.bf16.gmra.mrb[8].mxu1 %v2780_v43  ;;  %1183 = vmatprep.mubr.bf16.mxu0 %v2781_v44  ;;  %v1628_v43 = vsel %vm417_vm0, %v1570_v35, 0.0  ;;  %v1572_v44 = vmul.f32 %v3174_v49, %v1532_v39  ;;  %v2825_v35 = vld [vmem:[%s3135_s16 + $0x14c] ss:$16 sps:$4 sm:$0xff]   ;;  %v1584_v39 = vmul.f32 %v3174_v49, %v1544_v34 }
  0x3a   : > { %1344 = vmatprep.mubr.bf16.mxu1 %v2783_v45  ;;  %v1533_v45 = vld [vmem:[%s3164_s25 + $0x80] sm:$0xff]  ;;  %1629 = vadd.xlane.f32.xlu1 %v1628_v43 }
  0x40   : > { %1184 = vmatmul.mubr.bf16.gmra.mrb[12].mxu0 %v2785_v46  ;;  %v1534_v46 = vld [vmem:[%s3164_s25 + $0x88] sm:$0xff] }
  0x41   : > { %1345 = vmatmul.mubr.bf16.gmra.mrb[12].mxu1 %v2786_v47  ;;  %1191 = vmatprep.mubr.bf16.mxu0 %v2787_v50  ;;  %v1631_v47 = vsel %vm417_vm0, %v1571_v42, 0.0  ;;  %v1573_v50 = vmul.f32 %v3174_v49, %v1533_v45  ;;  %v1574_v53 = vmul.f32 %v3174_v49, %v1534_v46  ;;  %v1670_v45 = vsel %vm417_vm0, %v1584_v39, 0.0 }
  0x42   : > { %1352 = vmatprep.mubr.bf16.mxu1 %v2789_v52  ;;  %v1634_v52 = vsel %vm417_vm0, %v1572_v44, 0.0  ;;  %1632 = vadd.xlane.f32.xlu0 %v1631_v47  ;;  %v2827_v44 = vld [vmem:[%s3135_s16 + $0x140] ss:$16 sps:$4 sm:$0xff]   ;;  %v1586_v46 = vmul.f32 %v3174_v49, %v1546_v41 }
  0x43   : > { %1635 = vadd.xlane.f32.xlu1 %v1634_v52  ;;  %v1637_v62 = vsel %vm417_vm0, %v1573_v50, 0.0  ;;  %v1547_v47 = vld [vmem:[%s3164_s25 + $0xf0] sm:$0xff]  ;;  %v2828_v50 = vld [vmem:[%s3135_s16 + $0x148] ss:$16 sps:$4 sm:$0xff]  }
  0x44   : > { %v1548_v52 = vld [vmem:[%s3164_s25 + $0xf8] sm:$0xff] }
  0x46   : > { %1638 = vadd.xlane.f32.xlu0 %v1637_v62  ;;  %v2833_v62 = vld [vmem:[%s3135_s16 + $0x160] ss:$16 sps:$4 sm:$0xff]  }
  0x48   : > { %1192 = vmatmul.mubr.bf16.gmra.mrb[16].mxu0 %v2791_v61  ;;  %v2813_v61 = vld [vmem:[%s3135_s16 + $0x10c] ss:$16 sps:$4 sm:$0xff]  }
  0x49   : > { %1353 = vmatmul.mubr.bf16.gmra.mrb[16].mxu1 %v2792_v63  ;;  %1199 = vmatprep.mubr.bf16.mxu0 %v2793_v0  ;;  %v1575_v63 = vmul.f32 %v3174_v49, %v1535_v56  ;;  %v1640_v0 = vsel %vm417_vm0, %v1574_v53, 0.0  ;;  %v2831_v53 = vld [vmem:[%s3135_s16 + $0x16c] ss:$16 sps:$4 sm:$0xff]  }
  0x4a   : > { %1360 = vmatprep.mubr.bf16.mxu1 %v2795_v2  ;;  %v1576_v2 = vmul.f32 %v3174_v49, %v1536_v59  ;;  %1641 = vadd.xlane.f32.xlu1 %v1640_v0  ;;  %v1588_v59 = vmul.f32 %v3174_v49, %v1548_v52  ;;  %v2834_v0 = vld [vmem:[%s3135_s16 + $0x168] ss:$16 sps:$4 sm:$0xff]  }
  0x4b   : > { %v1643_v6 = vsel %vm417_vm0, %v1575_v63, 0.0 }
  0x4c   : > { %v1646_v10 = vsel %vm417_vm0, %v1576_v2, 0.0  ;;  %1644 = vadd.xlane.f32.xlu0 %v1643_v6  ;;  %v1682_v63 = vsel %vm417_vm0, %v1588_v59, 0.0  ;;  %v2835_v2 = vld [vmem:[%s3135_s16 + $0x184] ss:$16 sps:$4 sm:$0xff]   ;;  %v2840_v6 = vld [vmem:[%s3135_s16 + $0x188] ss:$16 sps:$4 sm:$0xff]  }
  0x4e   : > { %1647 = vadd.xlane.f32.xlu1 %v1646_v10  ;;  %v2845_v10 = vld [vmem:[%s3135_s16 + $0x1a0] ss:$16 sps:$4 sm:$0xff]  }
  0x50   : > { %1200 = vmatmul.mubr.bf16.gmra.mrb[20].mxu0 %v2797_v13  ;;  %v1539_v13 = vld [vmem:[%s3164_s25 + $0xb0] sm:$0xff]  ;;  %1650 = vadd.xlane.f32.xlu0 %v1649_v19  ;;  %v2855_v19 = vld [vmem:[%s3135_s16 + $0x1ec] ss:$16 sps:$4 sm:$0xff]  }
  0x51   : > { %1361 = vmatmul.mubr.bf16.gmra.mrb[20].mxu1 %v2798_v15  ;;  %1207 = vmatprep.mubr.bf16.mxu0 %v2799_v16  ;;  %v2817_v15 = vld [vmem:[%s3135_s16 + $0x124] ss:$16 sps:$4 sm:$0xff]   ;;  %v1540_v16 = vld [vmem:[%s3164_s25 + $0xb8] sm:$0xff] }
  0x52   : > { %1368 = vmatprep.mubr.bf16.mxu1 %v2801_v21  ;;  %v1579_v21 = vmul.f32 %v3174_v49, %v1539_v13  ;;  %v1580_v23 = vmul.f32 %v3174_v49, %v1540_v16  ;;  %1653 = vadd.xlane.f32.xlu1 %v1652_v22  ;;  %v2847_v13 = vld [vmem:[%s3135_s16 + $0x1c4] ss:$16 sps:$4 sm:$0xff]   ;;  %v2852_v16 = vld [vmem:[%s3135_s16 + $0x1c8] ss:$16 sps:$4 sm:$0xff]  }
  0x53   : > { %v2858_v22 = vld [vmem:[%s3135_s16 + $0x1e8] ss:$16 sps:$4 sm:$0xff]  }
  0x54   : > { %v1655_v26 = vsel %vm417_vm0, %v1579_v21, 0.0  ;;  %v1658_v29 = vsel %vm417_vm0, %v1580_v23, 0.0  ;;  %v2857_v21 = vld [vmem:[%s3135_s16 + $0x1e0] ss:$16 sps:$4 sm:$0xff]  }
  0x55   : > { %1656 = vadd.xlane.f32.xlu0 %v1655_v26 }
  0x56   : > { %1659 = vadd.xlane.f32.xlu1 %v1658_v29 }
  0x58   : > { %1208 = vmatmul.mubr.bf16.gmra.mrb[24].mxu0 %v2803_v33  ;;  %v2823_v33 = vld [vmem:[%s3135_s16 + $0x144] ss:$16 sps:$4 sm:$0xff]  }
  0x59   : > { %1369 = vmatmul.mubr.bf16.gmra.mrb[24].mxu1 %v2804_v37  ;;  %1215 = vmatprep.mubr.bf16.mxu0 %v2805_v38  ;;  %v1583_v37 = vmul.f32 %v3174_v49, %v1543_v31  ;;  %v1664_v38 = vsel %vm417_vm0, %v1582_v30, 0.0 }
  0x5a   : > { %1376 = vmatprep.mubr.bf16.mxu1 %v2807_v40  ;;  %v1545_v40 = vld [vmem:[%s3164_s25 + $0xe0] sm:$0xff]  ;;  %1662 = vadd.xlane.f32.xlu0 %v1661_v36 }
  0x5b   : > { %1665 = vadd.xlane.f32.xlu1 %v1664_v38  ;;  %v1667_v42 = vsel %vm417_vm0, %v1583_v37, 0.0  ;;  %v1585_v43 = vmul.f32 %v3174_v49, %v1545_v40 }
  0x5d   : > { %v1673_v56 = vsel %vm417_vm0, %v1585_v43, 0.0 }
  0x5e   : > { %1668 = vadd.xlane.f32.xlu0 %v1667_v42 }
  0x5f   : > { %1671 = vadd.xlane.f32.xlu1 %v1670_v45 }
  0x60   : > { %1216 = vmatmul.mubr.bf16.gmra.mrb[28].mxu0 %v2809_v51  ;;  %v2829_v51 = vld [vmem:[%s3135_s16 + $0x164] ss:$16 sps:$4 sm:$0xff]  }
  0x61   : > { %1377 = vmatmul.mubr.bf16.gmra.mrb[28].mxu1 %v2810_v57  ;;  %1223 = vmatprep.mubr.bf16.mxu0 %v2811_v58  ;;  %v1587_v57 = vmul.f32 %v3174_v49, %v1547_v47  ;;  %v1676_v58 = vsel %vm417_vm0, %v1586_v46, 0.0 }
  0x62   : > { %1384 = vmatprep.mubr.bf16.mxu1 %v2813_v61  ;;  %1674 = vadd.xlane.f32.xlu0 %v1673_v56  ;;  %v2969_v61 = vmov 0.0  }
  0x63   : > { %418 = vst.msk [vmem:[#allocation2] sm:$0xff] %vm417_vm0, %v2969_v61  ;;  %419 = vst.msk [vmem:[#allocation2 + $0x8] sm:$0xff] %vm417_vm0, %v2969_v61  ;;  %1677 = vadd.xlane.f32.xlu1 %v1676_v58  ;;  %v1679_v49 = vsel %vm417_vm0, %v1587_v57, 0.0 }
  0x64   : > { %420 = vst.msk [vmem:[#allocation2 + $0x10] sm:$0xff] %vm417_vm0, %v2969_v61  ;;  %421 = vst.msk [vmem:[#allocation2 + $0x18] sm:$0xff] %vm417_vm0, %v2969_v61 }
  0x65   : > { %422 = vst.msk [vmem:[#allocation2 + $0x20] sm:$0xff] %vm417_vm0, %v2969_v61  ;;  %423 = vst.msk [vmem:[#allocation2 + $0x28] sm:$0xff] %vm417_vm0, %v2969_v61 }
  0x66   : > { %424 = vst.msk [vmem:[#allocation2 + $0x30] sm:$0xff] %vm417_vm0, %v2969_v61  ;;  %425 = vst.msk [vmem:[#allocation2 + $0x38] sm:$0xff] %vm417_vm0, %v2969_v61  ;;  %1680 = vadd.xlane.f32.xlu0 %v1679_v49 }
  0x67   : > { %426 = vst.msk [vmem:[#allocation2 + $0x40] sm:$0xff] %vm417_vm0, %v2969_v61  ;;  %427 = vst.msk [vmem:[#allocation2 + $0x48] sm:$0xff] %vm417_vm0, %v2969_v61  ;;  %1683 = vadd.xlane.f32.xlu1 %v1682_v63 }
  0x68   : > { %1224 = vmatmul.mubr.bf16.gmra.mrb[32].mxu0 %v2815_v9  ;;  %428 = vst.msk [vmem:[#allocation2 + $0x50] sm:$0xff] %vm417_vm0, %v2969_v61  ;;  %429 = vst.msk [vmem:[#allocation2 + $0x58] sm:$0xff] %vm417_vm0, %v2969_v61  ;;  %v2843_v9 = vld [vmem:[%s3135_s16 + $0x1ac] ss:$16 sps:$4 sm:$0xff]  }
  0x69   : > { %1385 = vmatmul.mubr.bf16.gmra.mrb[32].mxu1 %v2816_v14  ;;  %1231 = vmatprep.mubr.bf16.mxu0 %v2817_v15  ;;  %430 = vst.msk [vmem:[#allocation2 + $0x60] sm:$0xff] %vm417_vm0, %v2969_v61  ;;  %431 = vst.msk [vmem:[#allocation2 + $0x68] sm:$0xff] %vm417_vm0, %v2969_v61  ;;  %v2849_v14 = vld [vmem:[%s3135_s16 + $0x1cc] ss:$16 sps:$4 sm:$0xff]   ;;  %v2851_v15 = vld [vmem:[%s3135_s16 + $0x1c0] ss:$16 sps:$4 sm:$0xff]  }
  0x6a   : > { %1392 = vmatprep.mubr.bf16.mxu1 %v2819_v17  ;;  %432 = vst.msk [vmem:[#allocation2 + $0x70] sm:$0xff] %vm417_vm0, %v2969_v61  ;;  %433 = vst.msk [vmem:[#allocation2 + $0x78] sm:$0xff] %vm417_vm0, %v2969_v61  ;;  %v2853_v17 = vld [vmem:[%s3135_s16 + $0x1e4] ss:$16 sps:$4 sm:$0xff]   ;;  %v520_v43 = vld [vmem:[#allocation2 + $0x8] sm:$0xff] }
  0x6b   : > { %434 = vst.msk [vmem:[#allocation2 + $0x80] sm:$0xff] %vm417_vm0, %v2969_v61  ;;  %435 = vst.msk [vmem:[#allocation2 + $0x88] sm:$0xff] %vm417_vm0, %v2969_v61  ;;  %v519_v38 = vld [vmem:[#allocation2] sm:$0xff]  ;;  %v521_v63 = vld [vmem:[#allocation2 + $0x10] sm:$0xff] }
  0x6c   : > { %436 = vst.msk [vmem:[#allocation2 + $0x90] sm:$0xff] %vm417_vm0, %v2969_v61  ;;  %437 = vst.msk [vmem:[#allocation2 + $0x98] sm:$0xff] %vm417_vm0, %v2969_v61 }
  0x6d   : > { %438 = vst.msk [vmem:[#allocation2 + $0xa0] sm:$0xff] %vm417_vm0, %v2969_v61  ;;  %439 = vst.msk [vmem:[#allocation2 + $0xa8] sm:$0xff] %vm417_vm0, %v2969_v61 }
  0x6e   : > { %440 = vst.msk [vmem:[#allocation2 + $0xb0] sm:$0xff] %vm417_vm0, %v2969_v61  ;;  %441 = vst.msk [vmem:[#allocation2 + $0xb8] sm:$0xff] %vm417_vm0, %v2969_v61 }
  0x6f   : > { %442 = vst.msk [vmem:[#allocation2 + $0xc0] sm:$0xff] %vm417_vm0, %v2969_v61  ;;  %443 = vst.msk [vmem:[#allocation2 + $0xc8] sm:$0xff] %vm417_vm0, %v2969_v61 }
  0x70   : > { %1232 = vmatmul.mubr.bf16.gmra.mrb[36].mxu0 %v2821_v28  ;;  %444 = vst.msk [vmem:[#allocation2 + $0xd0] sm:$0xff] %vm417_vm0, %v2969_v61  ;;  %445 = vst.msk [vmem:[#allocation2 + $0xd8] sm:$0xff] %vm417_vm0, %v2969_v61 }
  0x71   : > { %1393 = vmatmul.mubr.bf16.gmra.mrb[36].mxu1 %v2822_v32  ;;  %1239 = vmatprep.mubr.bf16.mxu0 %v2823_v33  ;;  %446 = vst.msk [vmem:[#allocation2 + $0xe0] sm:$0xff] %vm417_vm0, %v2969_v61  ;;  %447 = vst.msk [vmem:[#allocation2 + $0xe8] sm:$0xff] %vm417_vm0, %v2969_v61 }
  0x72   : > { %1400 = vmatprep.mubr.bf16.mxu1 %v2825_v35  ;;  %448 = vst.msk [vmem:[#allocation2 + $0xf0] sm:$0xff] %vm417_vm0, %v2969_v61  ;;  %449 = vst.msk [vmem:[#allocation2 + $0xf8] sm:$0xff] %vm417_vm0, %v2969_v61 }
  0x78   : > { %1240 = vmatmul.mubr.bf16.gmra.mrb[40].mxu0 %v2827_v44 }
  0x79   : > { %1401 = vmatmul.mubr.bf16.gmra.mrb[40].mxu1 %v2828_v50  ;;  %1247 = vmatprep.mubr.bf16.mxu0 %v2829_v51 }
  0x7a   : > { %1408 = vmatprep.mubr.bf16.mxu1 %v2831_v53 }
  0x80   : > { %1248 = vmatmul.mubr.bf16.gmra.mrb[44].mxu0 %v2833_v62 }
  0x81   : > { %1409 = vmatmul.mubr.bf16.gmra.mrb[44].mxu1 %v2834_v0  ;;  %1255 = vmatprep.mubr.bf16.mxu0 %v2835_v2 }
  0x82   : > { %1416 = vmatprep.mubr.bf16.mxu1 %v2837_v3 }
  0x88   : > { %1256 = vmatmul.mubr.bf16.gmra.mrb[48].mxu0 %v2839_v4 }
  0x89   : > { %1417 = vmatmul.mubr.bf16.gmra.mrb[48].mxu1 %v2840_v6  ;;  %1263 = vmatprep.mubr.bf16.mxu0 %v2841_v7 }
  0x8a   : > { %1424 = vmatprep.mubr.bf16.mxu1 %v2843_v9  ;;  %v522_v9 = vld [vmem:[#allocation2 + $0x18] sm:$0xff] }
  0x90   : > { %1264 = vmatmul.mubr.bf16.gmra.mrb[52].mxu0 %v2845_v10 }
  0x91   : > { %1425 = vmatmul.mubr.bf16.gmra.mrb[52].mxu1 %v2846_v12  ;;  %1271 = vmatprep.mubr.bf16.mxu0 %v2847_v13 }
  0x92   : > { %1432 = vmatprep.mubr.bf16.mxu1 %v2849_v14 }
  0x98   : > { %1272 = vmatmul.mubr.bf16.gmra.mrb[56].mxu0 %v2851_v15 }
  0x99   : > { %1433 = vmatmul.mubr.bf16.gmra.mrb[56].mxu1 %v2852_v16  ;;  %1279 = vmatprep.mubr.bf16.mxu0 %v2853_v17  ;;  %v2039_v16 = vld [vmem:[%s3391_s12] sm:$0xff] }
  0x9a   : > { %1440 = vmatprep.mubr.bf16.mxu1 %v2855_v19 }
  0xa0   : > { %1280 = vmatmul.mubr.bf16.gmra.mrb[60].mxu0 %v2857_v21 }
  0xa1   : > { %1441 = vmatmul.mubr.bf16.gmra.mrb[60].mxu1 %v2858_v22 }
  0xa6   : > { %v1591_v23 = vpop.xlane.xlu0 %1590 }
  0xa7   : > { %v1686_v26 = vadd.f32 %v3379_v24, %v1591_v23 }
  0xa9   : > { %v1597_v28 = vpop.xlane.xlu1 %1596  ;;  %2859 = vtanh.f32 %v1686_v26  ;;  %v2040_v26 = vld [vmem:[%s3391_s12 + $0x8] sm:$0xff] }
  0xaa   : > { %v1594_v25 = vpop.xlane.xlu0 %1593  ;;  %v1688_v47 = vadd.f32 %v3379_v24, %v1597_v28 }
  0xab   : > { %v1687_v34 = vadd.f32 %v3379_v24, %v1594_v25 }
  0xad   : > { %2861 = vtanh.f32 %v1687_v34  ;;  %v1600_v46 = vpop.xlane.xlu1 %1599 }
  0xae   : > { %v1689_v59 = vadd.f32 %v3379_v24, %v1600_v46  ;;  %2863 = vtanh.f32 %v1688_v47  ;;  %v1603_v6 = vpop.xlane.xlu0 %1602 }
  0xaf   : > { %v1690_v19 = vadd.f32 %v3379_v24, %v1603_v6 }
  0xb0   : > { %2865 = vtanh.f32 %v1689_v59 }
  0xb1   : > { %v1606_v13 = vpop.xlane.xlu1 %1605  ;;  %2867 = vtanh.f32 %v1690_v19 }
  0xb3   : > { %v2860_v7 = vpop.eup %2859 }
  0xb7   : > { %v2862_v14 = vpop.eup %2861 }
  0xb8   : > { %v2864_v46 = vpop.eup %2863 }
  0xfb   : > { %v2498_v27 = vpop.f32.mrb[0].mxu0 }
  0xfc   : > { %v2610_v29 = vpop.f32.mrb[0].mxu1  ;;  %v2499_v30 = vpop.f32.mrb[1].mxu0 }
  0xfd   : > { %v2500_v31 = vadd.f32 %v2499_v30, %v2498_v27  ;;  %v2611_v32 = vpop.f32.mrb[1].mxu1  ;;  %v2501_v33 = vpop.f32.mrb[2].mxu0 }
  0xfe   : > { %v2612_v35 = vadd.f32 %v2611_v32, %v2610_v29  ;;  %v2613_v36 = vpop.f32.mrb[2].mxu1  ;;  %v2502_v37 = vpop.f32.mrb[3].mxu0 }
  0xff   : > { %v2503_v39 = vadd.f32 %v2502_v37, %v2501_v33  ;;  %v2614_v40 = vpop.f32.mrb[3].mxu1 }
 0x100   : > { %v1323_v41 = vadd.f32 %v2612_v35, %v2500_v31  ;;  %v2615_v42 = vadd.f32 %v2614_v40, %v2613_v36  ;;  %v1691_v31 = vadd.f32 %v3379_v24, %v1606_v13 }
 0x102   : > { %v1449_v44 = vadd.f32 %v1323_v41, %v519_v38  ;;  %v1326_v45 = vadd.f32 %v2615_v42, %v2503_v39  ;;  %2869 = vtanh.f32 %v1691_v31 }
 0x103   : > { %v2504_v50 = vpop.f32.mrb[4].mxu0 }
 0x104   : > { %1482 = vst.msk [vmem:[#allocation2] sm:$0xff] %vm417_vm0, %v1449_v44  ;;  %v1450_v51 = vadd.f32 %v1326_v45, %v520_v43  ;;  %v2616_v52 = vpop.f32.mrb[4].mxu1  ;;  %v2505_v53 = vpop.f32.mrb[5].mxu0  ;;  %v523_v43 = vld [vmem:[#allocation2 + $0x20] sm:$0xff] }
 0x105   : > { %v2506_v56 = vadd.f32 %v2505_v53, %v2504_v50  ;;  %v2617_v57 = vpop.f32.mrb[5].mxu1  ;;  %v2507_v58 = vpop.f32.mrb[6].mxu0  ;;  %v524_v50 = vld [vmem:[#allocation2 + $0x28] sm:$0xff] }
 0x106   : > { %1483 = vst.msk [vmem:[#allocation2 + $0x8] sm:$0xff] %vm417_vm0, %v1450_v51  ;;  %v2618_v61 = vadd.f32 %v2617_v57, %v2616_v52  ;;  %v2619_v49 = vpop.f32.mrb[6].mxu1  ;;  %v2508_v62 = vpop.f32.mrb[7].mxu0 }
 0x107   : > { %v2509_v0 = vadd.f32 %v2508_v62, %v2507_v58  ;;  %v2620_v2 = vpop.f32.mrb[7].mxu1  ;;  %v1609_v45 = vpop.xlane.xlu0 %1608 }
 0x108   : > { %v1331_v3 = vadd.f32 %v2618_v61, %v2506_v56  ;;  %v2621_v4 = vadd.f32 %v2620_v2, %v2619_v49  ;;  %v1612_v52 = vpop.xlane.xlu1 %1611  ;;  %v2866_v53 = vpop.eup %2865  ;;  %v2041_v56 = vld [vmem:[%s3391_s12 + $0x10] sm:$0xff]  ;;  %v1692_v59 = vadd.f32 %v3379_v24, %v1609_v45 }
 0x10a   : > { %v1451_v10 = vadd.f32 %v1331_v3, %v521_v63  ;;  %v1334_v12 = vadd.f32 %v2621_v4, %v2509_v0  ;;  %v2042_v0 = vld [vmem:[%s3391_s12 + $0x18] sm:$0xff]  ;;  %2871 = vtanh.f32 %v1692_v59 }
 0x10b   : > { %v1750_v15 = vld [vmem:[#allocation2] sm:$0xff]  ;;  %v2510_v17 = vpop.f32.mrb[8].mxu0 }
 0x10c   : > { %v1782_v21 = vmul.f32 %v2860_v7, %v1750_v15  ;;  %1484 = vst.msk [vmem:[#allocation2 + $0x10] sm:$0xff] %vm417_vm0, %v1451_v10  ;;  %v1452_v22 = vadd.f32 %v1334_v12, %v522_v9  ;;  %v2622_v23 = vpop.f32.mrb[8].mxu1  ;;  %v2511_v25 = vpop.f32.mrb[9].mxu0  ;;  %v1693_v7 = vadd.f32 %v3379_v24, %v1612_v52 }
 0x10d   : > { %v1751_v27 = vld [vmem:[#allocation2 + $0x8] sm:$0xff]  ;;  %v2512_v28 = vadd.f32 %v2511_v25, %v2510_v17  ;;  %v2623_v29 = vpop.f32.mrb[9].mxu1  ;;  %v2513_v30 = vpop.f32.mrb[10].mxu0  ;;  %v525_v25 = vld [vmem:[#allocation2 + $0x30] sm:$0xff] }
 0x10e   : > { %v2450_v32 = vpack.c.bf16 %v1782_v21, %v1782_v21  ;;  %v1975_v33 = vadd.f32 %v1782_v21, %v3169_v48  ;;  %v2071_v34 = vadd.f32 %v2039_v16, %v1782_v21  ;;  %v1783_v35 = vmul.f32 %v2862_v14, %v1751_v27  ;;  %1485 = vst.msk [vmem:[#allocation2 + $0x18] sm:$0xff] %vm417_vm0, %v1452_v22  ;;  %v2625_v36 = vpop.f32.mrb[10].mxu1  ;;  %v2514_v37 = vpop.f32.mrb[11].mxu0 }
 0x10f   : > { %v2624_v38 = vadd.f32 %v2623_v29, %v2622_v23  ;;  %v2515_v39 = vadd.f32 %v2514_v37, %v2513_v30  ;;  %v2626_v40 = vpop.f32.mrb[11].mxu1  ;;  %v1615_v21 = vpop.xlane.xlu0 %1614  ;;  %v526_v29 = vld [vmem:[#allocation2 + $0x38] sm:$0xff]  ;;  %2873 = vtanh.f32 %v1693_v7 }
 0x110   : > { %1943 = vst.msk [vmem:[%s3399_s15] sm:$0xf] %vm1942_vm1, %v2450_v32  ;;  %v2451_v48 = vpack.c.bf16 %v1783_v35, %v1783_v35  ;;  %v1976_v41 = vadd.f32 %v1783_v35, %v3182_v54  ;;  %v2072_v42 = vadd.f32 %v2040_v26, %v1783_v35  ;;  %v2627_v44 = vadd.f32 %v2626_v40, %v2625_v36  ;;  %v2868_v27 = vpop.eup %2867  ;;  %v2043_v35 = vld [vmem:[%s3391_s12 + $0x20] sm:$0xff] }
 0x111   : > { %2007 = vst.msk [vmem:[%s3406_s17] sm:$0xff] %vm417_vm0, %v1975_v33  ;;  %2103 = vst.msk [vmem:[%s3412_s20] sm:$0xff] %vm417_vm0, %v2071_v34  ;;  %v1339_v47 = vadd.f32 %v2624_v38, %v2512_v28  ;;  %v1694_v31 = vadd.f32 %v3379_v24, %v1615_v21  ;;  %v2870_v32 = vpop.eup %2869  ;;  %v1618_v34 = vpop.xlane.xlu1 %1617 }
 0x112   : > { %1944 = vst.msk [vmem:[%s3399_s15 + $0x4] sm:$0xf] %vm1942_vm1, %v2451_v48  ;;  %v1342_v51 = vadd.f32 %v2627_v44, %v2515_v39  ;;  %v2044_v48 = vld [vmem:[%s3391_s12 + $0x28] sm:$0xff] }
 0x113   : > { %2008 = vst.msk [vmem:[%s3406_s17 + $0x8] sm:$0xff] %vm417_vm0, %v1976_v41  ;;  %2104 = vst.msk [vmem:[%s3412_s20 + $0x8] sm:$0xff] %vm417_vm0, %v2072_v42  ;;  %v1752_v54 = vld [vmem:[#allocation2 + $0x10] sm:$0xff]  ;;  %v1453_v57 = vadd.f32 %v1339_v47, %v523_v43  ;;  %v2516_v58 = vpop.f32.mrb[12].mxu0  ;;  %2875 = vtanh.f32 %v1694_v31  ;;  %v1621_v59 = vpop.xlane.xlu0 %1620 }
 0x114   : > { %v1784_v61 = vmul.f32 %v2864_v46, %v1752_v54  ;;  %v1454_v49 = vadd.f32 %v1342_v51, %v524_v50  ;;  %v2628_v62 = vpop.f32.mrb[12].mxu1  ;;  %v2517_v63 = vpop.f32.mrb[13].mxu0  ;;  %v1695_v51 = vadd.f32 %v3379_v24, %v1618_v34 }
 0x115   : > { %v1753_v2 = vld [vmem:[#allocation2 + $0x18] sm:$0xff]  ;;  %1486 = vst.msk [vmem:[#allocation2 + $0x20] sm:$0xff] %vm417_vm0, %v1453_v57  ;;  %v2518_v3 = vadd.f32 %v2517_v63, %v2516_v58  ;;  %v2629_v4 = vpop.f32.mrb[13].mxu1  ;;  %v2519_v6 = vpop.f32.mrb[14].mxu0 }
 0x116   : > { %v2452_v9 = vpack.c.bf16 %v1784_v61, %v1784_v61  ;;  %v1977_v10 = vadd.f32 %v1784_v61, %v3185_v55  ;;  %v2073_v12 = vadd.f32 %v2041_v56, %v1784_v61  ;;  %v1785_v13 = vmul.f32 %v2866_v53, %v1753_v2  ;;  %1487 = vst.msk [vmem:[#allocation2 + $0x28] sm:$0xff] %vm417_vm0, %v1454_v49  ;;  %v2631_v14 = vpop.f32.mrb[14].mxu1  ;;  %v2520_v15 = vpop.f32.mrb[15].mxu0  ;;  %v527_v56 = vld [vmem:[#allocation2 + $0x40] sm:$0xff] }
 0x117   : > { %v2630_v16 = vadd.f32 %v2629_v4, %v2628_v62  ;;  %v2521_v17 = vadd.f32 %v2520_v15, %v2519_v6  ;;  %v2632_v19 = vpop.f32.mrb[15].mxu1  ;;  %2877 = vtanh.f32 %v1695_v51 }
 0x118   : > { %1945 = vst.msk [vmem:[%s3399_s15 + $0x8] sm:$0xf] %vm1942_vm1, %v2452_v9  ;;  %v2453_v55 = vpack.c.bf16 %v1785_v13, %v1785_v13  ;;  %v1978_v22 = vadd.f32 %v1785_v13, %v3194_v60  ;;  %v2074_v23 = vadd.f32 %v2042_v0, %v1785_v13  ;;  %v2633_v26 = vadd.f32 %v2632_v19, %v2631_v14  ;;  %v2872_v0 = vpop.eup %2871  ;;  %v1624_v9 = vpop.xlane.xlu1 %1623 }
 0x119   : > { %2009 = vst.msk [vmem:[%s3406_s17 + $0x10] sm:$0xff] %vm417_vm0, %v1977_v10  ;;  %2105 = vst.msk [vmem:[%s3412_s20 + $0x10] sm:$0xff] %vm417_vm0, %v2073_v12  ;;  %v1347_v28 = vadd.f32 %v2630_v16, %v2518_v3  ;;  %v1696_v3 = vadd.f32 %v3379_v24, %v1621_v59  ;;  %v2874_v4 = vpop.eup %2873  ;;  %v2045_v10 = vld [vmem:[%s3391_s12 + $0x30] sm:$0xff]  ;;  %v2046_v16 = vld [vmem:[%s3391_s12 + $0x38] sm:$0xff] }
 0x11a   : > { %1946 = vst.msk [vmem:[%s3399_s15 + $0xc] sm:$0xf] %vm1942_vm1, %v2453_v55  ;;  %v1350_v30 = vadd.f32 %v2633_v26, %v2521_v17 }
 0x11b   : > { %2010 = vst.msk [vmem:[%s3406_s17 + $0x18] sm:$0xff] %vm417_vm0, %v1978_v22  ;;  %2106 = vst.msk [vmem:[%s3412_s20 + $0x18] sm:$0xff] %vm417_vm0, %v2074_v23  ;;  %v1455_v60 = vadd.f32 %v1347_v28, %v525_v25  ;;  %v2522_v33 = vpop.f32.mrb[16].mxu0  ;;  %2879 = vtanh.f32 %v1696_v3  ;;  %v1697_v28 = vadd.f32 %v3379_v24, %v1624_v9 }
 0x11c   : > { %v1754_v36 = vld [vmem:[#allocation2 + $0x20] sm:$0xff]  ;;  %v1456_v37 = vadd.f32 %v1350_v30, %v526_v29  ;;  %v2634_v38 = vpop.f32.mrb[16].mxu1  ;;  %v2523_v39 = vpop.f32.mrb[17].mxu0 }
 0x11d   : > { %v1786_v40 = vmul.f32 %v2868_v27, %v1754_v36  ;;  %v1755_v41 = vld [vmem:[#allocation2 + $0x28] sm:$0xff]  ;;  %1488 = vst.msk [vmem:[#allocation2 + $0x30] sm:$0xff] %vm417_vm0, %v1455_v60  ;;  %v2524_v42 = vadd.f32 %v2523_v39, %v2522_v33  ;;  %v2635_v43 = vpop.f32.mrb[17].mxu1  ;;  %v2525_v44 = vpop.f32.mrb[18].mxu0  ;;  %2881 = vtanh.f32 %v1697_v28 }
 0x11e   : > { %v1787_v45 = vmul.f32 %v2870_v32, %v1755_v41  ;;  %1489 = vst.msk [vmem:[#allocation2 + $0x38] sm:$0xff] %vm417_vm0, %v1456_v37  ;;  %v2636_v46 = vadd.f32 %v2635_v43, %v2634_v38  ;;  %v2637_v47 = vpop.f32.mrb[18].mxu1  ;;  %v2526_v50 = vpop.f32.mrb[19].mxu0  ;;  %v529_v32 = vld [vmem:[#allocation2 + $0x50] sm:$0xff]  ;;  %v2047_v41 = vld [vmem:[%s3391_s12 + $0x40] sm:$0xff] }
 0x11f   : > { %v2454_v52 = vpack.c.bf16 %v1786_v40, %v1786_v40  ;;  %v1979_v53 = vadd.f32 %v1786_v40, %v3202_v1  ;;  %v2075_v54 = vadd.f32 %v2043_v35, %v1786_v40  ;;  %v2527_v57 = vadd.f32 %v2526_v50, %v2525_v44  ;;  %v2638_v58 = vpop.f32.mrb[19].mxu1  ;;  %v2876_v34 = vpop.eup %2875 }
 0x120   : > { %v2455_v61 = vpack.c.bf16 %v1787_v45, %v1787_v45  ;;  %v1980_v49 = vadd.f32 %v1787_v45, %v3209_v5  ;;  %v2076_v62 = vadd.f32 %v2044_v48, %v1787_v45  ;;  %v1355_v63 = vadd.f32 %v2636_v46, %v2524_v42  ;;  %v528_v5 = vld [vmem:[#allocation2 + $0x48] sm:$0xff]  ;;  %v1627_v39 = vpop.xlane.xlu0 %1626  ;;  %v530_v48 = vld [vmem:[#allocation2 + $0x58] sm:$0xff] }
 0x121   : > { %1947 = vst.msk [vmem:[%s3399_s15 + $0x10] sm:$0xf] %vm1942_vm1, %v2454_v52  ;;  %v2639_v1 = vadd.f32 %v2638_v58, %v2637_v47  ;;  %v1698_v45 = vadd.f32 %v3379_v24, %v1627_v39  ;;  %v2878_v46 = vpop.eup %2877 }
 0x122   : > { %2011 = vst.msk [vmem:[%s3406_s17 + $0x20] sm:$0xff] %vm417_vm0, %v1979_v53  ;;  %2107 = vst.msk [vmem:[%s3412_s20 + $0x20] sm:$0xff] %vm417_vm0, %v2075_v54  ;;  %v1457_v2 = vadd.f32 %v1355_v63, %v527_v56 }
 0x123   : > { %1948 = vst.msk [vmem:[%s3399_s15 + $0x14] sm:$0xf] %vm1942_vm1, %v2455_v61  ;;  %v1358_v6 = vadd.f32 %v2639_v1, %v2527_v57  ;;  %v2528_v7 = vpop.f32.mrb[20].mxu0  ;;  %2883 = vtanh.f32 %v1698_v45 }
 0x124   : > { %2012 = vst.msk [vmem:[%s3406_s17 + $0x28] sm:$0xff] %vm417_vm0, %v1980_v49  ;;  %2108 = vst.msk [vmem:[%s3412_s20 + $0x28] sm:$0xff] %vm417_vm0, %v2076_v62  ;;  %v1756_v12 = vld [vmem:[#allocation2 + $0x30] sm:$0xff]  ;;  %v2640_v13 = vpop.f32.mrb[20].mxu1  ;;  %v2529_v14 = vpop.f32.mrb[21].mxu0  ;;  %v2048_v49 = vld [vmem:[%s3391_s12 + $0x48] sm:$0xff] }
 0x125   : > { %1490 = vst.msk [vmem:[#allocation2 + $0x40] sm:$0xff] %vm417_vm0, %v1457_v2  ;;  %v1788_v15 = vmul.f32 %v2872_v0, %v1756_v12  ;;  %v1757_v17 = vld [vmem:[#allocation2 + $0x38] sm:$0xff]  ;;  %v1458_v19 = vadd.f32 %v1358_v6, %v528_v5  ;;  %v2530_v21 = vadd.f32 %v2529_v14, %v2528_v7  ;;  %v2641_v55 = vpop.f32.mrb[21].mxu1  ;;  %v2531_v22 = vpop.f32.mrb[22].mxu0  ;;  %v531_v5 = vld [vmem:[#allocation2 + $0x60] sm:$0xff]  ;;  %v532_v14 = vld [vmem:[#allocation2 + $0x68] sm:$0xff] }
 0x126   : > { %v1789_v23 = vmul.f32 %v2874_v4, %v1757_v17  ;;  %v2642_v25 = vadd.f32 %v2641_v55, %v2640_v13  ;;  %v2643_v26 = vpop.f32.mrb[22].mxu1  ;;  %v2532_v27 = vpop.f32.mrb[23].mxu0 }
 0x127   : > { %v2456_v29 = vpack.c.bf16 %v1788_v15, %v1788_v15  ;;  %v1981_v30 = vadd.f32 %v1788_v15, %v3215_v8  ;;  %v2077_v31 = vadd.f32 %v2045_v10, %v1788_v15  ;;  %1491 = vst.msk [vmem:[#allocation2 + $0x48] sm:$0xff] %vm417_vm0, %v1458_v19  ;;  %v2533_v60 = vadd.f32 %v2532_v27, %v2531_v22  ;;  %v2644_v33 = vpop.f32.mrb[23].mxu1  ;;  %v2880_v6 = vpop.eup %2879  ;;  %v2049_v19 = vld [vmem:[%s3391_s12 + $0x50] sm:$0xff] }
 0x128   : > { %v2457_v35 = vpack.c.bf16 %v1789_v23, %v1789_v23  ;;  %v1982_v36 = vadd.f32 %v1789_v23, %v3221_v11  ;;  %v2078_v37 = vadd.f32 %v2046_v16, %v1789_v23  ;;  %v1363_v38 = vadd.f32 %v2642_v25, %v2530_v21  ;;  %v1630_v11 = vpop.xlane.xlu1 %1629  ;;  %v1633_v9 = vpop.xlane.xlu0 %1632 }
 0x129   : > { %1949 = vst.msk [vmem:[%s3399_s15 + $0x18] sm:$0xf] %vm1942_vm1, %v2456_v29  ;;  %v2645_v8 = vadd.f32 %v2644_v33, %v2643_v26  ;;  %v1699_v57 = vadd.f32 %v3379_v24, %v1630_v11  ;;  %v1700_v22 = vadd.f32 %v3379_v24, %v1633_v9 }
 0x12a   : > { %2013 = vst.msk [vmem:[%s3406_s17 + $0x30] sm:$0xff] %vm417_vm0, %v1981_v30  ;;  %2109 = vst.msk [vmem:[%s3412_s20 + $0x30] sm:$0xff] %vm417_vm0, %v2077_v31  ;;  %v1459_v40 = vadd.f32 %v1363_v38, %v529_v32 }
 0x12b   : > { %1950 = vst.msk [vmem:[%s3399_s15 + $0x1c] sm:$0xf] %vm1942_vm1, %v2457_v35  ;;  %v1366_v43 = vadd.f32 %v2645_v8, %v2533_v60  ;;  %v2534_v44 = vpop.f32.mrb[24].mxu0  ;;  %2885 = vtanh.f32 %v1699_v57  ;;  %v2923_v60 = vld [vmem:[%s3164_s25 + $0x50] sm:$0xff]  ;;  %v2050_v35 = vld [vmem:[%s3391_s12 + $0x58] sm:$0xff]  ;;  %v2051_v57 = vld [vmem:[%s3391_s12 + $0x60] sm:$0xff] }
 0x12c   : > { %2014 = vst.msk [vmem:[%s3406_s17 + $0x38] sm:$0xff] %vm417_vm0, %v1982_v36  ;;  %2110 = vst.msk [vmem:[%s3412_s20 + $0x38] sm:$0xff] %vm417_vm0, %v2078_v37  ;;  %v1758_v42 = vld [vmem:[#allocation2 + $0x40] sm:$0xff]  ;;  %v2646_v50 = vpop.f32.mrb[24].mxu1  ;;  %v2535_v51 = vpop.f32.mrb[25].mxu0  ;;  %2887 = vtanh.f32 %v1700_v22 }
 0x12d   : > { %v1790_v47 = vmul.f32 %v2876_v34, %v1758_v42  ;;  %1492 = vst.msk [vmem:[#allocation2 + $0x50] sm:$0xff] %vm417_vm0, %v1459_v40  ;;  %v1460_v52 = vadd.f32 %v1366_v43, %v530_v48  ;;  %v2536_v53 = vadd.f32 %v2535_v51, %v2534_v44  ;;  %v2647_v54 = vpop.f32.mrb[25].mxu1  ;;  %v2537_v56 = vpop.f32.mrb[26].mxu0  ;;  %v533_v40 = vld [vmem:[#allocation2 + $0x70] sm:$0xff]  ;;  %v534_v51 = vld [vmem:[#allocation2 + $0x78] sm:$0xff] }
 0x12e   : > { %v1759_v62 = vld [vmem:[#allocation2 + $0x48] sm:$0xff]  ;;  %v2648_v63 = vadd.f32 %v2647_v54, %v2646_v50  ;;  %v2649_v0 = vpop.f32.mrb[26].mxu1  ;;  %v2538_v1 = vpop.f32.mrb[27].mxu0 }
 0x12f   : > { %v2458_v58 = vpack.c.bf16 %v1790_v47, %v1790_v47  ;;  %v1983_v59 = vadd.f32 %v1790_v47, %v3231_v18  ;;  %v2079_v61 = vadd.f32 %v2047_v41, %v1790_v47  ;;  %v1791_v2 = vmul.f32 %v2878_v46, %v1759_v62  ;;  %1493 = vst.msk [vmem:[#allocation2 + $0x58] sm:$0xff] %vm417_vm0, %v1460_v52  ;;  %v2650_v4 = vpop.f32.mrb[27].mxu1  ;;  %v1636_v17 = vpop.xlane.xlu1 %1635  ;;  %v2924_v46 = vld [vmem:[%s3164_s25 + $0x58] sm:$0xff] }
 0x130   : > { %v2539_v3 = vadd.f32 %v2538_v1, %v2537_v56  ;;  %v1371_v18 = vadd.f32 %v2648_v63, %v2536_v53  ;;  %v2651_v7 = vadd.f32 %v2650_v4, %v2649_v0  ;;  %v1701_v31 = vadd.f32 %v3379_v24, %v1636_v17  ;;  %v1639_v43 = vpop.xlane.xlu0 %1638  ;;  %v2052_v1 = vld [vmem:[%s3391_s12 + $0x68] sm:$0xff] }
 0x131   : > { %1951 = vst.msk [vmem:[%s3399_s15 + $0x20] sm:$0xf] %vm1942_vm1, %v2458_v58  ;;  %v2459_v10 = vpack.c.bf16 %v1791_v2, %v1791_v2  ;;  %v1984_v12 = vadd.f32 %v1791_v2, %v3236_v20  ;;  %v2080_v13 = vadd.f32 %v2048_v49, %v1791_v2  ;;  %v2882_v20 = vpop.eup %2881 }
 0x132   : > { %2015 = vst.msk [vmem:[%s3406_s17 + $0x40] sm:$0xff] %vm417_vm0, %v1983_v59  ;;  %2111 = vst.msk [vmem:[%s3412_s20 + $0x40] sm:$0xff] %vm417_vm0, %v2079_v61  ;;  %v1461_v15 = vadd.f32 %v1371_v18, %v531_v5  ;;  %v1374_v16 = vadd.f32 %v2651_v7, %v2539_v3  ;;  %v2884_v44 = vpop.eup %2883  ;;  %2889 = vtanh.f32 %v1701_v31  ;;  %v1702_v61 = vadd.f32 %v3379_v24, %v1639_v43  ;;  %v2925_v7 = vld [vmem:[%s3164_s25 + $0x60] sm:$0xff] }
 0x133   : > { %1952 = vst.msk [vmem:[%s3399_s15 + $0x24] sm:$0xf] %vm1942_vm1, %v2459_v10  ;;  %v2540_v55 = vpop.f32.mrb[28].mxu0  ;;  %v1642_v54 = vpop.xlane.xlu1 %1641 }
 0x134   : > { %2016 = vst.msk [vmem:[%s3406_s17 + $0x48] sm:$0xff] %vm417_vm0, %v1984_v12  ;;  %2112 = vst.msk [vmem:[%s3412_s20 + $0x48] sm:$0xff] %vm417_vm0, %v2080_v13  ;;  %v1760_v21 = vld [vmem:[#allocation2 + $0x50] sm:$0xff]  ;;  %v1462_v25 = vadd.f32 %v1374_v16, %v532_v14  ;;  %v2652_v26 = vpop.f32.mrb[28].mxu1  ;;  %v2541_v27 = vpop.f32.mrb[29].mxu0  ;;  %2891 = vtanh.f32 %v1702_v61 }
 0x135   : > { %v1792_v23 = vmul.f32 %v2880_v6, %v1760_v21  ;;  %1494 = vst.msk [vmem:[#allocation2 + $0x60] sm:$0xff] %vm417_vm0, %v1461_v15  ;;  %v2542_v28 = vadd.f32 %v2541_v27, %v2540_v55  ;;  %v2653_v29 = vpop.f32.mrb[29].mxu1  ;;  %v2543_v30 = vpop.f32.mrb[30].mxu0  ;;  %v1703_v6 = vadd.f32 %v3379_v24, %v1642_v54  ;;  %v2926_v21 = vld [vmem:[%s3164_s25 + $0x68] sm:$0xff] }
 0x136   : > { %v1761_v36 = vld [vmem:[#allocation2 + $0x58] sm:$0xff]  ;;  %1495 = vst.msk [vmem:[#allocation2 + $0x68] sm:$0xff] %vm417_vm0, %v1462_v25  ;;  %v2654_v37 = vadd.f32 %v2653_v29, %v2652_v26  ;;  %v2655_v38 = vpop.f32.mrb[30].mxu1  ;;  %v2544_v39 = vpop.f32.mrb[31].mxu0 }
 0x137   : > { %v2460_v32 = vpack.c.bf16 %v1792_v23, %v1792_v23  ;;  %v1985_v33 = vadd.f32 %v2923_v60, %v1792_v23  ;;  %v2081_v34 = vadd.f32 %v2049_v19, %v1792_v23  ;;  %v1793_v8 = vmul.f32 %v2882_v20, %v1761_v36  ;;  %v2656_v11 = vpop.f32.mrb[31].mxu1  ;;  %v2886_v56 = vpop.eup %2885  ;;  %v535_v20 = vld [vmem:[#allocation2 + $0x80] sm:$0xff] }
 0x138   : > { %v2545_v48 = vadd.f32 %v2544_v39, %v2543_v30  ;;  %v1379_v41 = vadd.f32 %v2654_v37, %v2542_v28  ;;  %v2657_v42 = vadd.f32 %v2656_v11, %v2655_v38  ;;  %v1645_v25 = vpop.xlane.xlu0 %1644  ;;  %v2888_v26 = vpop.eup %2887  ;;  %v536_v28 = vld [vmem:[#allocation2 + $0x88] sm:$0xff]  ;;  %2893 = vtanh.f32 %v1703_v6 }
 0x139   : > { %1953 = vst.msk [vmem:[%s3399_s15 + $0x28] sm:$0xf] %vm1942_vm1, %v2460_v32  ;;  %v2461_v45 = vpack.c.bf16 %v1793_v8, %v1793_v8  ;;  %v1986_v47 = vadd.f32 %v2924_v46, %v1793_v8  ;;  %v2082_v50 = vadd.f32 %v2050_v35, %v1793_v8  ;;  %v1648_v30 = vpop.xlane.xlu1 %1647  ;;  %v2053_v32 = vld [vmem:[%s3391_s12 + $0x70] sm:$0xff]  ;;  %v1704_v35 = vadd.f32 %v3379_v24, %v1645_v25  ;;  %v2054_v8 = vld [vmem:[%s3391_s12 + $0x78] sm:$0xff] }
 0x13a   : > { %2017 = vst.msk [vmem:[%s3406_s17 + $0x50] sm:$0xff] %vm417_vm0, %v1985_v33  ;;  %2113 = vst.msk [vmem:[%s3412_s20 + $0x50] sm:$0xff] %vm417_vm0, %v2081_v34  ;;  %v1463_v52 = vadd.f32 %v1379_v41, %v533_v40  ;;  %v1382_v53 = vadd.f32 %v2657_v42, %v2545_v48  ;;  %v1705_v42 = vadd.f32 %v3379_v24, %v1648_v30  ;;  %v539_v30 = vld [vmem:[#allocation2 + $0xa0] sm:$0xff] }
 0x13b   : > { %1954 = vst.msk [vmem:[%s3399_s15 + $0x2c] sm:$0xf] %vm1942_vm1, %v2461_v45  ;;  %v2546_v59 = vpop.f32.mrb[32].mxu0  ;;  %2895 = vtanh.f32 %v1704_v35 }
 0x13c   : > { %2018 = vst.msk [vmem:[%s3406_s17 + $0x58] sm:$0xff] %vm417_vm0, %v1986_v47  ;;  %2114 = vst.msk [vmem:[%s3412_s20 + $0x58] sm:$0xff] %vm417_vm0, %v2082_v50  ;;  %v1762_v58 = vld [vmem:[#allocation2 + $0x60] sm:$0xff]  ;;  %v1464_v62 = vadd.f32 %v1382_v53, %v534_v51  ;;  %v2658_v63 = vpop.f32.mrb[32].mxu1  ;;  %v2547_v0 = vpop.f32.mrb[33].mxu0  ;;  %2897 = vtanh.f32 %v1705_v42 }
 0x13d   : > { %v1794_v49 = vmul.f32 %v2884_v44, %v1762_v58  ;;  %1496 = vst.msk [vmem:[#allocation2 + $0x70] sm:$0xff] %vm417_vm0, %v1463_v52  ;;  %v1763_v2 = vld [vmem:[#allocation2 + $0x68] sm:$0xff]  ;;  %v2548_v5 = vadd.f32 %v2547_v0, %v2546_v59  ;;  %v2659_v3 = vpop.f32.mrb[33].mxu1  ;;  %v2549_v4 = vpop.f32.mrb[34].mxu0  ;;  %v2927_v44 = vld [vmem:[%s3164_s25 + $0x70] sm:$0xff]  ;;  %v2928_v58 = vld [vmem:[%s3164_s25 + $0x78] sm:$0xff] }
 0x13e   : > { %v1795_v12 = vmul.f32 %v2886_v56, %v1763_v2  ;;  %1497 = vst.msk [vmem:[#allocation2 + $0x78] sm:$0xff] %vm417_vm0, %v1464_v62  ;;  %v2661_v13 = vpop.f32.mrb[34].mxu1  ;;  %v2550_v14 = vpop.f32.mrb[35].mxu0  ;;  %v2660_v15 = vadd.f32 %v2659_v3, %v2658_v63 }
 0x13f   : > { %v2462_v18 = vpack.c.bf16 %v1794_v49, %v1794_v49  ;;  %v1987_v9 = vadd.f32 %v2925_v7, %v1794_v49  ;;  %v2083_v10 = vadd.f32 %v2051_v57, %v1794_v49  ;;  %v2551_v16 = vadd.f32 %v2550_v14, %v2549_v4  ;;  %v2662_v17 = vpop.f32.mrb[35].mxu1  ;;  %v2890_v31 = vpop.eup %2889  ;;  %v537_v49 = vld [vmem:[#allocation2 + $0x90] sm:$0xff]  ;;  %v2055_v7 = vld [vmem:[%s3391_s12 + $0x80] sm:$0xff] }
 0x140   : > { %v2463_v19 = vpack.c.bf16 %v1795_v12, %v1795_v12  ;;  %v1988_v55 = vadd.f32 %v2926_v21, %v1795_v12  ;;  %v2084_v22 = vadd.f32 %v2052_v1, %v1795_v12  ;;  %v2663_v23 = vadd.f32 %v2662_v17, %v2661_v13  ;;  %v1651_v56 = vpop.xlane.xlu0 %1650  ;;  %v2892_v63 = vpop.eup %2891  ;;  %v538_v1 = vld [vmem:[#allocation2 + $0x98] sm:$0xff] }
 0x141   : > { %1955 = vst.msk [vmem:[%s3399_s15 + $0x30] sm:$0xf] %vm1942_vm1, %v2462_v18  ;;  %v1387_v27 = vadd.f32 %v2660_v15, %v2548_v5  ;;  %v1706_v5 = vadd.f32 %v3379_v24, %v1651_v56  ;;  %v1654_v18 = vpop.xlane.xlu1 %1653  ;;  %v2056_v15 = vld [vmem:[%s3391_s12 + $0x88] sm:$0xff] }
 0x142   : > { %2019 = vst.msk [vmem:[%s3406_s17 + $0x60] sm:$0xff] %vm417_vm0, %v1987_v9  ;;  %2115 = vst.msk [vmem:[%s3412_s20 + $0x60] sm:$0xff] %vm417_vm0, %v2083_v10  ;;  %v1390_v29 = vadd.f32 %v2663_v23, %v2551_v16  ;;  %v2894_v3 = vpop.eup %2893  ;;  %v1707_v25 = vadd.f32 %v3379_v24, %v1654_v18 }
 0x143   : > { %1956 = vst.msk [vmem:[%s3399_s15 + $0x34] sm:$0xf] %vm1942_vm1, %v2463_v19  ;;  %v1465_v33 = vadd.f32 %v1387_v27, %v535_v20  ;;  %v2552_v34 = vpop.f32.mrb[36].mxu0  ;;  %2899 = vtanh.f32 %v1706_v5  ;;  %v2929_v27 = vld [vmem:[%s3164_s25 + $0x80] sm:$0xff]  ;;  %v541_v5 = vld [vmem:[#allocation2 + $0xb0] sm:$0xff] }
 0x144   : > { %2020 = vst.msk [vmem:[%s3406_s17 + $0x68] sm:$0xff] %vm417_vm0, %v1988_v55  ;;  %2116 = vst.msk [vmem:[%s3412_s20 + $0x68] sm:$0xff] %vm417_vm0, %v2084_v22  ;;  %v1764_v60 = vld [vmem:[#allocation2 + $0x70] sm:$0xff]  ;;  %v1466_v37 = vadd.f32 %v1390_v29, %v536_v28  ;;  %v2664_v38 = vpop.f32.mrb[36].mxu1  ;;  %v2553_v39 = vpop.f32.mrb[37].mxu0  ;;  %2901 = vtanh.f32 %v1707_v25 }
 0x145   : > { %v1796_v36 = vmul.f32 %v2888_v26, %v1764_v60  ;;  %v1765_v40 = vld [vmem:[#allocation2 + $0x78] sm:$0xff]  ;;  %1498 = vst.msk [vmem:[#allocation2 + $0x80] sm:$0xff] %vm417_vm0, %v1465_v33  ;;  %v2554_v48 = vadd.f32 %v2553_v39, %v2552_v34  ;;  %v2665_v11 = vpop.f32.mrb[37].mxu1  ;;  %v2555_v41 = vpop.f32.mrb[38].mxu0  ;;  %v2930_v34 = vld [vmem:[%s3164_s25 + $0x88] sm:$0xff] }
 0x146   : > { %v1797_v47 = vmul.f32 %v2890_v31, %v1765_v40  ;;  %1499 = vst.msk [vmem:[#allocation2 + $0x88] sm:$0xff] %vm417_vm0, %v1466_v37  ;;  %v2667_v50 = vpop.f32.mrb[38].mxu1  ;;  %v2556_v51 = vpop.f32.mrb[39].mxu0  ;;  %v2666_v52 = vadd.f32 %v2665_v11, %v2664_v38  ;;  %v540_v40 = vld [vmem:[#allocation2 + $0xa8] sm:$0xff] }
 0x147   : > { %v2464_v43 = vpack.c.bf16 %v1796_v36, %v1796_v36  ;;  %v1989_v45 = vadd.f32 %v2927_v44, %v1796_v36  ;;  %v2085_v46 = vadd.f32 %v2053_v32, %v1796_v36  ;;  %v2557_v53 = vadd.f32 %v2556_v51, %v2555_v41  ;;  %v2668_v54 = vpop.f32.mrb[39].mxu1  ;;  %v1657_v60 = vpop.xlane.xlu0 %1656  ;;  %v2057_v44 = vld [vmem:[%s3391_s12 + $0x90] sm:$0xff]  ;;  %v2058_v51 = vld [vmem:[%s3391_s12 + $0x98] sm:$0xff] }
 0x148   : > { %v2465_v57 = vpack.c.bf16 %v1797_v47, %v1797_v47  ;;  %v1990_v59 = vadd.f32 %v2928_v58, %v1797_v47  ;;  %v2086_v61 = vadd.f32 %v2054_v8, %v1797_v47  ;;  %v2669_v62 = vadd.f32 %v2668_v54, %v2667_v50  ;;  %v2896_v38 = vpop.eup %2895 }
 0x149   : > { %1957 = vst.msk [vmem:[%s3399_s15 + $0x38] sm:$0xf] %vm1942_vm1, %v2464_v43  ;;  %v1395_v0 = vadd.f32 %v2666_v52, %v2554_v48  ;;  %v1708_v48 = vadd.f32 %v3379_v24, %v1657_v60  ;;  %v2898_v11 = vpop.eup %2897  ;;  %v1660_v43 = vpop.xlane.xlu1 %1659 }
 0x14a   : > { %2021 = vst.msk [vmem:[%s3406_s17 + $0x70] sm:$0xff] %vm417_vm0, %v1989_v45  ;;  %2117 = vst.msk [vmem:[%s3412_s20 + $0x70] sm:$0xff] %vm417_vm0, %v2085_v46  ;;  %v1398_v2 = vadd.f32 %v2669_v62, %v2557_v53  ;;  %v1709_v62 = vadd.f32 %v3379_v24, %v1660_v43 }
 0x14b   : > { %1958 = vst.msk [vmem:[%s3399_s15 + $0x3c] sm:$0xf] %vm1942_vm1, %v2465_v57  ;;  %v1467_v4 = vadd.f32 %v1395_v0, %v537_v49  ;;  %v2558_v6 = vpop.f32.mrb[40].mxu0  ;;  %2903 = vtanh.f32 %v1708_v48  ;;  %v2931_v0 = vld [vmem:[%s3164_s25 + $0x90] sm:$0xff]  ;;  %v543_v48 = vld [vmem:[#allocation2 + $0xc0] sm:$0xff] }
 0x14c   : > { %2022 = vst.msk [vmem:[%s3406_s17 + $0x78] sm:$0xff] %vm417_vm0, %v1990_v59  ;;  %2118 = vst.msk [vmem:[%s3412_s20 + $0x78] sm:$0xff] %vm417_vm0, %v2086_v61  ;;  %v1766_v9 = vld [vmem:[#allocation2 + $0x80] sm:$0xff]  ;;  %v1468_v10 = vadd.f32 %v1398_v2, %v538_v1  ;;  %v2670_v12 = vpop.f32.mrb[40].mxu1  ;;  %v2559_v13 = vpop.f32.mrb[41].mxu0  ;;  %2905 = vtanh.f32 %v1709_v62 }
 0x14d   : > { %v1798_v14 = vmul.f32 %v2892_v63, %v1766_v9  ;;  %v1767_v16 = vld [vmem:[#allocation2 + $0x88] sm:$0xff]  ;;  %1500 = vst.msk [vmem:[#allocation2 + $0x90] sm:$0xff] %vm417_vm0, %v1467_v4  ;;  %v2560_v17 = vadd.f32 %v2559_v13, %v2558_v6  ;;  %v2671_v19 = vpop.f32.mrb[41].mxu1  ;;  %v2561_v21 = vpop.f32.mrb[42].mxu0 }
 0x14e   : > { %v1799_v55 = vmul.f32 %v2894_v3, %v1767_v16  ;;  %1501 = vst.msk [vmem:[#allocation2 + $0x98] sm:$0xff] %vm417_vm0, %v1468_v10  ;;  %v2672_v22 = vadd.f32 %v2671_v19, %v2670_v12  ;;  %v2673_v20 = vpop.f32.mrb[42].mxu1  ;;  %v2562_v23 = vpop.f32.mrb[43].mxu0  ;;  %v542_v16 = vld [vmem:[#allocation2 + $0xb8] sm:$0xff]  ;;  %v2059_v19 = vld [vmem:[%s3391_s12 + $0xa0] sm:$0xff] }
 0x14f   : > { %v2466_v26 = vpack.c.bf16 %v1798_v14, %v1798_v14  ;;  %v1991_v28 = vadd.f32 %v2929_v27, %v1798_v14  ;;  %v2087_v29 = vadd.f32 %v2055_v7, %v1798_v14  ;;  %v2563_v31 = vadd.f32 %v2562_v23, %v2561_v21  ;;  %v2674_v32 = vpop.f32.mrb[43].mxu1  ;;  %v2900_v6 = vpop.eup %2899  ;;  %v2932_v7 = vld [vmem:[%s3164_s25 + $0x98] sm:$0xff] }
 0x150   : > { %v2467_v33 = vpack.c.bf16 %v1799_v55, %v1799_v55  ;;  %v1992_v35 = vadd.f32 %v2930_v34, %v1799_v55  ;;  %v2088_v36 = vadd.f32 %v2056_v15, %v1799_v55  ;;  %v1403_v37 = vadd.f32 %v2672_v22, %v2560_v17  ;;  %v1663_v13 = vpop.xlane.xlu0 %1662  ;;  %v1666_v17 = vpop.xlane.xlu1 %1665 }
 0x151   : > { %1959 = vst.msk [vmem:[%s3399_s15 + $0x40] sm:$0xf] %vm1942_vm1, %v2466_v26  ;;  %v2675_v39 = vadd.f32 %v2674_v32, %v2673_v20  ;;  %v1710_v20 = vadd.f32 %v3379_v24, %v1663_v13  ;;  %v2902_v23 = vpop.eup %2901  ;;  %v1711_v32 = vadd.f32 %v3379_v24, %v1666_v17  ;;  %v545_v17 = vld [vmem:[#allocation2 + $0xd0] sm:$0xff] }
 0x152   : > { %2023 = vst.msk [vmem:[%s3406_s17 + $0x80] sm:$0xff] %vm417_vm0, %v1991_v28  ;;  %2119 = vst.msk [vmem:[%s3412_s20 + $0x80] sm:$0xff] %vm417_vm0, %v2087_v29  ;;  %v1469_v8 = vadd.f32 %v1403_v37, %v539_v30 }
 0x153   : > { %1960 = vst.msk [vmem:[%s3399_s15 + $0x44] sm:$0xf] %vm1942_vm1, %v2467_v33  ;;  %v1406_v41 = vadd.f32 %v2675_v39, %v2563_v31  ;;  %v2564_v42 = vpop.f32.mrb[44].mxu0  ;;  %v2933_v33 = vld [vmem:[%s3164_s25 + $0xa0] sm:$0xff]  ;;  %2907 = vtanh.f32 %v1710_v20 }
 0x154   : > { %2024 = vst.msk [vmem:[%s3406_s17 + $0x88] sm:$0xff] %vm417_vm0, %v1992_v35  ;;  %2120 = vst.msk [vmem:[%s3412_s20 + $0x88] sm:$0xff] %vm417_vm0, %v2088_v36  ;;  %v1768_v45 = vld [vmem:[#allocation2 + $0x90] sm:$0xff]  ;;  %v2676_v46 = vpop.f32.mrb[44].mxu1  ;;  %v2565_v47 = vpop.f32.mrb[45].mxu0  ;;  %v2060_v36 = vld [vmem:[%s3391_s12 + $0xa8] sm:$0xff]  ;;  %2909 = vtanh.f32 %v1711_v32 }
 0x155   : > { %1502 = vst.msk [vmem:[#allocation2 + $0xa0] sm:$0xff] %vm417_vm0, %v1469_v8  ;;  %v1800_v50 = vmul.f32 %v2896_v38, %v1768_v45  ;;  %v1769_v52 = vld [vmem:[#allocation2 + $0x98] sm:$0xff]  ;;  %v1470_v53 = vadd.f32 %v1406_v41, %v540_v40  ;;  %v2566_v54 = vadd.f32 %v2565_v47, %v2564_v42  ;;  %v2677_v56 = vpop.f32.mrb[45].mxu1  ;;  %v2567_v57 = vpop.f32.mrb[46].mxu0  ;;  %v2934_v47 = vld [vmem:[%s3164_s25 + $0xa8] sm:$0xff] }
 0x156   : > { %v1801_v58 = vmul.f32 %v2898_v11, %v1769_v52  ;;  %v2678_v59 = vadd.f32 %v2677_v56, %v2676_v46  ;;  %v2679_v61 = vpop.f32.mrb[46].mxu1  ;;  %v2568_v49 = vpop.f32.mrb[47].mxu0  ;;  %v544_v52 = vld [vmem:[#allocation2 + $0xc8] sm:$0xff] }
 0x157   : > { %v2468_v63 = vpack.c.bf16 %v1800_v50, %v1800_v50  ;;  %v1993_v1 = vadd.f32 %v2931_v0, %v1800_v50  ;;  %v2089_v2 = vadd.f32 %v2057_v44, %v1800_v50  ;;  %1503 = vst.msk [vmem:[#allocation2 + $0xa8] sm:$0xff] %vm417_vm0, %v1470_v53  ;;  %v2569_v3 = vadd.f32 %v2568_v49, %v2567_v57  ;;  %v2680_v4 = vpop.f32.mrb[47].mxu1  ;;  %v2904_v42 = vpop.eup %2903  ;;  %v2061_v57 = vld [vmem:[%s3391_s12 + $0xb0] sm:$0xff] }
 0x158   : > { %v2469_v18 = vpack.c.bf16 %v1801_v58, %v1801_v58  ;;  %v1994_v9 = vadd.f32 %v2932_v7, %v1801_v58  ;;  %v2090_v10 = vadd.f32 %v2058_v51, %v1801_v58  ;;  %v1411_v12 = vadd.f32 %v2678_v59, %v2566_v54  ;;  %v1669_v45 = vpop.xlane.xlu0 %1668  ;;  %v1672_v56 = vpop.xlane.xlu1 %1671 }
 0x159   : > { %1961 = vst.msk [vmem:[%s3399_s15 + $0x48] sm:$0xf] %vm1942_vm1, %v2468_v63  ;;  %v2681_v14 = vadd.f32 %v2680_v4, %v2679_v61  ;;  %v1712_v61 = vadd.f32 %v3379_v24, %v1669_v45  ;;  %v2906_v49 = vpop.eup %2905  ;;  %v1713_v4 = vadd.f32 %v3379_v24, %v1672_v56  ;;  %v2937_v45 = vld [vmem:[%s3164_s25 + $0xc0] sm:$0xff] }
 0x15a   : > { %2025 = vst.msk [vmem:[%s3406_s17 + $0x90] sm:$0xff] %vm417_vm0, %v1993_v1  ;;  %2121 = vst.msk [vmem:[%s3412_s20 + $0x90] sm:$0xff] %vm417_vm0, %v2089_v2  ;;  %v1471_v15 = vadd.f32 %v1411_v12, %v541_v5 }
 0x15b   : > { %1962 = vst.msk [vmem:[%s3399_s15 + $0x4c] sm:$0xf] %vm1942_vm1, %v2469_v18  ;;  %v1414_v55 = vadd.f32 %v2681_v14, %v2569_v3  ;;  %v2570_v22 = vpop.f32.mrb[48].mxu0  ;;  %v2935_v18 = vld [vmem:[%s3164_s25 + $0xb0] sm:$0xff]  ;;  %2911 = vtanh.f32 %v1712_v61 }
 0x15c   : > { %2026 = vst.msk [vmem:[%s3406_s17 + $0x98] sm:$0xff] %vm417_vm0, %v1994_v9  ;;  %2122 = vst.msk [vmem:[%s3412_s20 + $0x98] sm:$0xff] %vm417_vm0, %v2090_v10  ;;  %v1770_v21 = vld [vmem:[#allocation2 + $0xa0] sm:$0xff]  ;;  %v2682_v26 = vpop.f32.mrb[48].mxu1  ;;  %v2571_v27 = vpop.f32.mrb[49].mxu0  ;;  %v2062_v10 = vld [vmem:[%s3391_s12 + $0xb8] sm:$0xff]  ;;  %2913 = vtanh.f32 %v1713_v4 }
 0x15d   : > { %v1802_v25 = vmul.f32 %v2900_v6, %v1770_v21  ;;  %1504 = vst.msk [vmem:[#allocation2 + $0xb0] sm:$0xff] %vm417_vm0, %v1471_v15  ;;  %v1472_v28 = vadd.f32 %v1414_v55, %v542_v16  ;;  %v2572_v29 = vadd.f32 %v2571_v27, %v2570_v22  ;;  %v2683_v30 = vpop.f32.mrb[49].mxu1  ;;  %v2573_v31 = vpop.f32.mrb[50].mxu0 }
 0x15e   : > { %v1771_v37 = vld [vmem:[#allocation2 + $0xa8] sm:$0xff]  ;;  %v2684_v38 = vadd.f32 %v2683_v30, %v2682_v26  ;;  %v2685_v39 = vpop.f32.mrb[50].mxu1  ;;  %v2574_v8 = vpop.f32.mrb[51].mxu0  ;;  %v2936_v26 = vld [vmem:[%s3164_s25 + $0xb8] sm:$0xff] }
 0x15f   : > { %v2470_v60 = vpack.c.bf16 %v1802_v25, %v1802_v25  ;;  %v1995_v34 = vadd.f32 %v2933_v33, %v1802_v25  ;;  %v2091_v35 = vadd.f32 %v2059_v19, %v1802_v25  ;;  %v1803_v40 = vmul.f32 %v2902_v23, %v1771_v37  ;;  %1505 = vst.msk [vmem:[#allocation2 + $0xb8] sm:$0xff] %vm417_vm0, %v1472_v28  ;;  %v2686_v41 = vpop.f32.mrb[51].mxu1  ;;  %v1675_v20 = vpop.xlane.xlu0 %1674  ;;  %v2063_v33 = vld [vmem:[%s3391_s12 + $0xc0] sm:$0xff] }
 0x160   : > { %v2575_v11 = vadd.f32 %v2574_v8, %v2573_v31  ;;  %v1419_v43 = vadd.f32 %v2684_v38, %v2572_v29  ;;  %v2687_v44 = vadd.f32 %v2686_v41, %v2685_v39  ;;  %v2908_v23 = vpop.eup %2907  ;;  %v546_v29 = vld [vmem:[#allocation2 + $0xd8] sm:$0xff]  ;;  %v1678_v32 = vpop.xlane.xlu1 %1677 }
 0x161   : > { %1963 = vst.msk [vmem:[%s3399_s15 + $0x50] sm:$0xf] %vm1942_vm1, %v2470_v60  ;;  %v2471_v46 = vpack.c.bf16 %v1803_v40, %v1803_v40  ;;  %v1996_v50 = vadd.f32 %v2934_v47, %v1803_v40  ;;  %v2092_v51 = vadd.f32 %v2060_v36, %v1803_v40  ;;  %v2910_v60 = vpop.eup %2909  ;;  %v1714_v36 = vadd.f32 %v3379_v24, %v1675_v20  ;;  %v2064_v40 = vld [vmem:[%s3391_s12 + $0xc8] sm:$0xff] }
 0x162   : > { %2027 = vst.msk [vmem:[%s3406_s17 + $0xa0] sm:$0xff] %vm417_vm0, %v1995_v34  ;;  %2123 = vst.msk [vmem:[%s3412_s20 + $0xa0] sm:$0xff] %vm417_vm0, %v2091_v35  ;;  %v1473_v53 = vadd.f32 %v1419_v43, %v543_v48  ;;  %v1422_v54 = vadd.f32 %v2687_v44, %v2575_v11  ;;  %v1715_v43 = vadd.f32 %v3379_v24, %v1678_v32 }
 0x163   : > { %1964 = vst.msk [vmem:[%s3399_s15 + $0x54] sm:$0xf] %vm1942_vm1, %v2471_v46  ;;  %v2576_v59 = vpop.f32.mrb[52].mxu0  ;;  %2915 = vtanh.f32 %v1714_v36 }
 0x164   : > { %2028 = vst.msk [vmem:[%s3406_s17 + $0xa8] sm:$0xff] %vm417_vm0, %v1996_v50  ;;  %2124 = vst.msk [vmem:[%s3412_s20 + $0xa8] sm:$0xff] %vm417_vm0, %v2092_v51  ;;  %v1772_v58 = vld [vmem:[#allocation2 + $0xb0] sm:$0xff]  ;;  %v1474_v63 = vadd.f32 %v1422_v54, %v544_v52  ;;  %v2688_v0 = vpop.f32.mrb[52].mxu1  ;;  %v2577_v1 = vpop.f32.mrb[53].mxu0  ;;  %2917 = vtanh.f32 %v1715_v43 }
 0x165   : > { %v1804_v62 = vmul.f32 %v2904_v42, %v1772_v58  ;;  %1506 = vst.msk [vmem:[#allocation2 + $0xc0] sm:$0xff] %vm417_vm0, %v1473_v53  ;;  %v2578_v2 = vadd.f32 %v2577_v1, %v2576_v59  ;;  %v2689_v5 = vpop.f32.mrb[53].mxu1  ;;  %v2579_v3 = vpop.f32.mrb[54].mxu0  ;;  %v2938_v58 = vld [vmem:[%s3164_s25 + $0xc8] sm:$0xff] }
 0x166   : > { %v1773_v12 = vld [vmem:[#allocation2 + $0xb8] sm:$0xff]  ;;  %1507 = vst.msk [vmem:[#allocation2 + $0xc8] sm:$0xff] %vm417_vm0, %v1474_v63  ;;  %v2690_v13 = vadd.f32 %v2689_v5, %v2688_v0  ;;  %v2691_v14 = vpop.f32.mrb[54].mxu1  ;;  %v2580_v15 = vpop.f32.mrb[55].mxu0 }
 0x167   : > { %v2472_v6 = vpack.c.bf16 %v1804_v62, %v1804_v62  ;;  %v1997_v7 = vadd.f32 %v2935_v18, %v1804_v62  ;;  %v2093_v9 = vadd.f32 %v2061_v57, %v1804_v62  ;;  %v1805_v16 = vmul.f32 %v2906_v49, %v1773_v12  ;;  %v2692_v21 = vpop.f32.mrb[55].mxu1  ;;  %v547_v49 = vld [vmem:[#allocation2 + $0xe0] sm:$0xff]  ;;  %v1681_v63 = vpop.xlane.xlu0 %1680 }
 0x168   : > { %v2581_v19 = vadd.f32 %v2580_v15, %v2579_v3  ;;  %v1427_v55 = vadd.f32 %v2690_v13, %v2578_v2  ;;  %v2693_v22 = vadd.f32 %v2692_v21, %v2691_v14  ;;  %v2912_v0 = vpop.eup %2911  ;;  %v548_v2 = vld [vmem:[#allocation2 + $0xe8] sm:$0xff]  ;;  %v1684_v3 = vpop.xlane.xlu1 %1683 }
 0x169   : > { %1965 = vst.msk [vmem:[%s3399_s15 + $0x58] sm:$0xf] %vm1942_vm1, %v2472_v6  ;;  %v2473_v25 = vpack.c.bf16 %v1805_v16, %v1805_v16  ;;  %v1998_v27 = vadd.f32 %v2936_v26, %v1805_v16  ;;  %v2094_v28 = vadd.f32 %v2062_v10, %v1805_v16  ;;  %v2914_v4 = vpop.eup %2913  ;;  %v2065_v6 = vld [vmem:[%s3391_s12 + $0xd0] sm:$0xff]  ;;  %v1716_v10 = vadd.f32 %v3379_v24, %v1681_v63  ;;  %v2066_v16 = vld [vmem:[%s3391_s12 + $0xd8] sm:$0xff] }
 0x16a   : > { %2029 = vst.msk [vmem:[%s3406_s17 + $0xb0] sm:$0xff] %vm417_vm0, %v1997_v7  ;;  %2125 = vst.msk [vmem:[%s3412_s20 + $0xb0] sm:$0xff] %vm417_vm0, %v2093_v9  ;;  %v1475_v30 = vadd.f32 %v1427_v55, %v545_v17  ;;  %v1430_v31 = vadd.f32 %v2693_v22, %v2581_v19  ;;  %v1717_v22 = vadd.f32 %v3379_v24, %v1684_v3  ;;  %v2070_v63 = vld [vmem:[%s3391_s12 + $0xf8] sm:$0xff] }
 0x16b   : > { %1966 = vst.msk [vmem:[%s3399_s15 + $0x5c] sm:$0xf] %vm1942_vm1, %v2473_v25  ;;  %v2582_v35 = vpop.f32.mrb[56].mxu0  ;;  %2919 = vtanh.f32 %v1716_v10 }
 0x16c   : > { %2030 = vst.msk [vmem:[%s3406_s17 + $0xb8] sm:$0xff] %vm417_vm0, %v1998_v27  ;;  %2126 = vst.msk [vmem:[%s3412_s20 + $0xb8] sm:$0xff] %vm417_vm0, %v2094_v28  ;;  %v1774_v34 = vld [vmem:[#allocation2 + $0xc0] sm:$0xff]  ;;  %v1476_v38 = vadd.f32 %v1430_v31, %v546_v29  ;;  %v2694_v39 = vpop.f32.mrb[56].mxu1  ;;  %v2583_v8 = vpop.f32.mrb[57].mxu0  ;;  %2921 = vtanh.f32 %v1717_v22 }
 0x16d   : > { %v1806_v37 = vmul.f32 %v2908_v23, %v1774_v34  ;;  %1508 = vst.msk [vmem:[#allocation2 + $0xd0] sm:$0xff] %vm417_vm0, %v1475_v30  ;;  %v1775_v48 = vld [vmem:[#allocation2 + $0xc8] sm:$0xff]  ;;  %v2584_v11 = vadd.f32 %v2583_v8, %v2582_v35  ;;  %v2695_v41 = vpop.f32.mrb[57].mxu1  ;;  %v2585_v42 = vpop.f32.mrb[58].mxu0  ;;  %v2939_v23 = vld [vmem:[%s3164_s25 + $0xd0] sm:$0xff] }
 0x16e   : > { %v1807_v50 = vmul.f32 %v2910_v60, %v1775_v48  ;;  %1509 = vst.msk [vmem:[#allocation2 + $0xd8] sm:$0xff] %vm417_vm0, %v1476_v38  ;;  %v2697_v51 = vpop.f32.mrb[58].mxu1  ;;  %v2586_v52 = vpop.f32.mrb[59].mxu0  ;;  %v2696_v53 = vadd.f32 %v2695_v41, %v2694_v39  ;;  %v2940_v60 = vld [vmem:[%s3164_s25 + $0xd8] sm:$0xff]  ;;  %v549_v35 = vld [vmem:[#allocation2 + $0xf0] sm:$0xff] }
 0x16f   : > { %v2474_v44 = vpack.c.bf16 %v1806_v37, %v1806_v37  ;;  %v1999_v46 = vadd.f32 %v2937_v45, %v1806_v37  ;;  %v2095_v47 = vadd.f32 %v2063_v33, %v1806_v37  ;;  %v2587_v54 = vadd.f32 %v2586_v52, %v2585_v42  ;;  %v2698_v56 = vpop.f32.mrb[59].mxu1  ;;  %v2916_v37 = vpop.eup %2915  ;;  %v550_v39 = vld [vmem:[#allocation2 + $0xf8] sm:$0xff] }
 0x170   : > { %v2475_v57 = vpack.c.bf16 %v1807_v50, %v1807_v50  ;;  %v2000_v59 = vadd.f32 %v2938_v58, %v1807_v50  ;;  %v2096_v61 = vadd.f32 %v2064_v40, %v1807_v50  ;;  %v2699_v62 = vadd.f32 %v2698_v56, %v2697_v51  ;;  %v2918_v40 = vpop.eup %2917  ;;  %v2941_v50 = vld [vmem:[%s3164_s25 + $0xe0] sm:$0xff] }
 0x171   : > { %1967 = vst.msk [vmem:[%s3399_s15 + $0x60] sm:$0xf] %vm1942_vm1, %v2474_v44  ;;  %v1435_v1 = vadd.f32 %v2696_v53, %v2584_v11  ;;  %v2067_v11 = vld [vmem:[%s3391_s12 + $0xe0] sm:$0xff]  ;;  %v2068_v44 = vld [vmem:[%s3391_s12 + $0xe8] sm:$0xff] }
 0x172   : > { %2031 = vst.msk [vmem:[%s3406_s17 + $0xc0] sm:$0xff] %vm417_vm0, %v1999_v46  ;;  %2127 = vst.msk [vmem:[%s3412_s20 + $0xc0] sm:$0xff] %vm417_vm0, %v2095_v47  ;;  %v1438_v5 = vadd.f32 %v2699_v62, %v2587_v54  ;;  %v2942_v54 = vld [vmem:[%s3164_s25 + $0xe8] sm:$0xff] }
 0x173   : > { %1968 = vst.msk [vmem:[%s3399_s15 + $0x64] sm:$0xf] %vm1942_vm1, %v2475_v57  ;;  %v1477_v7 = vadd.f32 %v1435_v1, %v547_v49  ;;  %v2588_v9 = vpop.f32.mrb[60].mxu0 }
 0x174   : > { %2032 = vst.msk [vmem:[%s3406_s17 + $0xc8] sm:$0xff] %vm417_vm0, %v2000_v59  ;;  %2128 = vst.msk [vmem:[%s3412_s20 + $0xc8] sm:$0xff] %vm417_vm0, %v2096_v61  ;;  %v1776_v18 = vld [vmem:[#allocation2 + $0xd0] sm:$0xff]  ;;  %v1478_v13 = vadd.f32 %v1438_v5, %v548_v2  ;;  %v2700_v14 = vpop.f32.mrb[60].mxu1  ;;  %v2589_v15 = vpop.f32.mrb[61].mxu0 }
 0x175   : > { %v1808_v12 = vmul.f32 %v2912_v0, %v1776_v18  ;;  %v1777_v17 = vld [vmem:[#allocation2 + $0xd8] sm:$0xff]  ;;  %1510 = vst.msk [vmem:[#allocation2 + $0xe0] sm:$0xff] %vm417_vm0, %v1477_v7  ;;  %v2590_v19 = vadd.f32 %v2589_v15, %v2588_v9  ;;  %v2701_v21 = vpop.f32.mrb[61].mxu1  ;;  %v2591_v55 = vpop.f32.mrb[62].mxu0  ;;  %v2069_v61 = vld [vmem:[%s3391_s12 + $0xf0] sm:$0xff] }
 0x176   : > { %v1809_v27 = vmul.f32 %v2914_v4, %v1777_v17  ;;  %1511 = vst.msk [vmem:[#allocation2 + $0xe8] sm:$0xff] %vm417_vm0, %v1478_v13  ;;  %v2703_v28 = vpop.f32.mrb[62].mxu1  ;;  %v2592_v29 = vpop.f32.mrb[63].mxu0  ;;  %v2702_v30 = vadd.f32 %v2701_v21, %v2700_v14  ;;  %v2943_v5 = vld [vmem:[%s3164_s25 + $0xf0] sm:$0xff]  ;;  %v2944_v18 = vld [vmem:[%s3164_s25 + $0xf8] sm:$0xff] }
 0x177   : > { %v2476_v20 = vpack.c.bf16 %v1808_v12, %v1808_v12  ;;  %v2001_v25 = vadd.f32 %v2939_v23, %v1808_v12  ;;  %v2097_v26 = vadd.f32 %v2065_v6, %v1808_v12  ;;  %v2593_v31 = vadd.f32 %v2592_v29, %v2591_v55  ;;  %v2704_v32 = vpop.f32.mrb[63].mxu1  ;;  %v2920_v58 = vpop.eup %2919 }
 0x178   : > { %v2477_v24 = vpack.c.bf16 %v1809_v27, %v1809_v27  ;;  %v2002_v33 = vadd.f32 %v2940_v60, %v1809_v27  ;;  %v2098_v34 = vadd.f32 %v2066_v16, %v1809_v27  ;;  %v2705_v36 = vadd.f32 %v2704_v32, %v2703_v28  ;;  %v2922_v59 = vpop.eup %2921 }
 0x179   : > { %1969 = vst.msk [vmem:[%s3399_s15 + $0x68] sm:$0xf] %vm1942_vm1, %v2476_v20  ;;  %v1443_v38 = vadd.f32 %v2702_v30, %v2590_v19 }
 0x17a   : > { %2033 = vst.msk [vmem:[%s3406_s17 + $0xd0] sm:$0xff] %vm417_vm0, %v2001_v25  ;;  %2129 = vst.msk [vmem:[%s3412_s20 + $0xd0] sm:$0xff] %vm417_vm0, %v2097_v26  ;;  %v1446_v8 = vadd.f32 %v2705_v36, %v2593_v31 }
 0x17b   : > { %1970 = vst.msk [vmem:[%s3399_s15 + $0x6c] sm:$0xf] %vm1942_vm1, %v2477_v24  ;;  %v1479_v48 = vadd.f32 %v1443_v38, %v549_v35 }
 0x17c   : > { %2034 = vst.msk [vmem:[%s3406_s17 + $0xd8] sm:$0xff] %vm417_vm0, %v2002_v33  ;;  %2130 = vst.msk [vmem:[%s3412_s20 + $0xd8] sm:$0xff] %vm417_vm0, %v2098_v34  ;;  %v1778_v41 = vld [vmem:[#allocation2 + $0xe0] sm:$0xff]  ;;  %v1480_v42 = vadd.f32 %v1446_v8, %v550_v39 }
 0x17d   : > { %v1810_v43 = vmul.f32 %v2916_v37, %v1778_v41  ;;  %v1779_v45 = vld [vmem:[#allocation2 + $0xe8] sm:$0xff]  ;;  %1512 = vst.msk [vmem:[#allocation2 + $0xf0] sm:$0xff] %vm417_vm0, %v1479_v48 }
 0x17e   : > { %v1811_v46 = vmul.f32 %v2918_v40, %v1779_v45  ;;  %1513 = vst.msk [vmem:[#allocation2 + $0xf8] sm:$0xff] %vm417_vm0, %v1480_v42 }
 0x17f   : > { %v2478_v47 = vpack.c.bf16 %v1810_v43, %v1810_v43  ;;  %v2003_v51 = vadd.f32 %v2941_v50, %v1810_v43  ;;  %v2099_v52 = vadd.f32 %v2067_v11, %v1810_v43 }
 0x180   : > { %v2479_v53 = vpack.c.bf16 %v1811_v46, %v1811_v46  ;;  %v2004_v56 = vadd.f32 %v2942_v54, %v1811_v46  ;;  %v2100_v57 = vadd.f32 %v2068_v44, %v1811_v46 }
 0x181   : > { %1971 = vst.msk [vmem:[%s3399_s15 + $0x70] sm:$0xf] %vm1942_vm1, %v2478_v47 }
 0x182   : > { %2035 = vst.msk [vmem:[%s3406_s17 + $0xe0] sm:$0xff] %vm417_vm0, %v2003_v51  ;;  %2131 = vst.msk [vmem:[%s3412_s20 + $0xe0] sm:$0xff] %vm417_vm0, %v2099_v52 }
 0x183   : > { %1972 = vst.msk [vmem:[%s3399_s15 + $0x74] sm:$0xf] %vm1942_vm1, %v2479_v53 }
 0x184   : > { %2036 = vst.msk [vmem:[%s3406_s17 + $0xe8] sm:$0xff] %vm417_vm0, %v2004_v56  ;;  %2132 = vst.msk [vmem:[%s3412_s20 + $0xe8] sm:$0xff] %vm417_vm0, %v2100_v57  ;;  %v1780_v49 = vld [vmem:[#allocation2 + $0xf0] sm:$0xff] }
 0x185   : > { %v1812_v62 = vmul.f32 %v2920_v58, %v1780_v49  ;;  %v1781_v0 = vld [vmem:[#allocation2 + $0xf8] sm:$0xff] }
 0x186   : > { %v1813_v1 = vmul.f32 %v2922_v59, %v1781_v0 }
 0x187   : > { %v2480_v2 = vpack.c.bf16 %v1812_v62, %v1812_v62  ;;  %v2005_v3 = vadd.f32 %v2943_v5, %v1812_v62  ;;  %v2101_v4 = vadd.f32 %v2069_v61, %v1812_v62 }
 0x188   : > { %v2481_v6 = vpack.c.bf16 %v1813_v1, %v1813_v1  ;;  %v2006_v7 = vadd.f32 %v2944_v18, %v1813_v1  ;;  %v2102_v9 = vadd.f32 %v2070_v63, %v1813_v1 }
 0x189   : > { %1973 = vst.msk [vmem:[%s3399_s15 + $0x78] sm:$0xf] %vm1942_vm1, %v2480_v2 }
 0x18a   : > { %2037 = vst.msk [vmem:[%s3406_s17 + $0xf0] sm:$0xff] %vm417_vm0, %v2005_v3  ;;  %2133 = vst.msk [vmem:[%s3412_s20 + $0xf0] sm:$0xff] %vm417_vm0, %v2101_v4 }
 0x18b   : > { %1974 = vst.msk [vmem:[%s3399_s15 + $0x7c] sm:$0xf] %vm1942_vm1, %v2481_v6 }
 0x18c   : > { %2038 = vst.msk [vmem:[%s3406_s17 + $0xf8] sm:$0xff] %vm417_vm0, %v2006_v7  ;;  %2134 = vst.msk [vmem:[%s3412_s20 + $0xf8] sm:$0xff] %vm417_vm0, %v2102_v9 }
 0x18d PF: > { %s20_s9 = sadd.s32 1, %s2967_s9   ;;  %s3743_s29 = smov %s2963_s30 }
 0x18e   : > { %p17_p5 = scmp.ge.s32.totalorder %s20_s9, 4   ;;  %s3744_s30 = smov %s3746_s5 }
 0x190   :  { %19 = sbr.rel (!%p17_p5) target bundleno = 2 (0x2), region = 113 }

// kernel: n2_lightgcn_forward.7
= control target key start
LH: loop header
LB: loop body
LE: loop exit
PB: predicated region body
PF: predicated region fallthrough
CT: control target
= control target key end

     0   :  { %s4055_s0 = inlined_call_operand.vmem [shape: bf16[512,512], index: 0, kind: input, shape index: {}]   ;;  %s4056_s1 = inlined_call_operand.vmem [shape: bf16[512,64], index: 1, kind: input, shape index: {}]   ;;  %s4057_s2 = inlined_call_operand.vmem [shape: f32[512,64], index: 2, kind: input, shape index: {}]   ;;  %s4058_s3 = inlined_call_operand.vmem [shape: f32[512,64], index: 3, kind: input, shape index: {}]   ;;  %s4059_s4 = inlined_call_operand.vmem [shape: f32[1,64], index: 4, kind: input, shape index: {}]   ;;  %s4060_s5 = inlined_call_operand.<no memory space> [shape: f32[1], index: 5, kind: input, shape index: {}]   ;;  %s4061_s6 = inlined_call_operand.hbm [shape: bf16[512,64], index: 6, kind: output, shape index: {0}]   ;;  %s4062_s7 = inlined_call_operand.hbm [shape: f32[512,64], index: 7, kind: output, shape index: {1}]   ;;  %s4063_s8 = inlined_call_operand.vmem [shape: f32[512,64], index: 8, kind: output, shape index: {2}]  }
   0x1   :  { %14 = sst [smem:[#allocation3]] %s4060_s5 }
   0x2   :  { %15 = vsyncpa [#allocation5], 0 }
   0x3   :  { %17 = vsyncpa [#allocation5 + $0x1], 0 }
   0x4   :  { %18 = vsyncpa [#allocation7], 0 }
   0x5   :  { %20 = vsyncpa [#allocation7 + $0x1], 0  ;;  %s3224_s29 = smov 0   ;;  %s3226_s30 = smov 0  }
   0x6   :  { %s3228_s9 = smov 0   ;;  %s3230_s10 = smov 0  }
   0x7   :  { %s3232_s11 = smov 0   ;;  %s3234_s12 = smov 0  }
   0x8 LB: > { %s2366_s5 = sadd.s32 4294967295, %s3167_s12   ;;  %s2367_s13 = sadd.s32 4294967294, %s3167_s12   ;;  %s3167_s12 = sphi %s3234_s12, %s26_s12   ;;  %s3163_s11 = sphi %s3232_s11, %s4071_s11   ;;  %s3159_s10 = sphi %s3230_s10, %s4070_s10   ;;  %s3155_s9 = sphi %s3228_s9, %s4069_s9   ;;  %s3151_s30 = sphi %s3226_s30, %s4068_s30   ;;  %s3147_s29 = sphi %s3224_s29, %s4067_s29  }
   0x9   : > { %s38_s14 = sadd.s32 1, %s3163_s11  ;;  %s188_s15 = sadd.s32 1, %s3155_s9 }
   0xa   : > { %p40_p0 = scmp.ge.s32.totalorder %s38_s14, 2  ;;  %p198_p1 = scmp.ne.s32.totalorder %s3155_s9, %s3151_s30 }
   0xb   : > { %p199_p2 = scmp.eq.s32.totalorder %s2366_s5, 1  ;;  %p204_p3 = scmp.ne.s32.totalorder %s3151_s30, %s3147_s29 }
   0xc   : > { %s4073_s14 = smov (%p40_p0, %s38_s14), 0  ;;  %p205_p5 = scmp.eq.s32.totalorder %s2367_s13, 1 }
   0xd   : > { %p3264_p4 = por %p199_p2, %p198_p1  ;;  %s185_s17 = ssub.s32 %s3163_s11, %s4073_s14 }
   0xe   : > { %p2370_p6 = scmp.ge.s32.totalorder %s3167_s12, 1  ;;  %p186_p7 = scmp.eq.s32.totalorder %s185_s17, 0 }
   0xf   : > { %p3271_p8 = por %p205_p5, %p204_p3  ;;  %p317_p9 = scmp.lt.s32.totalorder %s3167_s12, 3 }
  0x10   : > { %s3277_s19 = scalar_select %p186_p7, %s3155_s9, %s188_s15  }
  0x11   : > { %p318_p10 = pnand %p2370_p6, %p317_p9 }
  0x12   : > { %v2843_v0 = vld [vmem:[%s4056_s1 + $0x40] sm:$0xff] (!%p318_p10)   ;;  %v2847_v4 = vld [vmem:[%s4056_s1 + $0x48] sm:$0xff] (!%p318_p10)   ;;  %v2851_v8 = vld [vmem:[%s4056_s1 + $0x50] sm:$0xff] (!%p318_p10)   ;;  %s2373_s26 = sshll.u32 (!%p318_p10), %s3159_s10, 5  ;;  %vm413_vm0 = vcmask (!%p318_p10), 523264   ;;  %s1546_s17 = sld [smem:[#allocation3]] (!%p318_p10) }
  0x13   : > { %321 = sbr.rel (%p318_p10) target bundleno = 447 (0x1bf), region = 44  ;;  %v2844_v1 = vld [vmem:[%s4056_s1 + $0xc0] sm:$0xff] (!%p318_p10)   ;;  %2554 = vmatprep.subr.bf16.mxu0 (!%p318_p10), %v2843_v0  ;;  %v2848_v5 = vld [vmem:[%s4056_s1 + $0xc8] sm:$0xff] (!%p318_p10)   ;;  %v2852_v9 = vld [vmem:[%s4056_s1 + $0xd0] sm:$0xff] (!%p318_p10)   ;;  %p378_p11 = scmp.lt.s32.totalorder (!%p318_p10), %s2373_s26, 63  ;;  %vm1938_vm1 = vcmask (!%p318_p10), 519168  }
  0x14   : > { %v2845_v2 = vld [vmem:[%s4056_s1] sm:$0xff] (!%p318_p10)   ;;  %2666 = vmatprep.subr.bf16.mxu1 (!%p318_p10), %v2844_v1  ;;  %v2849_v6 = vld [vmem:[%s4056_s1 + $0x8] sm:$0xff] (!%p318_p10)   ;;  %v2853_v10 = vld [vmem:[%s4056_s1 + $0x10] sm:$0xff] (!%p318_p10)   ;;  %s3628_s20 = sand.u32 (!%p318_p10), 1, %s3151_s30   ;;  %s2553_s28 = sshll.u32 (!%p318_p10), %s3159_s10, 12 }
  0x15   : > { %v2846_v3 = vld [vmem:[%s4056_s1 + $0x80] sm:$0xff] (!%p318_p10)   ;;  %2555 = vmatpush3.bf16.msra.mxu0 (!%p318_p10), %v2845_v2  ;;  %v2850_v7 = vld [vmem:[%s4056_s1 + $0x88] sm:$0xff] (!%p318_p10)   ;;  %v2854_v11 = vld [vmem:[%s4056_s1 + $0x90] sm:$0xff] (!%p318_p10)   ;;  %s2371_s25 = sshll.u32 (!%p318_p10), %s3628_s20, 7  ;;  %s2372_s27 = sshll.u32 (!%p318_p10), %s3628_s20, 8 }
  0x16   : > { %2667 = vmatpush3.bf16.msra.mxu1 (!%p318_p10), %v2846_v3  ;;  %2556 = vmatprep.subr.bf16.mxu0 (!%p318_p10), %v2847_v4  ;;  %v2855_v12 = vld [vmem:[%s4056_s1 + $0x58] sm:$0xff] (!%p318_p10)   ;;  %v2859_v16 = vld [vmem:[%s4056_s1 + $0x60] sm:$0xff] (!%p318_p10)   ;;  %v2863_v20 = vld [vmem:[%s4056_s1 + $0x68] sm:$0xff] (!%p318_p10)   ;;  %s3654_s15 = scalar_lea.vmem (!%p318_p10), [#allocation4], %s2371_s25 }
  0x17   : > { %2668 = vmatprep.subr.bf16.mxu1 (!%p318_p10), %v2848_v5  ;;  %v2856_v13 = vld [vmem:[%s4056_s1 + $0xd8] sm:$0xff] (!%p318_p10)   ;;  %v2860_v17 = vld [vmem:[%s4056_s1 + $0xe0] sm:$0xff] (!%p318_p10)   ;;  %v2864_v21 = vld [vmem:[%s4056_s1 + $0xe8] sm:$0xff] (!%p318_p10)  }
  0x18   : > { %v2857_v14 = vld [vmem:[%s4056_s1 + $0x18] sm:$0xff] (!%p318_p10)   ;;  %v2861_v18 = vld [vmem:[%s4056_s1 + $0x20] sm:$0xff] (!%p318_p10)   ;;  %v2865_v22 = vld [vmem:[%s4056_s1 + $0x28] sm:$0xff] (!%p318_p10)  }
  0x19   : > { %2557 = vmatpush3.bf16.msra.mxu0 (!%p318_p10), %v2849_v6  ;;  %v2858_v15 = vld [vmem:[%s4056_s1 + $0x98] sm:$0xff] (!%p318_p10)   ;;  %v2862_v19 = vld [vmem:[%s4056_s1 + $0xa0] sm:$0xff] (!%p318_p10)   ;;  %v2866_v23 = vld [vmem:[%s4056_s1 + $0xa8] sm:$0xff] (!%p318_p10)  }
  0x1a   : > { %2669 = vmatpush3.bf16.msra.mxu1 %v2850_v7  ;;  %2558 = vmatprep.subr.bf16.mxu0 %v2851_v8  ;;  %s4075_s26 = smov (!%p378_p11, %s2373_s26), 63  ;;  %v2867_v24 = vld [vmem:[%s4056_s1 + $0x70] sm:$0xff]   ;;  %v2871_v28 = vld [vmem:[%s4056_s1 + $0x78] sm:$0xff]   ;;  %v3415_v49 = vld [vmem:[%s4059_s4] ss:$0 sm:$0xff] }
  0x1b   : > { %2670 = vmatprep.subr.bf16.mxu1 %v2852_v9  ;;  %v2868_v25 = vld [vmem:[%s4056_s1 + $0xf0] sm:$0xff]   ;;  %s2519_s24 = sshll.u32 %s4075_s26, 4  ;;  %v2872_v29 = vld [vmem:[%s4056_s1 + $0xf8] sm:$0xff]  }
  0x1c   : > { %v2869_v26 = vld [vmem:[%s4056_s1 + $0x30] sm:$0xff]   ;;  %s3376_s21 = scalar_lea.vmem %s4055_s0, %s2519_s24  ;;  %v2873_v30 = vld [vmem:[%s4056_s1 + $0x38] sm:$0xff]   ;;  %s3399_s24 = sshll.u32 %s4075_s26, 3 }
  0x1d   : > { %2559 = vmatpush3.bf16.msra.mxu0 %v2853_v10  ;;  %v2870_v27 = vld [vmem:[%s4056_s1 + $0xb0] sm:$0xff]   ;;  %v2874_v31 = vld [vmem:[%s4056_s1 + $0xb8] sm:$0xff]   ;;  %s3405_s13 = scalar_lea.vmem %s4057_s2, %s3399_s24  ;;  %s3635_s23 = scalar_lea.vmem %s4058_s3, %s3399_s24 }
  0x1e   : > { %2671 = vmatpush3.bf16.msra.mxu1 %v2854_v11  ;;  %2560 = vmatprep.subr.bf16.mxu0 %v2855_v12  ;;  %v2875_v32 = vld [vmem:[%s3376_s21] ss:$16 sps:$4 sm:$0xff]   ;;  %v2877_v33 = vld [vmem:[%s3376_s21 + $0x4] ss:$16 sps:$4 sm:$0xff]   ;;  %v2878_v34 = vld [vmem:[%s3376_s21 + $0x8] ss:$16 sps:$4 sm:$0xff]   ;;  %s3650_s26 = scalar_lea.vmem %s4063_s8, %s3399_s24 }
  0x1f   : > { %2672 = vmatprep.subr.bf16.mxu1 %v2856_v13  ;;  %v2880_v35 = vld [vmem:[%s3376_s21 + $0xc] ss:$16 sps:$4 sm:$0xff]   ;;  %1155 = vmatprep.mubr.bf16.mxu0 %v2877_v33  ;;  %v2881_v36 = vld [vmem:[%s3376_s21 + $0x24] ss:$16 sps:$4 sm:$0xff]   ;;  %v2885_v38 = vld [vmem:[%s3376_s21 + $0x20] ss:$16 sps:$4 sm:$0xff]  }
  0x20   : > { %1316 = vmatprep.mubr.bf16.mxu1 %v2880_v35  ;;  %v2883_v37 = vld [vmem:[%s3376_s21 + $0x2c] ss:$16 sps:$4 sm:$0xff]   ;;  %v2886_v39 = vld [vmem:[%s3376_s21 + $0x28] ss:$16 sps:$4 sm:$0xff]   ;;  %v2887_v40 = vld [vmem:[%s3376_s21 + $0x44] ss:$16 sps:$4 sm:$0xff]  }
  0x21   : > { %2561 = vmatpush3.bf16.msra.mxu0 %v2857_v14  ;;  %v2889_v41 = vld [vmem:[%s3376_s21 + $0x4c] ss:$16 sps:$4 sm:$0xff]   ;;  %v2891_v42 = vld [vmem:[%s3376_s21 + $0x40] ss:$16 sps:$4 sm:$0xff]   ;;  %v2892_v43 = vld [vmem:[%s3376_s21 + $0x48] ss:$16 sps:$4 sm:$0xff]  }
  0x22   : > { %2673 = vmatpush3.bf16.msra.mxu1 %v2858_v15  ;;  %2562 = vmatprep.subr.bf16.mxu0 %v2859_v16  ;;  %v2893_v44 = vld [vmem:[%s3376_s21 + $0x64] ss:$16 sps:$4 sm:$0xff]   ;;  %v2895_v45 = vld [vmem:[%s3376_s21 + $0x6c] ss:$16 sps:$4 sm:$0xff]   ;;  %v2897_v46 = vld [vmem:[%s3376_s21 + $0x60] ss:$16 sps:$4 sm:$0xff]  }
  0x23   : > { %2674 = vmatprep.subr.bf16.mxu1 %v2860_v17  ;;  %v2898_v47 = vld [vmem:[%s3376_s21 + $0x68] ss:$16 sps:$4 sm:$0xff]   ;;  %v3410_v48 = vld [vmem:[%s3405_s13] sm:$0xff]  ;;  %v2901_v52 = vld [vmem:[%s3376_s21 + $0x8c] ss:$16 sps:$4 sm:$0xff]   ;;  %s2552_s24 = sshll.u32 %s3159_s10, 11 }
  0x24   : > { %v2899_v50 = vld [vmem:[%s3376_s21 + $0x84] ss:$16 sps:$4 sm:$0xff]   ;;  %v1553_v51 = vmul.f32 %v3415_v49, %v3410_v48  ;;  %v3423_v54 = vld [vmem:[%s3405_s13 + $0x8] sm:$0xff]  ;;  %v3435_v60 = vld [vmem:[%s3405_s13 + $0x18] sm:$0xff] }
  0x25   : > { %2563 = vmatpush3.bf16.msra.mxu0 %v2861_v18  ;;  %v3426_v55 = vld [vmem:[%s3405_s13 + $0x10] sm:$0xff]  ;;  %v1554_v56 = vmul.f32 %v3415_v49, %v3423_v54  ;;  %v1556_v62 = vmul.f32 %v3415_v49, %v3435_v60  ;;  %v2904_v63 = vld [vmem:[%s3376_s21 + $0x88] ss:$16 sps:$4 sm:$0xff]   ;;  %v3443_v1 = vld [vmem:[%s3405_s13 + $0x20] sm:$0xff] }
  0x26   : > { %2675 = vmatpush3.bf16.msra.mxu1 %v2862_v19  ;;  %2564 = vmatprep.subr.bf16.mxu0 %v2863_v20  ;;  %v1585_v53 = vsel %vm413_vm0, %v1553_v51, 0.0  ;;  %v1555_v57 = vmul.f32 %v3415_v49, %v3426_v55  ;;  %v2903_v61 = vld [vmem:[%s3376_s21 + $0x80] ss:$16 sps:$4 sm:$0xff]   ;;  %v2905_v0 = vld [vmem:[%s3376_s21 + $0xa4] ss:$16 sps:$4 sm:$0xff]   ;;  %v1557_v4 = vmul.f32 %v3415_v49, %v3443_v1  ;;  %v3450_v5 = vld [vmem:[%s3405_s13 + $0x28] sm:$0xff] }
  0x27   : > { %2676 = vmatprep.subr.bf16.mxu1 %v2864_v21  ;;  %1586 = vadd.xlane.f32.xlu0 %v1585_v53  ;;  %v1588_v58 = vsel %vm413_vm0, %v1554_v56, 0.0  ;;  %v2907_v2 = vld [vmem:[%s3376_s21 + $0xac] ss:$16 sps:$4 sm:$0xff]   ;;  %v1594_v3 = vsel %vm413_vm0, %v1556_v62, 0.0  ;;  %v1558_v6 = vmul.f32 %v3415_v49, %v3450_v5  ;;  %v3456_v8 = vld [vmem:[%s3405_s13 + $0x30] sm:$0xff]  ;;  %v3472_v18 = vld [vmem:[%s3405_s13 + $0x40] sm:$0xff] }
  0x28   : > { %v1591_v59 = vsel %vm413_vm0, %v1555_v57, 0.0  ;;  %v1597_v7 = vsel %vm413_vm0, %v1557_v4, 0.0  ;;  %v1559_v10 = vmul.f32 %v3415_v49, %v3456_v8  ;;  %v3462_v11 = vld [vmem:[%s3405_s13 + $0x38] sm:$0xff]  ;;  %v2909_v13 = vld [vmem:[%s3376_s21 + $0xa0] ss:$16 sps:$4 sm:$0xff]   ;;  %v1561_v19 = vmul.f32 %v3415_v49, %v3472_v18  ;;  %v3477_v20 = vld [vmem:[%s3405_s13 + $0x48] sm:$0xff] }
  0x29   : > { %2565 = vmatpush3.bf16.msra.mxu0 %v2865_v22  ;;  %1592 = vadd.xlane.f32.xlu1 %v1591_v59  ;;  %v1600_v9 = vsel %vm413_vm0, %v1558_v6, 0.0  ;;  %v1560_v12 = vmul.f32 %v3415_v49, %v3462_v11  ;;  %v2910_v15 = vld [vmem:[%s3376_s21 + $0xa8] ss:$16 sps:$4 sm:$0xff]   ;;  %v2911_v16 = vld [vmem:[%s3376_s21 + $0xc4] ss:$16 sps:$4 sm:$0xff]   ;;  %v1562_v22 = vmul.f32 %v3415_v49, %v3477_v20 }
  0x2a   : > { %2677 = vmatpush3.bf16.msra.mxu1 %v2866_v23  ;;  %2566 = vmatprep.subr.bf16.mxu0 %v2867_v24  ;;  %v1603_v14 = vsel %vm413_vm0, %v1559_v10, 0.0  ;;  %v2913_v21 = vld [vmem:[%s3376_s21 + $0xcc] ss:$16 sps:$4 sm:$0xff]   ;;  %v1609_v23 = vsel %vm413_vm0, %v1561_v19, 0.0  ;;  %v1523_v24 = vld [vmem:[%s3405_s13 + $0x50] sm:$0xff] }
  0x2b   : > { %2678 = vmatprep.subr.bf16.mxu1 %v2868_v25  ;;  %1589 = vadd.xlane.f32.xlu0 %v1588_v58  ;;  %v1606_v17 = vsel %vm413_vm0, %v1560_v12, 0.0  ;;  %v1612_v25 = vsel %vm413_vm0, %v1562_v22, 0.0  ;;  %v2915_v33 = vld [vmem:[%s3376_s21 + $0xc0] ss:$16 sps:$4 sm:$0xff]   ;;  %v2922_v57 = vld [vmem:[%s3376_s21 + $0xe8] ss:$16 sps:$4 sm:$0xff]  }
  0x2c   : > { %v2921_v51 = vld [vmem:[%s3376_s21 + $0xe0] ss:$16 sps:$4 sm:$0xff]   ;;  %v2923_v58 = vld [vmem:[%s3376_s21 + $0x104] ss:$16 sps:$4 sm:$0xff]   ;;  %v1532_v59 = vld [vmem:[%s3405_s13 + $0x98] sm:$0xff] }
  0x2d   : > { %2567 = vmatpush3.bf16.msra.mxu0 %v2869_v26  ;;  %1595 = vadd.xlane.f32.xlu1 %v1594_v3  ;;  %v1563_v26 = vmul.f32 %v3415_v49, %v1523_v24  ;;  %v1531_v56 = vld [vmem:[%s3405_s13 + $0x90] sm:$0xff]  ;;  %v1533_v3 = vld [vmem:[%s3405_s13 + $0xa0] sm:$0xff]  ;;  %v1534_v4 = vld [vmem:[%s3405_s13 + $0xa8] sm:$0xff] }
  0x2e   : > { %2679 = vmatpush3.bf16.msra.mxu1 %v2870_v27  ;;  %2568 = vmatprep.subr.bf16.mxu0 %v2871_v28  ;;  %v1524_v27 = vld [vmem:[%s3405_s13 + $0x58] sm:$0xff]  ;;  %v1574_v12 = vmul.f32 %v3415_v49, %v1534_v4  ;;  %v1537_v24 = vld [vmem:[%s3405_s13 + $0xc0] sm:$0xff] }
  0x2f   : > { %2680 = vmatprep.subr.bf16.mxu1 %v2872_v29  ;;  %1598 = vadd.xlane.f32.xlu0 %v1597_v7  ;;  %v1564_v28 = vmul.f32 %v3415_v49, %v1524_v27  ;;  %v1525_v29 = vld [vmem:[%s3405_s13 + $0x60] sm:$0xff]  ;;  %v1573_v7 = vmul.f32 %v3415_v49, %v1533_v3  ;;  %v1577_v27 = vmul.f32 %v3415_v49, %v1537_v24  ;;  %v2949_v3 = vld [vmem:[%s3376_s21 + $0x18c] ss:$16 sps:$4 sm:$0xff]   ;;  %v3620_v24 = vstv %s1546_s17  ;;  %s3660_s17 = scalar_lea.vmem [#allocation6], %s2372_s27  ;;  %s3957_s27 = scalar_lea.hbm %s4061_s6, %s2552_s24 }
  0x30   : > { %v1648_v22 = vsel %vm413_vm0, %v1574_v12, 0.0  ;;  %v2951_v4 = vld [vmem:[%s3376_s21 + $0x180] ss:$16 sps:$4 sm:$0xff]   ;;  %v2958_v12 = vld [vmem:[%s3376_s21 + $0x1a8] ss:$16 sps:$4 sm:$0xff]   ;;  %s2203_s5 = sshll.u32 %s3660_s17, 4  ;;  %s3973_s24 = scalar_lea.hbm %s4062_s7, %s2553_s28  ;;  %s3975_s5 = int_to_ptr.vmem [resolvable:$true] %s2203_s5 }
  0x31   : > { %2569 = vmatpush3.bf16.msra.mxu0 %v2873_v30  ;;  %1601 = vadd.xlane.f32.xlu1 %v1600_v9  ;;  %v1615_v30 = vsel %vm413_vm0, %v1563_v26, 0.0  ;;  %v2927_v9 = vld [vmem:[%s3376_s21 + $0x100] ss:$16 sps:$4 sm:$0xff]   ;;  %v1645_v19 = vsel %vm413_vm0, %v1573_v7, 0.0  ;;  %v2953_v7 = vld [vmem:[%s3376_s21 + $0x1a4] ss:$16 sps:$4 sm:$0xff]  }
  0x32   : > { %2681 = vmatpush3.bf16.msra.mxu1 %v2874_v31  ;;  %v1565_v31 = vmul.f32 %v3415_v49, %v1525_v29 }
  0x33   : > { %1604 = vadd.xlane.f32.xlu0 %v1603_v14  ;;  %v2928_v14 = vld [vmem:[%s3376_s21 + $0x108] ss:$16 sps:$4 sm:$0xff]  }
  0x34   : > { %1156 = vmatmul.mubr.bf16.vlgmr.msra.gmra.mrb[0].mxu0 %v2875_v32  ;;  %v1526_v32 = vld [vmem:[%s3405_s13 + $0x68] sm:$0xff] }
  0x35   : > { %1317 = vmatmul.mubr.bf16.vlgmr.msra.gmra.mrb[0].mxu1 %v2878_v34  ;;  %1163 = vmatprep.mubr.bf16.mxu0 %v2881_v36  ;;  %v1618_v34 = vsel %vm413_vm0, %v1564_v28, 0.0  ;;  %v1566_v35 = vmul.f32 %v3415_v49, %v1526_v32  ;;  %v1527_v36 = vld [vmem:[%s3405_s13 + $0x70] sm:$0xff]  ;;  %v2934_v32 = vld [vmem:[%s3376_s21 + $0x128] ss:$16 sps:$4 sm:$0xff]  }
  0x36   : > { %1324 = vmatprep.mubr.bf16.mxu1 %v2883_v37  ;;  %1607 = vadd.xlane.f32.xlu1 %v1606_v17  ;;  %v2916_v37 = vld [vmem:[%s3376_s21 + $0xc8] ss:$16 sps:$4 sm:$0xff]   ;;  %v2931_v17 = vld [vmem:[%s3376_s21 + $0x12c] ss:$16 sps:$4 sm:$0xff]   ;;  %v2933_v28 = vld [vmem:[%s3376_s21 + $0x120] ss:$16 sps:$4 sm:$0xff]  }
  0x37   : > { %1610 = vadd.xlane.f32.xlu0 %v1609_v23 }
  0x3a   : > { %1613 = vadd.xlane.f32.xlu1 %v1612_v25  ;;  %v1538_v25 = vld [vmem:[%s3405_s13 + $0xc8] sm:$0xff] }
  0x3b   : > { %1616 = vadd.xlane.f32.xlu0 %v1615_v30  ;;  %v1578_v30 = vmul.f32 %v3415_v49, %v1538_v25 }
  0x3c   : > { %1164 = vmatmul.mubr.bf16.gmra.mrb[4].mxu0 %v2885_v38  ;;  %v2917_v38 = vld [vmem:[%s3376_s21 + $0xe4] ss:$16 sps:$4 sm:$0xff]  }
  0x3d   : > { %1325 = vmatmul.mubr.bf16.gmra.mrb[4].mxu1 %v2886_v39  ;;  %1171 = vmatprep.mubr.bf16.mxu0 %v2887_v40  ;;  %v1528_v39 = vld [vmem:[%s3405_s13 + $0x78] sm:$0xff] }
  0x3e   : > { %1332 = vmatprep.mubr.bf16.mxu1 %v2889_v41  ;;  %v2919_v40 = vld [vmem:[%s3376_s21 + $0xec] ss:$16 sps:$4 sm:$0xff]   ;;  %1619 = vadd.xlane.f32.xlu1 %v1618_v34  ;;  %v1621_v41 = vsel %vm413_vm0, %v1565_v31, 0.0  ;;  %v1539_v31 = vld [vmem:[%s3405_s13 + $0xd0] sm:$0xff] }
  0x3f   : > { %1622 = vadd.xlane.f32.xlu0 %v1621_v41  ;;  %v1540_v34 = vld [vmem:[%s3405_s13 + $0xd8] sm:$0xff]  ;;  %v1542_v41 = vld [vmem:[%s3405_s13 + $0xe8] sm:$0xff] }
  0x44   : > { %1172 = vmatmul.mubr.bf16.gmra.mrb[8].mxu0 %v2891_v42  ;;  %v1567_v42 = vmul.f32 %v3415_v49, %v1527_v36  ;;  %v1657_v36 = vsel %vm413_vm0, %v1577_v27, 0.0 }
  0x45   : > { %1333 = vmatmul.mubr.bf16.gmra.mrb[8].mxu1 %v2892_v43  ;;  %1179 = vmatprep.mubr.bf16.mxu0 %v2893_v44  ;;  %v1624_v43 = vsel %vm413_vm0, %v1566_v35, 0.0  ;;  %v1568_v44 = vmul.f32 %v3415_v49, %v1528_v39  ;;  %v2937_v35 = vld [vmem:[%s3376_s21 + $0x14c] ss:$16 sps:$4 sm:$0xff]   ;;  %v1580_v39 = vmul.f32 %v3415_v49, %v1540_v34 }
  0x46   : > { %1340 = vmatprep.mubr.bf16.mxu1 %v2895_v45  ;;  %v1529_v45 = vld [vmem:[%s3405_s13 + $0x80] sm:$0xff]  ;;  %1625 = vadd.xlane.f32.xlu1 %v1624_v43 }
  0x4c   : > { %1180 = vmatmul.mubr.bf16.gmra.mrb[12].mxu0 %v2897_v46  ;;  %v1530_v46 = vld [vmem:[%s3405_s13 + $0x88] sm:$0xff] }
  0x4d   : > { %1341 = vmatmul.mubr.bf16.gmra.mrb[12].mxu1 %v2898_v47  ;;  %1187 = vmatprep.mubr.bf16.mxu0 %v2899_v50  ;;  %v1627_v47 = vsel %vm413_vm0, %v1567_v42, 0.0  ;;  %v1569_v50 = vmul.f32 %v3415_v49, %v1529_v45  ;;  %v1570_v53 = vmul.f32 %v3415_v49, %v1530_v46  ;;  %v1666_v45 = vsel %vm413_vm0, %v1580_v39, 0.0 }
  0x4e   : > { %1348 = vmatprep.mubr.bf16.mxu1 %v2901_v52  ;;  %v1630_v52 = vsel %vm413_vm0, %v1568_v44, 0.0  ;;  %1628 = vadd.xlane.f32.xlu0 %v1627_v47  ;;  %v2939_v44 = vld [vmem:[%s3376_s21 + $0x140] ss:$16 sps:$4 sm:$0xff]   ;;  %v1582_v46 = vmul.f32 %v3415_v49, %v1542_v41 }
  0x4f   : > { %1631 = vadd.xlane.f32.xlu1 %v1630_v52  ;;  %v1633_v62 = vsel %vm413_vm0, %v1569_v50, 0.0  ;;  %v1543_v47 = vld [vmem:[%s3405_s13 + $0xf0] sm:$0xff]  ;;  %v2940_v50 = vld [vmem:[%s3376_s21 + $0x148] ss:$16 sps:$4 sm:$0xff]  }
  0x50   : > { %v1544_v52 = vld [vmem:[%s3405_s13 + $0xf8] sm:$0xff] }
  0x52   : > { %1634 = vadd.xlane.f32.xlu0 %v1633_v62  ;;  %v2945_v62 = vld [vmem:[%s3376_s21 + $0x160] ss:$16 sps:$4 sm:$0xff]  }
  0x54   : > { %1188 = vmatmul.mubr.bf16.gmra.mrb[16].mxu0 %v2903_v61  ;;  %v2925_v61 = vld [vmem:[%s3376_s21 + $0x10c] ss:$16 sps:$4 sm:$0xff]  }
  0x55   : > { %1349 = vmatmul.mubr.bf16.gmra.mrb[16].mxu1 %v2904_v63  ;;  %1195 = vmatprep.mubr.bf16.mxu0 %v2905_v0  ;;  %v1571_v63 = vmul.f32 %v3415_v49, %v1531_v56  ;;  %v1636_v0 = vsel %vm413_vm0, %v1570_v53, 0.0  ;;  %v2943_v53 = vld [vmem:[%s3376_s21 + $0x16c] ss:$16 sps:$4 sm:$0xff]  }
  0x56   : > { %1356 = vmatprep.mubr.bf16.mxu1 %v2907_v2  ;;  %v1572_v2 = vmul.f32 %v3415_v49, %v1532_v59  ;;  %1637 = vadd.xlane.f32.xlu1 %v1636_v0  ;;  %v1584_v59 = vmul.f32 %v3415_v49, %v1544_v52  ;;  %v2946_v0 = vld [vmem:[%s3376_s21 + $0x168] ss:$16 sps:$4 sm:$0xff]  }
  0x57   : > { %v1639_v6 = vsel %vm413_vm0, %v1571_v63, 0.0 }
  0x58   : > { %v1642_v10 = vsel %vm413_vm0, %v1572_v2, 0.0  ;;  %1640 = vadd.xlane.f32.xlu0 %v1639_v6  ;;  %v1678_v63 = vsel %vm413_vm0, %v1584_v59, 0.0  ;;  %v2947_v2 = vld [vmem:[%s3376_s21 + $0x184] ss:$16 sps:$4 sm:$0xff]   ;;  %v2952_v6 = vld [vmem:[%s3376_s21 + $0x188] ss:$16 sps:$4 sm:$0xff]  }
  0x5a   : > { %1643 = vadd.xlane.f32.xlu1 %v1642_v10  ;;  %v2957_v10 = vld [vmem:[%s3376_s21 + $0x1a0] ss:$16 sps:$4 sm:$0xff]  }
  0x5c   : > { %1196 = vmatmul.mubr.bf16.gmra.mrb[20].mxu0 %v2909_v13  ;;  %v1535_v13 = vld [vmem:[%s3405_s13 + $0xb0] sm:$0xff]  ;;  %1646 = vadd.xlane.f32.xlu0 %v1645_v19  ;;  %v2967_v19 = vld [vmem:[%s3376_s21 + $0x1ec] ss:$16 sps:$4 sm:$0xff]  }
  0x5d   : > { %1357 = vmatmul.mubr.bf16.gmra.mrb[20].mxu1 %v2910_v15  ;;  %1203 = vmatprep.mubr.bf16.mxu0 %v2911_v16  ;;  %v2929_v15 = vld [vmem:[%s3376_s21 + $0x124] ss:$16 sps:$4 sm:$0xff]   ;;  %v1536_v16 = vld [vmem:[%s3405_s13 + $0xb8] sm:$0xff] }
  0x5e   : > { %1364 = vmatprep.mubr.bf16.mxu1 %v2913_v21  ;;  %v1575_v21 = vmul.f32 %v3415_v49, %v1535_v13  ;;  %v1576_v23 = vmul.f32 %v3415_v49, %v1536_v16  ;;  %1649 = vadd.xlane.f32.xlu1 %v1648_v22  ;;  %v2959_v13 = vld [vmem:[%s3376_s21 + $0x1c4] ss:$16 sps:$4 sm:$0xff]   ;;  %v2964_v16 = vld [vmem:[%s3376_s21 + $0x1c8] ss:$16 sps:$4 sm:$0xff]  }
  0x5f   : > { %v2970_v22 = vld [vmem:[%s3376_s21 + $0x1e8] ss:$16 sps:$4 sm:$0xff]  }
  0x60   : > { %v1651_v26 = vsel %vm413_vm0, %v1575_v21, 0.0  ;;  %v1654_v29 = vsel %vm413_vm0, %v1576_v23, 0.0  ;;  %v2969_v21 = vld [vmem:[%s3376_s21 + $0x1e0] ss:$16 sps:$4 sm:$0xff]  }
  0x61   : > { %1652 = vadd.xlane.f32.xlu0 %v1651_v26 }
  0x62   : > { %1655 = vadd.xlane.f32.xlu1 %v1654_v29 }
  0x64   : > { %1204 = vmatmul.mubr.bf16.gmra.mrb[24].mxu0 %v2915_v33  ;;  %v2935_v33 = vld [vmem:[%s3376_s21 + $0x144] ss:$16 sps:$4 sm:$0xff]  }
  0x65   : > { %1365 = vmatmul.mubr.bf16.gmra.mrb[24].mxu1 %v2916_v37  ;;  %1211 = vmatprep.mubr.bf16.mxu0 %v2917_v38  ;;  %v1579_v37 = vmul.f32 %v3415_v49, %v1539_v31  ;;  %v1660_v38 = vsel %vm413_vm0, %v1578_v30, 0.0 }
  0x66   : > { %1372 = vmatprep.mubr.bf16.mxu1 %v2919_v40  ;;  %v1541_v40 = vld [vmem:[%s3405_s13 + $0xe0] sm:$0xff]  ;;  %1658 = vadd.xlane.f32.xlu0 %v1657_v36 }
  0x67   : > { %1661 = vadd.xlane.f32.xlu1 %v1660_v38  ;;  %v1663_v42 = vsel %vm413_vm0, %v1579_v37, 0.0  ;;  %v1581_v43 = vmul.f32 %v3415_v49, %v1541_v40 }
  0x69   : > { %v1669_v56 = vsel %vm413_vm0, %v1581_v43, 0.0 }
  0x6a   : > { %1664 = vadd.xlane.f32.xlu0 %v1663_v42 }
  0x6b   : > { %1667 = vadd.xlane.f32.xlu1 %v1666_v45 }
  0x6c   : > { %1212 = vmatmul.mubr.bf16.gmra.mrb[28].mxu0 %v2921_v51  ;;  %v2941_v51 = vld [vmem:[%s3376_s21 + $0x164] ss:$16 sps:$4 sm:$0xff]  }
  0x6d   : > { %1373 = vmatmul.mubr.bf16.gmra.mrb[28].mxu1 %v2922_v57  ;;  %1219 = vmatprep.mubr.bf16.mxu0 %v2923_v58  ;;  %v1583_v57 = vmul.f32 %v3415_v49, %v1543_v47  ;;  %v1672_v58 = vsel %vm413_vm0, %v1582_v46, 0.0 }
  0x6e   : > { %1380 = vmatprep.mubr.bf16.mxu1 %v2925_v61  ;;  %1670 = vadd.xlane.f32.xlu0 %v1669_v56  ;;  %v3169_v61 = vmov 0.0  }
  0x6f   : > { %414 = vst.msk [vmem:[#allocation2] sm:$0xff] %vm413_vm0, %v3169_v61  ;;  %415 = vst.msk [vmem:[#allocation2 + $0x8] sm:$0xff] %vm413_vm0, %v3169_v61  ;;  %1673 = vadd.xlane.f32.xlu1 %v1672_v58  ;;  %v1675_v49 = vsel %vm413_vm0, %v1583_v57, 0.0 }
  0x70   : > { %416 = vst.msk [vmem:[#allocation2 + $0x10] sm:$0xff] %vm413_vm0, %v3169_v61  ;;  %417 = vst.msk [vmem:[#allocation2 + $0x18] sm:$0xff] %vm413_vm0, %v3169_v61 }
  0x71   : > { %418 = vst.msk [vmem:[#allocation2 + $0x20] sm:$0xff] %vm413_vm0, %v3169_v61  ;;  %419 = vst.msk [vmem:[#allocation2 + $0x28] sm:$0xff] %vm413_vm0, %v3169_v61 }
  0x72   : > { %420 = vst.msk [vmem:[#allocation2 + $0x30] sm:$0xff] %vm413_vm0, %v3169_v61  ;;  %421 = vst.msk [vmem:[#allocation2 + $0x38] sm:$0xff] %vm413_vm0, %v3169_v61  ;;  %1676 = vadd.xlane.f32.xlu0 %v1675_v49 }
  0x73   : > { %422 = vst.msk [vmem:[#allocation2 + $0x40] sm:$0xff] %vm413_vm0, %v3169_v61  ;;  %423 = vst.msk [vmem:[#allocation2 + $0x48] sm:$0xff] %vm413_vm0, %v3169_v61  ;;  %1679 = vadd.xlane.f32.xlu1 %v1678_v63 }
  0x74   : > { %1220 = vmatmul.mubr.bf16.gmra.mrb[32].mxu0 %v2927_v9  ;;  %424 = vst.msk [vmem:[#allocation2 + $0x50] sm:$0xff] %vm413_vm0, %v3169_v61  ;;  %425 = vst.msk [vmem:[#allocation2 + $0x58] sm:$0xff] %vm413_vm0, %v3169_v61  ;;  %v2955_v9 = vld [vmem:[%s3376_s21 + $0x1ac] ss:$16 sps:$4 sm:$0xff]  }
  0x75   : > { %1381 = vmatmul.mubr.bf16.gmra.mrb[32].mxu1 %v2928_v14  ;;  %1227 = vmatprep.mubr.bf16.mxu0 %v2929_v15  ;;  %426 = vst.msk [vmem:[#allocation2 + $0x60] sm:$0xff] %vm413_vm0, %v3169_v61  ;;  %427 = vst.msk [vmem:[#allocation2 + $0x68] sm:$0xff] %vm413_vm0, %v3169_v61  ;;  %v2961_v14 = vld [vmem:[%s3376_s21 + $0x1cc] ss:$16 sps:$4 sm:$0xff]   ;;  %v2963_v15 = vld [vmem:[%s3376_s21 + $0x1c0] ss:$16 sps:$4 sm:$0xff]  }
  0x76   : > { %1388 = vmatprep.mubr.bf16.mxu1 %v2931_v17  ;;  %428 = vst.msk [vmem:[#allocation2 + $0x70] sm:$0xff] %vm413_vm0, %v3169_v61  ;;  %429 = vst.msk [vmem:[#allocation2 + $0x78] sm:$0xff] %vm413_vm0, %v3169_v61  ;;  %v2965_v17 = vld [vmem:[%s3376_s21 + $0x1e4] ss:$16 sps:$4 sm:$0xff]   ;;  %v516_v43 = vld [vmem:[#allocation2 + $0x8] sm:$0xff]  ;;  %s2187_s21 = sshll.u32 %s3654_s15, 4  ;;  %s3963_s21 = int_to_ptr.vmem [resolvable:$true] %s2187_s21 }
  0x77   : > { %430 = vst.msk [vmem:[#allocation2 + $0x80] sm:$0xff] %vm413_vm0, %v3169_v61  ;;  %431 = vst.msk [vmem:[#allocation2 + $0x88] sm:$0xff] %vm413_vm0, %v3169_v61  ;;  %v515_v38 = vld [vmem:[#allocation2] sm:$0xff]  ;;  %v517_v63 = vld [vmem:[#allocation2 + $0x10] sm:$0xff]  ;;  %s3057_s25 = scalar_lea.vmem %s3963_s21, 2048 }
  0x78   : > { %432 = vst.msk [vmem:[#allocation2 + $0x90] sm:$0xff] %vm413_vm0, %v3169_v61  ;;  %433 = vst.msk [vmem:[#allocation2 + $0x98] sm:$0xff] %vm413_vm0, %v3169_v61  ;;  %p3058_p12 = scmp.ne.s32.totalorder %s3963_s21, %s3057_s25 }
  0x79   : > { %434 = vst.msk [vmem:[#allocation2 + $0xa0] sm:$0xff] %vm413_vm0, %v3169_v61  ;;  %435 = vst.msk [vmem:[#allocation2 + $0xa8] sm:$0xff] %vm413_vm0, %v3169_v61 }
  0x7a   : > { %436 = vst.msk [vmem:[#allocation2 + $0xb0] sm:$0xff] %vm413_vm0, %v3169_v61  ;;  %437 = vst.msk [vmem:[#allocation2 + $0xb8] sm:$0xff] %vm413_vm0, %v3169_v61  ;;  %p3059_p13 = pnand %p3058_p12, %p3264_p4 }
  0x7b   : > { %438 = vst.msk [vmem:[#allocation2 + $0xc0] sm:$0xff] %vm413_vm0, %v3169_v61  ;;  %439 = vst.msk [vmem:[#allocation2 + $0xc8] sm:$0xff] %vm413_vm0, %v3169_v61 }
  0x7c   : > { %1228 = vmatmul.mubr.bf16.gmra.mrb[36].mxu0 %v2933_v28  ;;  %440 = vst.msk [vmem:[#allocation2 + $0xd0] sm:$0xff] %vm413_vm0, %v3169_v61  ;;  %441 = vst.msk [vmem:[#allocation2 + $0xd8] sm:$0xff] %vm413_vm0, %v3169_v61  ;;  %p3060_p0 = pneg %p3059_p13 }
  0x7d   : > { %1389 = vmatmul.mubr.bf16.gmra.mrb[36].mxu1 %v2934_v32  ;;  %1235 = vmatprep.mubr.bf16.mxu0 %v2935_v33  ;;  %442 = vst.msk [vmem:[#allocation2 + $0xe0] sm:$0xff] %vm413_vm0, %v3169_v61  ;;  %443 = vst.msk [vmem:[#allocation2 + $0xe8] sm:$0xff] %vm413_vm0, %v3169_v61 }
  0x7e   : > { %1396 = vmatprep.mubr.bf16.mxu1 %v2937_v35  ;;  %444 = vst.msk [vmem:[#allocation2 + $0xf0] sm:$0xff] %vm413_vm0, %v3169_v61  ;;  %445 = vst.msk [vmem:[#allocation2 + $0xf8] sm:$0xff] %vm413_vm0, %v3169_v61 }
  0x84   : > { %1236 = vmatmul.mubr.bf16.gmra.mrb[40].mxu0 %v2939_v44 }
  0x85   : > { %1397 = vmatmul.mubr.bf16.gmra.mrb[40].mxu1 %v2940_v50  ;;  %1243 = vmatprep.mubr.bf16.mxu0 %v2941_v51 }
  0x86   : > { %1404 = vmatprep.mubr.bf16.mxu1 %v2943_v53 }
  0x8c   : > { %1244 = vmatmul.mubr.bf16.gmra.mrb[44].mxu0 %v2945_v62 }
  0x8d   : > { %1405 = vmatmul.mubr.bf16.gmra.mrb[44].mxu1 %v2946_v0  ;;  %1251 = vmatprep.mubr.bf16.mxu0 %v2947_v2 }
  0x8e   : > { %1412 = vmatprep.mubr.bf16.mxu1 %v2949_v3 }
  0x94   : > { %1252 = vmatmul.mubr.bf16.gmra.mrb[48].mxu0 %v2951_v4 }
  0x95   : > { %1413 = vmatmul.mubr.bf16.gmra.mrb[48].mxu1 %v2952_v6  ;;  %1259 = vmatprep.mubr.bf16.mxu0 %v2953_v7 }
  0x96   : > { %1420 = vmatprep.mubr.bf16.mxu1 %v2955_v9  ;;  %v518_v9 = vld [vmem:[#allocation2 + $0x18] sm:$0xff] }
  0x9c   : > { %1260 = vmatmul.mubr.bf16.gmra.mrb[52].mxu0 %v2957_v10 }
  0x9d   : > { %1421 = vmatmul.mubr.bf16.gmra.mrb[52].mxu1 %v2958_v12  ;;  %1267 = vmatprep.mubr.bf16.mxu0 %v2959_v13 }
  0x9e   : > { %1428 = vmatprep.mubr.bf16.mxu1 %v2961_v14 }
  0xa4   : > { %1268 = vmatmul.mubr.bf16.gmra.mrb[56].mxu0 %v2963_v15 }
  0xa5   : > { %1429 = vmatmul.mubr.bf16.gmra.mrb[56].mxu1 %v2964_v16  ;;  %1275 = vmatprep.mubr.bf16.mxu0 %v2965_v17  ;;  %v2035_v16 = vld [vmem:[%s3635_s23] sm:$0xff] }
  0xa6   : > { %1436 = vmatprep.mubr.bf16.mxu1 %v2967_v19 }
  0xac   : > { %1276 = vmatmul.mubr.bf16.gmra.mrb[60].mxu0 %v2969_v21 }
  0xad   : > { %1437 = vmatmul.mubr.bf16.gmra.mrb[60].mxu1 %v2970_v22 }
  0xb4   : > { %v1587_v23 = vpop.xlane.xlu0 %1586 }
  0xb5   : > { %v1682_v26 = vadd.f32 %v3620_v24, %v1587_v23 }
  0xb6   : > { %v1593_v28 = vpop.xlane.xlu1 %1592 }
  0xb7   : > { %2971 = vtanh.f32 %v1682_v26  ;;  %v1684_v47 = vadd.f32 %v3620_v24, %v1593_v28  ;;  %v2036_v26 = vld [vmem:[%s3635_s23 + $0x8] sm:$0xff] }
  0xb8   : > { %v1590_v25 = vpop.xlane.xlu0 %1589 }
  0xb9   : > { %v1683_v34 = vadd.f32 %v3620_v24, %v1590_v25 }
  0xba   : > { %v1596_v46 = vpop.xlane.xlu1 %1595 }
  0xbb   : > { %2973 = vtanh.f32 %v1683_v34  ;;  %v1685_v59 = vadd.f32 %v3620_v24, %v1596_v46 }
  0xbc   : > { %2975 = vtanh.f32 %v1684_v47  ;;  %v1599_v6 = vpop.xlane.xlu0 %1598 }
  0xbd   : > { %2977 = vtanh.f32 %v1685_v59  ;;  %v1686_v19 = vadd.f32 %v3620_v24, %v1599_v6 }
  0xbe   : > { %v1602_v13 = vpop.xlane.xlu1 %1601 }
  0xbf   : > { %2979 = vtanh.f32 %v1686_v19 }
  0xc1   : > { %v2972_v7 = vpop.eup %2971 }
  0xc5   : > { %v2974_v14 = vpop.eup %2973 }
  0xc6   : > { %v2976_v46 = vpop.eup %2975 }
 0x107   : > { %v2570_v27 = vpop.f32.mrb[0].mxu0 }
 0x108   : > { %v2682_v29 = vpop.f32.mrb[0].mxu1  ;;  %v2571_v30 = vpop.f32.mrb[1].mxu0 }
 0x109   : > { %v2572_v31 = vadd.f32 %v2571_v30, %v2570_v27  ;;  %v2683_v32 = vpop.f32.mrb[1].mxu1  ;;  %v2573_v33 = vpop.f32.mrb[2].mxu0 }
 0x10a   : > { %v2684_v35 = vadd.f32 %v2683_v32, %v2682_v29  ;;  %v2685_v36 = vpop.f32.mrb[2].mxu1  ;;  %v2574_v37 = vpop.f32.mrb[3].mxu0 }
 0x10b   : > { %v2575_v39 = vadd.f32 %v2574_v37, %v2573_v33  ;;  %v2686_v40 = vpop.f32.mrb[3].mxu1 }
 0x10c   : > { %v1319_v41 = vadd.f32 %v2684_v35, %v2572_v31  ;;  %v2687_v42 = vadd.f32 %v2686_v40, %v2685_v36  ;;  %v1687_v31 = vadd.f32 %v3620_v24, %v1602_v13 }
 0x10e   : > { %v1445_v44 = vadd.f32 %v1319_v41, %v515_v38  ;;  %v1322_v45 = vadd.f32 %v2687_v42, %v2575_v39  ;;  %2981 = vtanh.f32 %v1687_v31 }
 0x10f   : > { %v2576_v50 = vpop.f32.mrb[4].mxu0 }
 0x110   : > { %1478 = vst.msk [vmem:[#allocation2] sm:$0xff] %vm413_vm0, %v1445_v44  ;;  %v1446_v51 = vadd.f32 %v1322_v45, %v516_v43  ;;  %v2688_v52 = vpop.f32.mrb[4].mxu1  ;;  %v2577_v53 = vpop.f32.mrb[5].mxu0  ;;  %v519_v44 = vld [vmem:[#allocation2 + $0x20] sm:$0xff] }
 0x111   : > { %v2578_v56 = vadd.f32 %v2577_v53, %v2576_v50  ;;  %v2689_v57 = vpop.f32.mrb[5].mxu1  ;;  %v2579_v58 = vpop.f32.mrb[6].mxu0 }
 0x112   : > { %1479 = vst.msk [vmem:[#allocation2 + $0x8] sm:$0xff] %vm413_vm0, %v1446_v51  ;;  %v2690_v61 = vadd.f32 %v2689_v57, %v2688_v52  ;;  %v2691_v49 = vpop.f32.mrb[6].mxu1  ;;  %v2580_v62 = vpop.f32.mrb[7].mxu0  ;;  %v520_v52 = vld [vmem:[#allocation2 + $0x28] sm:$0xff]  ;;  %v2037_v57 = vld [vmem:[%s3635_s23 + $0x10] sm:$0xff] }
 0x113   : > { %v2581_v0 = vadd.f32 %v2580_v62, %v2579_v58  ;;  %v2692_v2 = vpop.f32.mrb[7].mxu1  ;;  %v1605_v45 = vpop.xlane.xlu0 %1604 }
 0x114   : > { %v1327_v3 = vadd.f32 %v2690_v61, %v2578_v56  ;;  %v2693_v4 = vadd.f32 %v2692_v2, %v2691_v49  ;;  %v1608_v53 = vpop.xlane.xlu1 %1607  ;;  %v1688_v49 = vadd.f32 %v3620_v24, %v1605_v45  ;;  %v2038_v2 = vld [vmem:[%s3635_s23 + $0x18] sm:$0xff] }
 0x116   : > { %v1447_v10 = vadd.f32 %v1327_v3, %v517_v63  ;;  %v1330_v12 = vadd.f32 %v2693_v4, %v2581_v0  ;;  %2983 = vtanh.f32 %v1688_v49 }
 0x117   : > { %v1746_v15 = vld [vmem:[#allocation2] sm:$0xff]  ;;  %v2582_v17 = vpop.f32.mrb[8].mxu0 }
 0x118   : > { %v1778_v21 = vmul.f32 %v2972_v7, %v1746_v15  ;;  %1480 = vst.msk [vmem:[#allocation2 + $0x10] sm:$0xff] %vm413_vm0, %v1447_v10  ;;  %v1448_v22 = vadd.f32 %v1330_v12, %v518_v9  ;;  %v2694_v23 = vpop.f32.mrb[8].mxu1  ;;  %v2583_v25 = vpop.f32.mrb[9].mxu0  ;;  %v1689_v10 = vadd.f32 %v3620_v24, %v1608_v53 }
 0x119   : > { %v1747_v27 = vld [vmem:[#allocation2 + $0x8] sm:$0xff]  ;;  %v2584_v28 = vadd.f32 %v2583_v25, %v2582_v17  ;;  %v2695_v29 = vpop.f32.mrb[9].mxu1  ;;  %v2585_v30 = vpop.f32.mrb[10].mxu0 }
 0x11a   : > { %v2520_v32 = vpack.c.bf16 %v1778_v21, %v1778_v21  ;;  %v1971_v33 = vadd.f32 %v1778_v21, %v3410_v48  ;;  %v2067_v34 = vadd.f32 %v2035_v16, %v1778_v21  ;;  %v1779_v35 = vmul.f32 %v2974_v14, %v1747_v27  ;;  %1481 = vst.msk [vmem:[#allocation2 + $0x18] sm:$0xff] %vm413_vm0, %v1448_v22  ;;  %v2697_v36 = vpop.f32.mrb[10].mxu1  ;;  %v2586_v37 = vpop.f32.mrb[11].mxu0 }
 0x11b   : > { %v2696_v38 = vadd.f32 %v2695_v29, %v2694_v23  ;;  %v2587_v39 = vadd.f32 %v2586_v37, %v2585_v30  ;;  %v2698_v40 = vpop.f32.mrb[11].mxu1  ;;  %v1611_v23 = vpop.xlane.xlu0 %1610  ;;  %2985 = vtanh.f32 %v1689_v10 }
 0x11c   : > { %1939 = vst.msk [vmem:[%s3654_s15] sm:$0xf] %vm1938_vm1, %v2520_v32  ;;  %v2099_v48 = vmul.f32 0.25, %v2067_v34  ;;  %v2521_v41 = vpack.c.bf16 %v1779_v35, %v1779_v35  ;;  %v1972_v42 = vadd.f32 %v1779_v35, %v3423_v54  ;;  %v2068_v43 = vadd.f32 %v2036_v26, %v1779_v35  ;;  %v2978_v54 = vpop.eup %2977  ;;  %v1614_v32 = vpop.xlane.xlu1 %1613  ;;  %v522_v34 = vld [vmem:[#allocation2 + $0x38] sm:$0xff] }
 0x11d   : > { %2003 = vst.msk [vmem:[%s3660_s17] sm:$0xff] %vm413_vm0, %v1971_v33  ;;  %v1335_v47 = vadd.f32 %v2696_v38, %v2584_v28  ;;  %v2699_v50 = vadd.f32 %v2698_v40, %v2697_v36  ;;  %v521_v28 = vld [vmem:[#allocation2 + $0x30] sm:$0xff]  ;;  %v2980_v29 = vpop.eup %2979  ;;  %v1690_v35 = vadd.f32 %v3620_v24, %v1611_v23 }
 0x11e   : > { %2131 = vst.msk [vmem:[%s3650_s26] sm:$0xff] %vm413_vm0, %v2099_v48  ;;  %2004 = vst.msk [vmem:[%s3660_s17 + $0x8] sm:$0xff] %vm413_vm0, %v1972_v42  ;;  %v2100_v51 = vmul.f32 0.25, %v2068_v43  ;;  %v2982_v38 = vpop.eup %2981  ;;  %v1691_v42 = vadd.f32 %v3620_v24, %v1614_v32 }
 0x11f   : > { %1940 = vst.msk [vmem:[%s3654_s15 + $0x4] sm:$0xf] %vm1938_vm1, %v2521_v41  ;;  %v1748_v56 = vld [vmem:[#allocation2 + $0x10] sm:$0xff]  ;;  %v1449_v58 = vadd.f32 %v1335_v47, %v519_v44  ;;  %v1338_v59 = vadd.f32 %v2699_v50, %v2587_v39  ;;  %v2588_v61 = vpop.f32.mrb[12].mxu0  ;;  %v2039_v39 = vld [vmem:[%s3635_s23 + $0x20] sm:$0xff]  ;;  %v2040_v50 = vld [vmem:[%s3635_s23 + $0x28] sm:$0xff]  ;;  %2987 = vtanh.f32 %v1690_v35 }
 0x120   : > { %2132 = vst.msk [vmem:[%s3650_s26 + $0x8] sm:$0xff] %vm413_vm0, %v2100_v51  ;;  %v1780_v62 = vmul.f32 %v2976_v46, %v1748_v56  ;;  %v2700_v63 = vpop.f32.mrb[12].mxu1  ;;  %v2589_v0 = vpop.f32.mrb[13].mxu0  ;;  %2989 = vtanh.f32 %v1691_v42 }
 0x121   : > { %v1749_v3 = vld [vmem:[#allocation2 + $0x18] sm:$0xff]  ;;  %1482 = vst.msk [vmem:[#allocation2 + $0x20] sm:$0xff] %vm413_vm0, %v1449_v58  ;;  %v1450_v4 = vadd.f32 %v1338_v59, %v520_v52  ;;  %v2590_v6 = vadd.f32 %v2589_v0, %v2588_v61  ;;  %v2701_v7 = vpop.f32.mrb[13].mxu1  ;;  %v2591_v9 = vpop.f32.mrb[14].mxu0  ;;  %v523_v61 = vld [vmem:[#allocation2 + $0x40] sm:$0xff] }
 0x122   : > { %v2522_v12 = vpack.c.bf16 %v1780_v62, %v1780_v62  ;;  %v1973_v13 = vadd.f32 %v1780_v62, %v3426_v55  ;;  %v2069_v14 = vadd.f32 %v2037_v57, %v1780_v62  ;;  %v1781_v15 = vmul.f32 %v2978_v54, %v1749_v3  ;;  %v2703_v16 = vpop.f32.mrb[14].mxu1  ;;  %v2592_v17 = vpop.f32.mrb[15].mxu0 }
 0x123   : > { %1483 = vst.msk [vmem:[#allocation2 + $0x28] sm:$0xff] %vm413_vm0, %v1450_v4  ;;  %v2702_v19 = vadd.f32 %v2701_v7, %v2700_v63  ;;  %v2593_v21 = vadd.f32 %v2592_v17, %v2591_v9  ;;  %v2704_v22 = vpop.f32.mrb[15].mxu1  ;;  %v1617_v62 = vpop.xlane.xlu0 %1616  ;;  %v524_v9 = vld [vmem:[#allocation2 + $0x48] sm:$0xff] }
 0x124   : > { %1941 = vst.msk [vmem:[%s3654_s15 + $0x8] sm:$0xf] %vm1938_vm1, %v2522_v12  ;;  %v2101_v25 = vmul.f32 0.25, %v2069_v14  ;;  %v2523_v55 = vpack.c.bf16 %v1781_v15, %v1781_v15  ;;  %v1974_v26 = vadd.f32 %v1781_v15, %v3435_v60  ;;  %v2070_v27 = vadd.f32 %v2038_v2, %v1781_v15  ;;  %v2984_v3 = vpop.eup %2983  ;;  %v1620_v10 = vpop.xlane.xlu1 %1619 }
 0x125   : > { %2005 = vst.msk [vmem:[%s3660_s17 + $0x10] sm:$0xff] %vm413_vm0, %v1973_v13  ;;  %v1343_v30 = vadd.f32 %v2702_v19, %v2590_v6  ;;  %v2705_v31 = vadd.f32 %v2704_v22, %v2703_v16  ;;  %v1692_v14 = vadd.f32 %v3620_v24, %v1617_v62  ;;  %v2986_v17 = vpop.eup %2985  ;;  %v2041_v19 = vld [vmem:[%s3635_s23 + $0x30] sm:$0xff]  ;;  %v2044_v62 = vld [vmem:[%s3635_s23 + $0x48] sm:$0xff] }
 0x126   : > { %2133 = vst.msk [vmem:[%s3650_s26 + $0x10] sm:$0xff] %vm413_vm0, %v2101_v25  ;;  %2006 = vst.msk [vmem:[%s3660_s17 + $0x18] sm:$0xff] %vm413_vm0, %v1974_v26  ;;  %v2102_v33 = vmul.f32 0.25, %v2070_v27  ;;  %v1693_v25 = vadd.f32 %v3620_v24, %v1620_v10 }
 0x127   : > { %1942 = vst.msk [vmem:[%s3654_s15 + $0xc] sm:$0xf] %vm1938_vm1, %v2523_v55  ;;  %v1451_v60 = vadd.f32 %v1343_v30, %v521_v28  ;;  %v1346_v36 = vadd.f32 %v2705_v31, %v2593_v21  ;;  %v2594_v37 = vpop.f32.mrb[16].mxu0  ;;  %2991 = vtanh.f32 %v1692_v14  ;;  %v1623_v42 = vpop.xlane.xlu0 %1622 }
 0x128   : > { %2134 = vst.msk [vmem:[%s3650_s26 + $0x18] sm:$0xff] %vm413_vm0, %v2102_v33  ;;  %v1750_v40 = vld [vmem:[#allocation2 + $0x20] sm:$0xff]  ;;  %v2706_v48 = vpop.f32.mrb[16].mxu1  ;;  %v2595_v41 = vpop.f32.mrb[17].mxu0  ;;  %2993 = vtanh.f32 %v1693_v25 }
 0x129   : > { %v1782_v43 = vmul.f32 %v2980_v29, %v1750_v40  ;;  %1484 = vst.msk [vmem:[#allocation2 + $0x30] sm:$0xff] %vm413_vm0, %v1451_v60  ;;  %v1452_v44 = vadd.f32 %v1346_v36, %v522_v34  ;;  %v2596_v45 = vadd.f32 %v2595_v41, %v2594_v37  ;;  %v2707_v46 = vpop.f32.mrb[17].mxu1  ;;  %v2597_v47 = vpop.f32.mrb[18].mxu0  ;;  %v2042_v29 = vld [vmem:[%s3635_s23 + $0x38] sm:$0xff]  ;;  %v525_v37 = vld [vmem:[#allocation2 + $0x50] sm:$0xff] }
 0x12a   : > { %v1751_v51 = vld [vmem:[#allocation2 + $0x28] sm:$0xff]  ;;  %v2708_v52 = vadd.f32 %v2707_v46, %v2706_v48  ;;  %v2709_v53 = vpop.f32.mrb[18].mxu1  ;;  %v2598_v54 = vpop.f32.mrb[19].mxu0  ;;  %v526_v46 = vld [vmem:[#allocation2 + $0x58] sm:$0xff] }
 0x12b   : > { %v2524_v56 = vpack.c.bf16 %v1782_v43, %v1782_v43  ;;  %v1975_v57 = vadd.f32 %v1782_v43, %v3443_v1  ;;  %v2071_v58 = vadd.f32 %v2039_v39, %v1782_v43  ;;  %v1783_v59 = vmul.f32 %v2982_v38, %v1751_v51  ;;  %1485 = vst.msk [vmem:[#allocation2 + $0x38] sm:$0xff] %vm413_vm0, %v1452_v44  ;;  %v2710_v49 = vpop.f32.mrb[19].mxu1  ;;  %v2988_v39 = vpop.eup %2987 }
 0x12c   : > { %v1351_v63 = vadd.f32 %v2708_v52, %v2596_v45  ;;  %v2599_v0 = vadd.f32 %v2598_v54, %v2597_v47  ;;  %v2711_v2 = vadd.f32 %v2710_v49, %v2709_v53  ;;  %v2990_v47 = vpop.eup %2989  ;;  %v1626_v52 = vpop.xlane.xlu1 %1625  ;;  %v2043_v54 = vld [vmem:[%s3635_s23 + $0x40] sm:$0xff] }
 0x12d   : > { %1943 = vst.msk [vmem:[%s3654_s15 + $0x10] sm:$0xf] %vm1938_vm1, %v2524_v56  ;;  %v2103_v1 = vmul.f32 0.25, %v2071_v58  ;;  %v2525_v4 = vpack.c.bf16 %v1783_v59, %v1783_v59  ;;  %v1976_v6 = vadd.f32 %v1783_v59, %v3450_v5  ;;  %v2072_v7 = vadd.f32 %v2040_v50, %v1783_v59 }
 0x12e   : > { %2007 = vst.msk [vmem:[%s3660_s17 + $0x20] sm:$0xff] %vm413_vm0, %v1975_v57  ;;  %v1453_v12 = vadd.f32 %v1351_v63, %v523_v61  ;;  %v1354_v13 = vadd.f32 %v2711_v2, %v2599_v0 }
 0x12f   : > { %2135 = vst.msk [vmem:[%s3650_s26 + $0x20] sm:$0xff] %vm413_vm0, %v2103_v1  ;;  %2008 = vst.msk [vmem:[%s3660_s17 + $0x28] sm:$0xff] %vm413_vm0, %v1976_v6  ;;  %v2104_v15 = vmul.f32 0.25, %v2072_v7  ;;  %v2600_v16 = vpop.f32.mrb[20].mxu0  ;;  %v1695_v1 = vadd.f32 %v3620_v24, %v1626_v52 }
 0x130   : > { %1944 = vst.msk [vmem:[%s3654_s15 + $0x14] sm:$0xf] %vm1938_vm1, %v2525_v4  ;;  %v1752_v5 = vld [vmem:[#allocation2 + $0x30] sm:$0xff]  ;;  %v1454_v21 = vadd.f32 %v1354_v13, %v524_v9  ;;  %v2712_v22 = vpop.f32.mrb[20].mxu1  ;;  %v2601_v23 = vpop.f32.mrb[21].mxu0 }
 0x131   : > { %1486 = vst.msk [vmem:[#allocation2 + $0x40] sm:$0xff] %vm413_vm0, %v1453_v12  ;;  %2136 = vst.msk [vmem:[%s3650_s26 + $0x28] sm:$0xff] %vm413_vm0, %v2104_v15  ;;  %v1784_v55 = vmul.f32 %v2984_v3, %v1752_v5  ;;  %v2602_v26 = vadd.f32 %v2601_v23, %v2600_v16  ;;  %v2713_v27 = vpop.f32.mrb[21].mxu1  ;;  %v2603_v28 = vpop.f32.mrb[22].mxu0 }
 0x132   : > { %v1753_v30 = vld [vmem:[#allocation2 + $0x38] sm:$0xff]  ;;  %1487 = vst.msk [vmem:[#allocation2 + $0x48] sm:$0xff] %vm413_vm0, %v1454_v21  ;;  %v2714_v31 = vadd.f32 %v2713_v27, %v2712_v22  ;;  %v2715_v32 = vpop.f32.mrb[22].mxu1  ;;  %v2604_v33 = vpop.f32.mrb[23].mxu0  ;;  %v527_v21 = vld [vmem:[#allocation2 + $0x60] sm:$0xff]  ;;  %v528_v27 = vld [vmem:[#allocation2 + $0x68] sm:$0xff] }
 0x133   : > { %v2526_v34 = vpack.c.bf16 %v1784_v55, %v1784_v55  ;;  %v1977_v35 = vadd.f32 %v1784_v55, %v3456_v8  ;;  %v2073_v60 = vadd.f32 %v2041_v19, %v1784_v55  ;;  %v1785_v36 = vmul.f32 %v2986_v17, %v1753_v30  ;;  %v2716_v38 = vpop.f32.mrb[23].mxu1  ;;  %v2992_v16 = vpop.eup %2991 }
 0x134   : > { %v1359_v40 = vadd.f32 %v2714_v31, %v2602_v26  ;;  %v2605_v48 = vadd.f32 %v2604_v33, %v2603_v28  ;;  %v2717_v41 = vadd.f32 %v2716_v38, %v2715_v32  ;;  %v1629_v22 = vpop.xlane.xlu0 %1628  ;;  %v2994_v55 = vpop.eup %2993 }
 0x135   : > { %1945 = vst.msk [vmem:[%s3654_s15 + $0x18] sm:$0xf] %vm1938_vm1, %v2526_v34  ;;  %v2105_v43 = vmul.f32 0.25, %v2073_v60  ;;  %v2527_v8 = vpack.c.bf16 %v1785_v36, %v1785_v36  ;;  %v1978_v44 = vadd.f32 %v1785_v36, %v3462_v11  ;;  %v2074_v45 = vadd.f32 %v2042_v29, %v1785_v36  ;;  %v1632_v28 = vpop.xlane.xlu1 %1631  ;;  %v2045_v29 = vld [vmem:[%s3635_s23 + $0x50] sm:$0xff]  ;;  %v2046_v36 = vld [vmem:[%s3635_s23 + $0x58] sm:$0xff] }
 0x136   : > { %2009 = vst.msk [vmem:[%s3660_s17 + $0x30] sm:$0xff] %vm413_vm0, %v1977_v35  ;;  %v1455_v50 = vadd.f32 %v1359_v40, %v525_v37  ;;  %v1362_v51 = vadd.f32 %v2717_v41, %v2605_v48  ;;  %v1694_v11 = vadd.f32 %v3620_v24, %v1623_v42  ;;  %v1696_v33 = vadd.f32 %v3620_v24, %v1629_v22 }
 0x137   : > { %2137 = vst.msk [vmem:[%s3650_s26 + $0x30] sm:$0xff] %vm413_vm0, %v2105_v43  ;;  %2010 = vst.msk [vmem:[%s3660_s17 + $0x38] sm:$0xff] %vm413_vm0, %v1978_v44  ;;  %v2106_v53 = vmul.f32 0.25, %v2074_v45  ;;  %v2606_v57 = vpop.f32.mrb[24].mxu0  ;;  %v1697_v41 = vadd.f32 %v3620_v24, %v1632_v28  ;;  %v3035_v43 = vld [vmem:[%s3405_s13 + $0x50] sm:$0xff] }
 0x138   : > { %1946 = vst.msk [vmem:[%s3654_s15 + $0x1c] sm:$0xf] %vm1938_vm1, %v2527_v8  ;;  %v1754_v56 = vld [vmem:[#allocation2 + $0x40] sm:$0xff]  ;;  %v1456_v59 = vadd.f32 %v1362_v51, %v526_v46  ;;  %v2718_v61 = vpop.f32.mrb[24].mxu1  ;;  %v2607_v49 = vpop.f32.mrb[25].mxu0  ;;  %2995 = vtanh.f32 %v1694_v11 }
 0x139   : > { %v1786_v58 = vmul.f32 %v2988_v39, %v1754_v56  ;;  %1488 = vst.msk [vmem:[#allocation2 + $0x50] sm:$0xff] %vm413_vm0, %v1455_v50  ;;  %2138 = vst.msk [vmem:[%s3650_s26 + $0x38] sm:$0xff] %vm413_vm0, %v2106_v53  ;;  %v1755_v63 = vld [vmem:[#allocation2 + $0x48] sm:$0xff]  ;;  %v2608_v0 = vadd.f32 %v2607_v49, %v2606_v57  ;;  %v2719_v2 = vpop.f32.mrb[25].mxu1  ;;  %v2609_v3 = vpop.f32.mrb[26].mxu0  ;;  %2997 = vtanh.f32 %v1695_v1  ;;  %v3036_v57 = vld [vmem:[%s3405_s13 + $0x58] sm:$0xff] }
 0x13a   : > { %v1787_v9 = vmul.f32 %v2990_v47, %v1755_v63  ;;  %1489 = vst.msk [vmem:[#allocation2 + $0x58] sm:$0xff] %vm413_vm0, %v1456_v59  ;;  %v2721_v10 = vpop.f32.mrb[26].mxu1  ;;  %v2610_v12 = vpop.f32.mrb[27].mxu0  ;;  %v2720_v13 = vadd.f32 %v2719_v2, %v2718_v61  ;;  %2999 = vtanh.f32 %v1696_v33  ;;  %v529_v59 = vld [vmem:[#allocation2 + $0x70] sm:$0xff]  ;;  %v530_v2 = vld [vmem:[#allocation2 + $0x78] sm:$0xff] }
 0x13b   : > { %v2528_v4 = vpack.c.bf16 %v1786_v58, %v1786_v58  ;;  %v1979_v6 = vadd.f32 %v1786_v58, %v3472_v18  ;;  %v2075_v7 = vadd.f32 %v2043_v54, %v1786_v58  ;;  %v2611_v14 = vadd.f32 %v2610_v12, %v2609_v3  ;;  %v2722_v15 = vpop.f32.mrb[27].mxu1  ;;  %v1635_v53 = vpop.xlane.xlu0 %1634 }
 0x13c   : > { %v2529_v18 = vpack.c.bf16 %v1787_v9, %v1787_v9  ;;  %v1980_v19 = vadd.f32 %v1787_v9, %v3477_v20  ;;  %v2076_v5 = vadd.f32 %v2044_v62, %v1787_v9  ;;  %v1367_v23 = vadd.f32 %v2720_v13, %v2608_v0  ;;  %v1638_v63 = vpop.xlane.xlu1 %1637  ;;  %v2047_v9 = vld [vmem:[%s3635_s23 + $0x60] sm:$0xff] }
 0x13d   : > { %1947 = vst.msk [vmem:[%s3654_s15 + $0x20] sm:$0xf] %vm1938_vm1, %v2528_v4  ;;  %v2107_v17 = vmul.f32 0.25, %v2075_v7  ;;  %v2723_v25 = vadd.f32 %v2722_v15, %v2721_v10  ;;  %3001 = vtanh.f32 %v1697_v41  ;;  %v1698_v3 = vadd.f32 %v3620_v24, %v1635_v53 }
 0x13e   : > { %2011 = vst.msk [vmem:[%s3660_s17 + $0x40] sm:$0xff] %vm413_vm0, %v1979_v6  ;;  %2012 = vst.msk [vmem:[%s3660_s17 + $0x48] sm:$0xff] %vm413_vm0, %v1980_v19  ;;  %v2108_v26 = vmul.f32 0.25, %v2076_v5  ;;  %v1457_v30 = vadd.f32 %v1367_v23, %v527_v21  ;;  %v2048_v5 = vld [vmem:[%s3635_s23 + $0x68] sm:$0xff] }
 0x13f   : > { %2139 = vst.msk [vmem:[%s3650_s26 + $0x40] sm:$0xff] %vm413_vm0, %v2107_v17  ;;  %v1370_v31 = vadd.f32 %v2723_v25, %v2611_v14  ;;  %v2612_v32 = vpop.f32.mrb[28].mxu0  ;;  %v1699_v14 = vadd.f32 %v3620_v24, %v1638_v63  ;;  %3003 = vtanh.f32 %v1698_v3 }
 0x140   : > { %1948 = vst.msk [vmem:[%s3654_s15 + $0x24] sm:$0xf] %vm1938_vm1, %v2529_v18  ;;  %v1756_v20 = vld [vmem:[#allocation2 + $0x50] sm:$0xff]  ;;  %v2724_v35 = vpop.f32.mrb[28].mxu1  ;;  %v2613_v60 = vpop.f32.mrb[29].mxu0 }
 0x141   : > { %2140 = vst.msk [vmem:[%s3650_s26 + $0x48] sm:$0xff] %vm413_vm0, %v2108_v26  ;;  %v1788_v34 = vmul.f32 %v2992_v16, %v1756_v20  ;;  %v1757_v37 = vld [vmem:[#allocation2 + $0x58] sm:$0xff]  ;;  %1490 = vst.msk [vmem:[#allocation2 + $0x60] sm:$0xff] %vm413_vm0, %v1457_v30  ;;  %v1458_v38 = vadd.f32 %v1370_v31, %v528_v27  ;;  %v2614_v39 = vadd.f32 %v2613_v60, %v2612_v32  ;;  %v2725_v40 = vpop.f32.mrb[29].mxu1  ;;  %v2615_v48 = vpop.f32.mrb[30].mxu0  ;;  %v3037_v26 = vld [vmem:[%s3405_s13 + $0x60] sm:$0xff]  ;;  %3005 = vtanh.f32 %v1699_v14 }
 0x142   : > { %v1789_v45 = vmul.f32 %v2994_v55, %v1757_v37  ;;  %v2727_v46 = vpop.f32.mrb[30].mxu1  ;;  %v2616_v47 = vpop.f32.mrb[31].mxu0  ;;  %v2726_v50 = vadd.f32 %v2725_v40, %v2724_v35  ;;  %v531_v20 = vld [vmem:[#allocation2 + $0x80] sm:$0xff]  ;;  %v3038_v37 = vld [vmem:[%s3405_s13 + $0x68] sm:$0xff] }
 0x143   : > { %v2530_v42 = vpack.c.bf16 %v1788_v34, %v1788_v34  ;;  %v1981_v8 = vadd.f32 %v3035_v43, %v1788_v34  ;;  %v2077_v44 = vadd.f32 %v2045_v29, %v1788_v34  ;;  %1491 = vst.msk [vmem:[#allocation2 + $0x68] sm:$0xff] %vm413_vm0, %v1458_v38  ;;  %v2617_v51 = vadd.f32 %v2616_v47, %v2615_v48  ;;  %v2728_v52 = vpop.f32.mrb[31].mxu1  ;;  %v2996_v61 = vpop.eup %2995  ;;  %v532_v40 = vld [vmem:[#allocation2 + $0x88] sm:$0xff] }
 0x144   : > { %v2531_v56 = vpack.c.bf16 %v1789_v45, %v1789_v45  ;;  %v1982_v11 = vadd.f32 %v3036_v57, %v1789_v45  ;;  %v2078_v58 = vadd.f32 %v2046_v36, %v1789_v45  ;;  %v1375_v49 = vadd.f32 %v2726_v50, %v2614_v39  ;;  %v2998_v7 = vpop.eup %2997  ;;  %v1641_v31 = vpop.xlane.xlu0 %1640 }
 0x145   : > { %1949 = vst.msk [vmem:[%s3654_s15 + $0x28] sm:$0xf] %vm1938_vm1, %v2530_v42  ;;  %v2109_v54 = vmul.f32 0.25, %v2077_v44  ;;  %v2729_v62 = vadd.f32 %v2728_v52, %v2727_v46  ;;  %v3000_v35 = vpop.eup %2999  ;;  %v1644_v48 = vpop.xlane.xlu1 %1643  ;;  %v1700_v43 = vadd.f32 %v3620_v24, %v1641_v31  ;;  %v2049_v46 = vld [vmem:[%s3635_s23 + $0x70] sm:$0xff] }
 0x146   : > { %2013 = vst.msk [vmem:[%s3660_s17 + $0x50] sm:$0xff] %vm413_vm0, %v1981_v8  ;;  %2014 = vst.msk [vmem:[%s3660_s17 + $0x58] sm:$0xff] %vm413_vm0, %v1982_v11  ;;  %v2110_v0 = vmul.f32 0.25, %v2078_v58  ;;  %v1459_v1 = vadd.f32 %v1375_v49, %v529_v59  ;;  %v1701_v53 = vadd.f32 %v3620_v24, %v1644_v48  ;;  %v2050_v58 = vld [vmem:[%s3635_s23 + $0x78] sm:$0xff] }
 0x147   : > { %2141 = vst.msk [vmem:[%s3650_s26 + $0x50] sm:$0xff] %vm413_vm0, %v2109_v54  ;;  %v1378_v4 = vadd.f32 %v2729_v62, %v2617_v51  ;;  %v2618_v6 = vpop.f32.mrb[32].mxu0  ;;  %v3002_v45 = vpop.eup %3001  ;;  %3007 = vtanh.f32 %v1700_v43 }
 0x148   : > { %1950 = vst.msk [vmem:[%s3654_s15 + $0x2c] sm:$0xf] %vm1938_vm1, %v2531_v56  ;;  %v1758_v10 = vld [vmem:[#allocation2 + $0x60] sm:$0xff]  ;;  %v2730_v12 = vpop.f32.mrb[32].mxu1  ;;  %v2619_v13 = vpop.f32.mrb[33].mxu0  ;;  %3009 = vtanh.f32 %v1701_v53 }
 0x149   : > { %2142 = vst.msk [vmem:[%s3650_s26 + $0x58] sm:$0xff] %vm413_vm0, %v2110_v0  ;;  %v1790_v15 = vmul.f32 %v2996_v61, %v1758_v10  ;;  %1492 = vst.msk [vmem:[#allocation2 + $0x70] sm:$0xff] %vm413_vm0, %v1459_v1  ;;  %v1460_v16 = vadd.f32 %v1378_v4, %v530_v2  ;;  %v2620_v17 = vadd.f32 %v2619_v13, %v2618_v6  ;;  %v2731_v18 = vpop.f32.mrb[33].mxu1  ;;  %v2621_v19 = vpop.f32.mrb[34].mxu0  ;;  %v3039_v0 = vld [vmem:[%s3405_s13 + $0x70] sm:$0xff]  ;;  %v535_v53 = vld [vmem:[#allocation2 + $0xa0] sm:$0xff] }
 0x14a   : > { %v1759_v21 = vld [vmem:[#allocation2 + $0x68] sm:$0xff]  ;;  %v2732_v22 = vadd.f32 %v2731_v18, %v2730_v12  ;;  %v2733_v23 = vpop.f32.mrb[34].mxu1  ;;  %v2622_v25 = vpop.f32.mrb[35].mxu0  ;;  %v533_v4 = vld [vmem:[#allocation2 + $0x90] sm:$0xff] }
 0x14b   : > { %v2532_v55 = vpack.c.bf16 %v1790_v15, %v1790_v15  ;;  %v1983_v27 = vadd.f32 %v3037_v26, %v1790_v15  ;;  %v2079_v28 = vadd.f32 %v2047_v9, %v1790_v15  ;;  %v1791_v29 = vmul.f32 %v2998_v7, %v1759_v21  ;;  %1493 = vst.msk [vmem:[#allocation2 + $0x78] sm:$0xff] %vm413_vm0, %v1460_v16  ;;  %v2734_v30 = vpop.f32.mrb[35].mxu1  ;;  %v3004_v7 = vpop.eup %3003  ;;  %v3040_v16 = vld [vmem:[%s3405_s13 + $0x78] sm:$0xff] }
 0x14c   : > { %v1383_v32 = vadd.f32 %v2732_v22, %v2620_v17  ;;  %v2623_v33 = vadd.f32 %v2622_v25, %v2621_v19  ;;  %v2735_v34 = vadd.f32 %v2734_v30, %v2733_v23  ;;  %v1647_v13 = vpop.xlane.xlu0 %1646  ;;  %v534_v19 = vld [vmem:[#allocation2 + $0x98] sm:$0xff]  ;;  %v1650_v23 = vpop.xlane.xlu1 %1649 }
 0x14d   : > { %1951 = vst.msk [vmem:[%s3654_s15 + $0x30] sm:$0xf] %vm1938_vm1, %v2532_v55  ;;  %v2111_v60 = vmul.f32 0.25, %v2079_v28  ;;  %v2533_v36 = vpack.c.bf16 %v1791_v29, %v1791_v29  ;;  %v1984_v38 = vadd.f32 %v3038_v37, %v1791_v29  ;;  %v2080_v39 = vadd.f32 %v2048_v5, %v1791_v29  ;;  %v3006_v5 = vpop.eup %3005  ;;  %v2051_v55 = vld [vmem:[%s3635_s23 + $0x80] sm:$0xff] }
 0x14e   : > { %2015 = vst.msk [vmem:[%s3660_s17 + $0x60] sm:$0xff] %vm413_vm0, %v1983_v27  ;;  %v1461_v41 = vadd.f32 %v1383_v32, %v531_v20  ;;  %v1386_v42 = vadd.f32 %v2735_v34, %v2623_v33  ;;  %v1702_v28 = vadd.f32 %v3620_v24, %v1647_v13  ;;  %v2052_v32 = vld [vmem:[%s3635_s23 + $0x88] sm:$0xff] }
 0x14f   : > { %2143 = vst.msk [vmem:[%s3650_s26 + $0x60] sm:$0xff] %vm413_vm0, %v2111_v60  ;;  %2016 = vst.msk [vmem:[%s3660_s17 + $0x68] sm:$0xff] %vm413_vm0, %v1984_v38  ;;  %v2112_v8 = vmul.f32 0.25, %v2080_v39  ;;  %v2624_v44 = vpop.f32.mrb[36].mxu0  ;;  %v3041_v38 = vld [vmem:[%s3405_s13 + $0x80] sm:$0xff] }
 0x150   : > { %1952 = vst.msk [vmem:[%s3654_s15 + $0x34] sm:$0xf] %vm1938_vm1, %v2533_v36  ;;  %v1760_v47 = vld [vmem:[#allocation2 + $0x70] sm:$0xff]  ;;  %v1462_v50 = vadd.f32 %v1386_v42, %v532_v40  ;;  %v2736_v51 = vpop.f32.mrb[36].mxu1  ;;  %v2625_v52 = vpop.f32.mrb[37].mxu0  ;;  %v1703_v36 = vadd.f32 %v3620_v24, %v1650_v23  ;;  %3011 = vtanh.f32 %v1702_v28 }
 0x151   : > { %1494 = vst.msk [vmem:[#allocation2 + $0x80] sm:$0xff] %vm413_vm0, %v1461_v41  ;;  %2144 = vst.msk [vmem:[%s3650_s26 + $0x68] sm:$0xff] %vm413_vm0, %v2112_v8  ;;  %v1792_v54 = vmul.f32 %v3000_v35, %v1760_v47  ;;  %v2626_v56 = vadd.f32 %v2625_v52, %v2624_v44  ;;  %v2737_v57 = vpop.f32.mrb[37].mxu1  ;;  %v2627_v11 = vpop.f32.mrb[38].mxu0 }
 0x152   : > { %v1761_v59 = vld [vmem:[#allocation2 + $0x78] sm:$0xff]  ;;  %1495 = vst.msk [vmem:[#allocation2 + $0x88] sm:$0xff] %vm413_vm0, %v1462_v50  ;;  %v2738_v61 = vadd.f32 %v2737_v57, %v2736_v51  ;;  %v2739_v49 = vpop.f32.mrb[38].mxu1  ;;  %v2628_v62 = vpop.f32.mrb[39].mxu0  ;;  %v3042_v50 = vld [vmem:[%s3405_s13 + $0x88] sm:$0xff]  ;;  %3013 = vtanh.f32 %v1703_v36 }
 0x153   : > { %v2534_v63 = vpack.c.bf16 %v1792_v54, %v1792_v54  ;;  %v1985_v2 = vadd.f32 %v3039_v0, %v1792_v54  ;;  %v2081_v3 = vadd.f32 %v2049_v46, %v1792_v54  ;;  %v1793_v1 = vmul.f32 %v3002_v45, %v1761_v59  ;;  %v2740_v6 = vpop.f32.mrb[39].mxu1  ;;  %v3008_v45 = vpop.eup %3007  ;;  %v536_v59 = vld [vmem:[#allocation2 + $0xa8] sm:$0xff]  ;;  %v538_v36 = vld [vmem:[#allocation2 + $0xb8] sm:$0xff] }
 0x154   : > { %v1391_v9 = vadd.f32 %v2738_v61, %v2626_v56  ;;  %v2629_v10 = vadd.f32 %v2628_v62, %v2627_v11  ;;  %v2741_v12 = vadd.f32 %v2740_v6, %v2739_v49  ;;  %v1653_v54 = vpop.xlane.xlu0 %1652  ;;  %v3010_v11 = vpop.eup %3009  ;;  %v2053_v49 = vld [vmem:[%s3635_s23 + $0x90] sm:$0xff] }
 0x155   : > { %1953 = vst.msk [vmem:[%s3654_s15 + $0x38] sm:$0xf] %vm1938_vm1, %v2534_v63  ;;  %v2113_v14 = vmul.f32 0.25, %v2081_v3  ;;  %v2535_v15 = vpack.c.bf16 %v1793_v1, %v1793_v1  ;;  %v1986_v17 = vadd.f32 %v3040_v16, %v1793_v1  ;;  %v2082_v18 = vadd.f32 %v2050_v58, %v1793_v1  ;;  %v1656_v61 = vpop.xlane.xlu1 %1655 }
 0x156   : > { %2017 = vst.msk [vmem:[%s3660_s17 + $0x70] sm:$0xff] %vm413_vm0, %v1985_v2  ;;  %v1463_v21 = vadd.f32 %v1391_v9, %v533_v4  ;;  %v1394_v22 = vadd.f32 %v2741_v12, %v2629_v10  ;;  %v1704_v3 = vadd.f32 %v3620_v24, %v1653_v54 }
 0x157   : > { %2145 = vst.msk [vmem:[%s3650_s26 + $0x70] sm:$0xff] %vm413_vm0, %v2113_v14  ;;  %2018 = vst.msk [vmem:[%s3660_s17 + $0x78] sm:$0xff] %vm413_vm0, %v1986_v17  ;;  %v2114_v25 = vmul.f32 0.25, %v2082_v18  ;;  %v2630_v27 = vpop.f32.mrb[40].mxu0  ;;  %v3043_v17 = vld [vmem:[%s3405_s13 + $0x90] sm:$0xff] }
 0x158   : > { %1954 = vst.msk [vmem:[%s3654_s15 + $0x3c] sm:$0xf] %vm1938_vm1, %v2535_v15  ;;  %v1762_v26 = vld [vmem:[#allocation2 + $0x80] sm:$0xff]  ;;  %v1464_v20 = vadd.f32 %v1394_v22, %v534_v19  ;;  %v2742_v30 = vpop.f32.mrb[40].mxu1  ;;  %v2631_v31 = vpop.f32.mrb[41].mxu0  ;;  %v1705_v15 = vadd.f32 %v3620_v24, %v1656_v61  ;;  %3015 = vtanh.f32 %v1704_v3 }
 0x159   : > { %v1794_v29 = vmul.f32 %v3004_v7, %v1762_v26  ;;  %1496 = vst.msk [vmem:[#allocation2 + $0x90] sm:$0xff] %vm413_vm0, %v1463_v21  ;;  %2146 = vst.msk [vmem:[%s3650_s26 + $0x78] sm:$0xff] %vm413_vm0, %v2114_v25  ;;  %v1763_v33 = vld [vmem:[#allocation2 + $0x88] sm:$0xff]  ;;  %v2632_v34 = vadd.f32 %v2631_v31, %v2630_v27  ;;  %v2743_v35 = vpop.f32.mrb[41].mxu1  ;;  %v2633_v60 = vpop.f32.mrb[42].mxu0  ;;  %v2054_v7 = vld [vmem:[%s3635_s23 + $0x98] sm:$0xff] }
 0x15a   : > { %v1795_v48 = vmul.f32 %v3006_v5, %v1763_v33  ;;  %1497 = vst.msk [vmem:[#allocation2 + $0x98] sm:$0xff] %vm413_vm0, %v1464_v20  ;;  %v2745_v41 = vpop.f32.mrb[42].mxu1  ;;  %v2634_v42 = vpop.f32.mrb[43].mxu0  ;;  %v2744_v43 = vadd.f32 %v2743_v35, %v2742_v30  ;;  %v537_v31 = vld [vmem:[#allocation2 + $0xb0] sm:$0xff]  ;;  %3017 = vtanh.f32 %v1705_v15 }
 0x15b   : > { %v2536_v37 = vpack.c.bf16 %v1794_v29, %v1794_v29  ;;  %v1987_v39 = vadd.f32 %v3041_v38, %v1794_v29  ;;  %v2083_v40 = vadd.f32 %v2051_v55, %v1794_v29  ;;  %v2635_v8 = vadd.f32 %v2634_v42, %v2633_v60  ;;  %v2746_v44 = vpop.f32.mrb[43].mxu1  ;;  %v1659_v26 = vpop.xlane.xlu0 %1658  ;;  %v3044_v29 = vld [vmem:[%s3405_s13 + $0x98] sm:$0xff] }
 0x15c   : > { %v2537_v47 = vpack.c.bf16 %v1795_v48, %v1795_v48  ;;  %v1988_v51 = vadd.f32 %v3042_v50, %v1795_v48  ;;  %v2084_v52 = vadd.f32 %v2052_v32, %v1795_v48  ;;  %v1399_v56 = vadd.f32 %v2744_v43, %v2632_v34  ;;  %v3012_v32 = vpop.eup %3011  ;;  %v1662_v35 = vpop.xlane.xlu1 %1661 }
 0x15d   : > { %1955 = vst.msk [vmem:[%s3654_s15 + $0x40] sm:$0xf] %vm1938_vm1, %v2536_v37  ;;  %v2115_v46 = vmul.f32 0.25, %v2083_v40  ;;  %v2747_v57 = vadd.f32 %v2746_v44, %v2745_v41  ;;  %v1706_v37 = vadd.f32 %v3620_v24, %v1659_v26  ;;  %v3014_v48 = vpop.eup %3013  ;;  %v2055_v41 = vld [vmem:[%s3635_s23 + $0xa0] sm:$0xff]  ;;  %v1707_v44 = vadd.f32 %v3620_v24, %v1662_v35 }
 0x15e   : > { %2019 = vst.msk [vmem:[%s3660_s17 + $0x80] sm:$0xff] %vm413_vm0, %v1987_v39  ;;  %2020 = vst.msk [vmem:[%s3660_s17 + $0x88] sm:$0xff] %vm413_vm0, %v1988_v51  ;;  %v2116_v58 = vmul.f32 0.25, %v2084_v52  ;;  %v1465_v63 = vadd.f32 %v1399_v56, %v535_v53  ;;  %v2056_v52 = vld [vmem:[%s3635_s23 + $0xa8] sm:$0xff] }
 0x15f   : > { %2147 = vst.msk [vmem:[%s3650_s26 + $0x80] sm:$0xff] %vm413_vm0, %v2115_v46  ;;  %v1402_v0 = vadd.f32 %v2747_v57, %v2635_v8  ;;  %v2636_v2 = vpop.f32.mrb[44].mxu0  ;;  %3019 = vtanh.f32 %v1706_v37 }
 0x160   : > { %1956 = vst.msk [vmem:[%s3654_s15 + $0x44] sm:$0xf] %vm1938_vm1, %v2537_v47  ;;  %v1764_v62 = vld [vmem:[#allocation2 + $0x90] sm:$0xff]  ;;  %v2748_v4 = vpop.f32.mrb[44].mxu1  ;;  %v2637_v6 = vpop.f32.mrb[45].mxu0  ;;  %3021 = vtanh.f32 %v1707_v44 }
 0x161   : > { %2148 = vst.msk [vmem:[%s3650_s26 + $0x88] sm:$0xff] %vm413_vm0, %v2116_v58  ;;  %v1796_v1 = vmul.f32 %v3008_v45, %v1764_v62  ;;  %v1765_v9 = vld [vmem:[#allocation2 + $0x98] sm:$0xff]  ;;  %1498 = vst.msk [vmem:[#allocation2 + $0xa0] sm:$0xff] %vm413_vm0, %v1465_v63  ;;  %v1466_v10 = vadd.f32 %v1402_v0, %v536_v59  ;;  %v2638_v12 = vadd.f32 %v2637_v6, %v2636_v2  ;;  %v2749_v13 = vpop.f32.mrb[45].mxu1  ;;  %v2639_v14 = vpop.f32.mrb[46].mxu0  ;;  %v3045_v58 = vld [vmem:[%s3405_s13 + $0xa0] sm:$0xff] }
 0x162   : > { %v1797_v5 = vmul.f32 %v3010_v11, %v1765_v9  ;;  %v2751_v21 = vpop.f32.mrb[46].mxu1  ;;  %v2640_v22 = vpop.f32.mrb[47].mxu0  ;;  %v2750_v23 = vadd.f32 %v2749_v13, %v2748_v4  ;;  %v539_v62 = vld [vmem:[#allocation2 + $0xc0] sm:$0xff]  ;;  %v3046_v9 = vld [vmem:[%s3405_s13 + $0xa8] sm:$0xff] }
 0x163   : > { %v2538_v16 = vpack.c.bf16 %v1796_v1, %v1796_v1  ;;  %v1989_v18 = vadd.f32 %v3043_v17, %v1796_v1  ;;  %v2085_v19 = vadd.f32 %v2053_v49, %v1796_v1  ;;  %1499 = vst.msk [vmem:[#allocation2 + $0xa8] sm:$0xff] %vm413_vm0, %v1466_v10  ;;  %v2641_v25 = vadd.f32 %v2640_v22, %v2639_v14  ;;  %v2752_v55 = vpop.f32.mrb[47].mxu1  ;;  %v1665_v0 = vpop.xlane.xlu0 %1664  ;;  %v540_v13 = vld [vmem:[#allocation2 + $0xc8] sm:$0xff] }
 0x164   : > { %v2539_v28 = vpack.c.bf16 %v1797_v5, %v1797_v5  ;;  %v1990_v20 = vadd.f32 %v3044_v29, %v1797_v5  ;;  %v2086_v30 = vadd.f32 %v2054_v7, %v1797_v5  ;;  %v1407_v33 = vadd.f32 %v2750_v23, %v2638_v12  ;;  %v3016_v4 = vpop.eup %3015  ;;  %v1668_v14 = vpop.xlane.xlu1 %1667 }
 0x165   : > { %1957 = vst.msk [vmem:[%s3654_s15 + $0x48] sm:$0xf] %vm1938_vm1, %v2538_v16  ;;  %v2117_v27 = vmul.f32 0.25, %v2085_v19  ;;  %v2753_v34 = vadd.f32 %v2752_v55, %v2751_v21  ;;  %v1708_v17 = vadd.f32 %v3620_v24, %v1665_v0  ;;  %v3018_v5 = vpop.eup %3017  ;;  %v2057_v21 = vld [vmem:[%s3635_s23 + $0xb0] sm:$0xff]  ;;  %v1709_v26 = vadd.f32 %v3620_v24, %v1668_v14 }
 0x166   : > { %2021 = vst.msk [vmem:[%s3660_s17 + $0x90] sm:$0xff] %vm413_vm0, %v1989_v18  ;;  %2022 = vst.msk [vmem:[%s3660_s17 + $0x98] sm:$0xff] %vm413_vm0, %v1990_v20  ;;  %v2118_v60 = vmul.f32 0.25, %v2086_v30  ;;  %v1467_v38 = vadd.f32 %v1407_v33, %v537_v31  ;;  %v2058_v30 = vld [vmem:[%s3635_s23 + $0xb8] sm:$0xff] }
 0x167   : > { %2149 = vst.msk [vmem:[%s3650_s26 + $0x90] sm:$0xff] %vm413_vm0, %v2117_v27  ;;  %v1410_v39 = vadd.f32 %v2753_v34, %v2641_v25  ;;  %v2642_v40 = vpop.f32.mrb[48].mxu0  ;;  %3023 = vtanh.f32 %v1708_v17 }
 0x168   : > { %1958 = vst.msk [vmem:[%s3654_s15 + $0x4c] sm:$0xf] %vm1938_vm1, %v2539_v28  ;;  %v1766_v42 = vld [vmem:[#allocation2 + $0xa0] sm:$0xff]  ;;  %v2754_v43 = vpop.f32.mrb[48].mxu1  ;;  %v2643_v8 = vpop.f32.mrb[49].mxu0  ;;  %3025 = vtanh.f32 %v1709_v26 }
 0x169   : > { %2150 = vst.msk [vmem:[%s3650_s26 + $0x98] sm:$0xff] %vm413_vm0, %v2118_v60  ;;  %v1798_v45 = vmul.f32 %v3012_v32, %v1766_v42  ;;  %1500 = vst.msk [vmem:[#allocation2 + $0xb0] sm:$0xff] %vm413_vm0, %v1467_v38  ;;  %v1468_v46 = vadd.f32 %v1410_v39, %v538_v36  ;;  %v2644_v47 = vadd.f32 %v2643_v8, %v2642_v40  ;;  %v2755_v50 = vpop.f32.mrb[49].mxu1  ;;  %v2645_v51 = vpop.f32.mrb[50].mxu0  ;;  %v3047_v60 = vld [vmem:[%s3405_s13 + $0xb0] sm:$0xff]  ;;  %v543_v26 = vld [vmem:[#allocation2 + $0xe0] sm:$0xff] }
 0x16a   : > { %v1767_v53 = vld [vmem:[#allocation2 + $0xa8] sm:$0xff]  ;;  %v2756_v54 = vadd.f32 %v2755_v50, %v2754_v43  ;;  %v2757_v56 = vpop.f32.mrb[50].mxu1  ;;  %v2646_v57 = vpop.f32.mrb[51].mxu0  ;;  %v541_v39 = vld [vmem:[#allocation2 + $0xd0] sm:$0xff] }
 0x16b   : > { %v2540_v11 = vpack.c.bf16 %v1798_v45, %v1798_v45  ;;  %v1991_v59 = vadd.f32 %v3045_v58, %v1798_v45  ;;  %v2087_v61 = vadd.f32 %v2055_v41, %v1798_v45  ;;  %v1799_v49 = vmul.f32 %v3014_v48, %v1767_v53  ;;  %1501 = vst.msk [vmem:[#allocation2 + $0xb8] sm:$0xff] %vm413_vm0, %v1468_v46  ;;  %v2758_v63 = vpop.f32.mrb[51].mxu1  ;;  %v3020_v48 = vpop.eup %3019  ;;  %v3048_v46 = vld [vmem:[%s3405_s13 + $0xb8] sm:$0xff] }
 0x16c   : > { %v1415_v2 = vadd.f32 %v2756_v54, %v2644_v47  ;;  %v2647_v3 = vadd.f32 %v2646_v57, %v2645_v51  ;;  %v2759_v1 = vadd.f32 %v2758_v63, %v2757_v56  ;;  %v1671_v8 = vpop.xlane.xlu0 %1670  ;;  %v542_v51 = vld [vmem:[#allocation2 + $0xd8] sm:$0xff]  ;;  %v1674_v56 = vpop.xlane.xlu1 %1673 }
 0x16d   : > { %1959 = vst.msk [vmem:[%s3654_s15 + $0x50] sm:$0xf] %vm1938_vm1, %v2540_v11  ;;  %v2119_v6 = vmul.f32 0.25, %v2087_v61  ;;  %v2541_v7 = vpack.c.bf16 %v1799_v49, %v1799_v49  ;;  %v1992_v10 = vadd.f32 %v3046_v9, %v1799_v49  ;;  %v2088_v12 = vadd.f32 %v2056_v52, %v1799_v49  ;;  %v3022_v52 = vpop.eup %3021  ;;  %v2059_v11 = vld [vmem:[%s3635_s23 + $0xc0] sm:$0xff] }
 0x16e   : > { %2023 = vst.msk [vmem:[%s3660_s17 + $0xa0] sm:$0xff] %vm413_vm0, %v1991_v59  ;;  %v1469_v15 = vadd.f32 %v1415_v2, %v539_v62  ;;  %v1418_v16 = vadd.f32 %v2759_v1, %v2647_v3  ;;  %v1710_v61 = vadd.f32 %v3620_v24, %v1671_v8  ;;  %v2060_v2 = vld [vmem:[%s3635_s23 + $0xc8] sm:$0xff] }
 0x16f   : > { %2151 = vst.msk [vmem:[%s3650_s26 + $0xa0] sm:$0xff] %vm413_vm0, %v2119_v6  ;;  %2024 = vst.msk [vmem:[%s3660_s17 + $0xa8] sm:$0xff] %vm413_vm0, %v1992_v10  ;;  %v2120_v18 = vmul.f32 0.25, %v2088_v12  ;;  %v2648_v19 = vpop.f32.mrb[52].mxu0  ;;  %v3049_v10 = vld [vmem:[%s3405_s13 + $0xc0] sm:$0xff] }
 0x170   : > { %1960 = vst.msk [vmem:[%s3654_s15 + $0x54] sm:$0xf] %vm1938_vm1, %v2541_v7  ;;  %v1768_v22 = vld [vmem:[#allocation2 + $0xb0] sm:$0xff]  ;;  %v1470_v23 = vadd.f32 %v1418_v16, %v540_v13  ;;  %v2760_v25 = vpop.f32.mrb[52].mxu1  ;;  %v2649_v55 = vpop.f32.mrb[53].mxu0  ;;  %v1711_v7 = vadd.f32 %v3620_v24, %v1674_v56  ;;  %3027 = vtanh.f32 %v1710_v61 }
 0x171   : > { %1502 = vst.msk [vmem:[#allocation2 + $0xc0] sm:$0xff] %vm413_vm0, %v1469_v15  ;;  %2152 = vst.msk [vmem:[%s3650_s26 + $0xa8] sm:$0xff] %vm413_vm0, %v2120_v18  ;;  %v1800_v27 = vmul.f32 %v3016_v4, %v1768_v22  ;;  %v2650_v28 = vadd.f32 %v2649_v55, %v2648_v19  ;;  %v2761_v29 = vpop.f32.mrb[53].mxu1  ;;  %v2651_v20 = vpop.f32.mrb[54].mxu0 }
 0x172   : > { %v1769_v31 = vld [vmem:[#allocation2 + $0xb8] sm:$0xff]  ;;  %1503 = vst.msk [vmem:[#allocation2 + $0xc8] sm:$0xff] %vm413_vm0, %v1470_v23  ;;  %v2762_v32 = vadd.f32 %v2761_v29, %v2760_v25  ;;  %v2763_v33 = vpop.f32.mrb[54].mxu1  ;;  %v2652_v34 = vpop.f32.mrb[55].mxu0  ;;  %v3050_v23 = vld [vmem:[%s3405_s13 + $0xc8] sm:$0xff]  ;;  %3029 = vtanh.f32 %v1711_v7 }
 0x173   : > { %v2542_v35 = vpack.c.bf16 %v1800_v27, %v1800_v27  ;;  %v1993_v36 = vadd.f32 %v3047_v60, %v1800_v27  ;;  %v2089_v37 = vadd.f32 %v2057_v21, %v1800_v27  ;;  %v1801_v38 = vmul.f32 %v3018_v5, %v1769_v31  ;;  %v2764_v40 = vpop.f32.mrb[55].mxu1  ;;  %v3024_v5 = vpop.eup %3023  ;;  %v544_v31 = vld [vmem:[#allocation2 + $0xe8] sm:$0xff] }
 0x174   : > { %v1423_v41 = vadd.f32 %v2762_v32, %v2650_v28  ;;  %v2653_v42 = vadd.f32 %v2652_v34, %v2651_v20  ;;  %v2765_v43 = vadd.f32 %v2764_v40, %v2763_v33  ;;  %v1677_v27 = vpop.xlane.xlu0 %1676  ;;  %v3026_v20 = vpop.eup %3025  ;;  %v2061_v33 = vld [vmem:[%s3635_s23 + $0xd0] sm:$0xff] }
 0x175   : > { %1961 = vst.msk [vmem:[%s3654_s15 + $0x58] sm:$0xf] %vm1938_vm1, %v2542_v35  ;;  %v2121_v44 = vmul.f32 0.25, %v2089_v37  ;;  %v2543_v45 = vpack.c.bf16 %v1801_v38, %v1801_v38  ;;  %v1994_v47 = vadd.f32 %v3048_v46, %v1801_v38  ;;  %v2090_v50 = vadd.f32 %v2058_v30, %v1801_v38  ;;  %v1680_v32 = vpop.xlane.xlu1 %1679 }
 0x176   : > { %2025 = vst.msk [vmem:[%s3660_s17 + $0xb0] sm:$0xff] %vm413_vm0, %v1993_v36  ;;  %v1471_v53 = vadd.f32 %v1423_v41, %v541_v39  ;;  %v1426_v54 = vadd.f32 %v2765_v43, %v2653_v42  ;;  %v1712_v37 = vadd.f32 %v3620_v24, %v1677_v27 }
 0x177   : > { %2153 = vst.msk [vmem:[%s3650_s26 + $0xb0] sm:$0xff] %vm413_vm0, %v2121_v44  ;;  %2026 = vst.msk [vmem:[%s3660_s17 + $0xb8] sm:$0xff] %vm413_vm0, %v1994_v47  ;;  %v2122_v57 = vmul.f32 0.25, %v2090_v50  ;;  %v2654_v59 = vpop.f32.mrb[56].mxu0  ;;  %v3051_v47 = vld [vmem:[%s3405_s13 + $0xd0] sm:$0xff] }
 0x178   : > { %1962 = vst.msk [vmem:[%s3654_s15 + $0x5c] sm:$0xf] %vm1938_vm1, %v2543_v45  ;;  %v1770_v58 = vld [vmem:[#allocation2 + $0xc0] sm:$0xff]  ;;  %v1472_v62 = vadd.f32 %v1426_v54, %v542_v51  ;;  %v2766_v63 = vpop.f32.mrb[56].mxu1  ;;  %v2655_v0 = vpop.f32.mrb[57].mxu0  ;;  %v1713_v45 = vadd.f32 %v3620_v24, %v1680_v32  ;;  %3031 = vtanh.f32 %v1712_v37 }
 0x179   : > { %v1802_v49 = vmul.f32 %v3020_v48, %v1770_v58  ;;  %1504 = vst.msk [vmem:[#allocation2 + $0xd0] sm:$0xff] %vm413_vm0, %v1471_v53  ;;  %2154 = vst.msk [vmem:[%s3650_s26 + $0xb8] sm:$0xff] %vm413_vm0, %v2122_v57  ;;  %v1771_v3 = vld [vmem:[#allocation2 + $0xc8] sm:$0xff]  ;;  %v2656_v1 = vadd.f32 %v2655_v0, %v2654_v59  ;;  %v2767_v4 = vpop.f32.mrb[57].mxu1  ;;  %v2657_v6 = vpop.f32.mrb[58].mxu0  ;;  %v2062_v48 = vld [vmem:[%s3635_s23 + $0xd8] sm:$0xff] }
 0x17a   : > { %v1803_v14 = vmul.f32 %v3022_v52, %v1771_v3  ;;  %1505 = vst.msk [vmem:[#allocation2 + $0xd8] sm:$0xff] %vm413_vm0, %v1472_v62  ;;  %v2769_v15 = vpop.f32.mrb[58].mxu1  ;;  %v2658_v16 = vpop.f32.mrb[59].mxu0  ;;  %v2768_v17 = vadd.f32 %v2767_v4, %v2766_v63  ;;  %v3052_v59 = vld [vmem:[%s3405_s13 + $0xd8] sm:$0xff]  ;;  %v545_v62 = vld [vmem:[#allocation2 + $0xf0] sm:$0xff]  ;;  %3033 = vtanh.f32 %v1713_v45 }
 0x17b   : > { %v2544_v9 = vpack.c.bf16 %v1802_v49, %v1802_v49  ;;  %v1995_v12 = vadd.f32 %v3049_v10, %v1802_v49  ;;  %v2091_v13 = vadd.f32 %v2059_v11, %v1802_v49  ;;  %v2659_v18 = vadd.f32 %v2658_v16, %v2657_v6  ;;  %v2770_v19 = vpop.f32.mrb[59].mxu1  ;;  %v3028_v63 = vpop.eup %3027 }
 0x17c   : > { %v2545_v22 = vpack.c.bf16 %v1803_v14, %v1803_v14  ;;  %v1996_v25 = vadd.f32 %v3050_v23, %v1803_v14  ;;  %v2092_v55 = vadd.f32 %v2060_v2, %v1803_v14  ;;  %v1431_v28 = vadd.f32 %v2768_v17, %v2656_v1  ;;  %v546_v1 = vld [vmem:[#allocation2 + $0xf8] sm:$0xff]  ;;  %v3030_v7 = vpop.eup %3029  ;;  %v2064_v14 = vld [vmem:[%s3635_s23 + $0xe8] sm:$0xff]  ;;  %v3053_v17 = vld [vmem:[%s3405_s13 + $0xe0] sm:$0xff] }
 0x17d   : > { %1963 = vst.msk [vmem:[%s3654_s15 + $0x60] sm:$0xf] %vm1938_vm1, %v2544_v9  ;;  %v2123_v21 = vmul.f32 0.25, %v2091_v13  ;;  %v2771_v29 = vadd.f32 %v2770_v19, %v2769_v15  ;;  %v2063_v9 = vld [vmem:[%s3635_s23 + $0xe0] sm:$0xff] }
 0x17e   : > { %2027 = vst.msk [vmem:[%s3660_s17 + $0xc0] sm:$0xff] %vm413_vm0, %v1995_v12  ;;  %2028 = vst.msk [vmem:[%s3660_s17 + $0xc8] sm:$0xff] %vm413_vm0, %v1996_v25  ;;  %v2124_v30 = vmul.f32 0.25, %v2092_v55  ;;  %v1473_v35 = vadd.f32 %v1431_v28, %v543_v26  ;;  %v3054_v25 = vld [vmem:[%s3405_s13 + $0xe8] sm:$0xff] }
 0x17f   : > { %2155 = vst.msk [vmem:[%s3650_s26 + $0xc0] sm:$0xff] %vm413_vm0, %v2123_v21  ;;  %v1434_v60 = vadd.f32 %v2771_v29, %v2659_v18  ;;  %v2660_v36 = vpop.f32.mrb[60].mxu0  ;;  %v2065_v29 = vld [vmem:[%s3635_s23 + $0xf0] sm:$0xff] }
 0x180   : > { %1964 = vst.msk [vmem:[%s3654_s15 + $0x64] sm:$0xf] %vm1938_vm1, %v2545_v22  ;;  %v1772_v34 = vld [vmem:[#allocation2 + $0xd0] sm:$0xff]  ;;  %v2772_v39 = vpop.f32.mrb[60].mxu1  ;;  %v2661_v40 = vpop.f32.mrb[61].mxu0 }
 0x181   : > { %2156 = vst.msk [vmem:[%s3650_s26 + $0xc8] sm:$0xff] %vm413_vm0, %v2124_v30  ;;  %v1804_v38 = vmul.f32 %v3024_v5, %v1772_v34  ;;  %v1773_v41 = vld [vmem:[#allocation2 + $0xd8] sm:$0xff]  ;;  %1506 = vst.msk [vmem:[#allocation2 + $0xe0] sm:$0xff] %vm413_vm0, %v1473_v35  ;;  %v1474_v42 = vadd.f32 %v1434_v60, %v544_v31  ;;  %v2662_v43 = vadd.f32 %v2661_v40, %v2660_v36  ;;  %v2773_v8 = vpop.f32.mrb[61].mxu1  ;;  %v2663_v44 = vpop.f32.mrb[62].mxu0  ;;  %v3055_v34 = vld [vmem:[%s3405_s13 + $0xf0] sm:$0xff] }
 0x182   : > { %v1805_v52 = vmul.f32 %v3026_v20, %v1773_v41  ;;  %v2775_v53 = vpop.f32.mrb[62].mxu1  ;;  %v2664_v54 = vpop.f32.mrb[63].mxu0  ;;  %v2774_v56 = vadd.f32 %v2773_v8, %v2772_v39  ;;  %v2066_v31 = vld [vmem:[%s3635_s23 + $0xf8] sm:$0xff] }
 0x183   : > { %v2546_v46 = vpack.c.bf16 %v1804_v38, %v1804_v38  ;;  %v1997_v50 = vadd.f32 %v3051_v47, %v1804_v38  ;;  %v2093_v51 = vadd.f32 %v2061_v33, %v1804_v38  ;;  %1507 = vst.msk [vmem:[#allocation2 + $0xe8] sm:$0xff] %vm413_vm0, %v1474_v42  ;;  %v2665_v57 = vadd.f32 %v2664_v54, %v2663_v44  ;;  %v2776_v11 = vpop.f32.mrb[63].mxu1  ;;  %v3032_v21 = vpop.eup %3031  ;;  %v3056_v39 = vld [vmem:[%s3405_s13 + $0xf8] sm:$0xff]  ;;  %s3170_s13 = smov [#allocation4]  }
 0x184   : > { %v2547_v58 = vpack.c.bf16 %v1805_v52, %v1805_v52  ;;  %v1998_v61 = vadd.f32 %v3052_v59, %v1805_v52  ;;  %v2094_v49 = vadd.f32 %v2062_v48, %v1805_v52  ;;  %v1439_v0 = vadd.f32 %v2774_v56, %v2662_v43  ;;  %v3034_v28 = vpop.eup %3033  ;;  %s3061_s10 = sshll.u32 %s3170_s13, 4  ;;  %s3062_s10 = int_to_ptr.vmem [resolvable:$false] %s3061_s10 }
 0x185   : > { %1965 = vst.msk [vmem:[%s3654_s15 + $0x68] sm:$0xf] %vm1938_vm1, %v2546_v46  ;;  %v2125_v24 = vmul.f32 0.25, %v2093_v51  ;;  %v2777_v2 = vadd.f32 %v2776_v11, %v2775_v53  ;;  %s3063_s28 = scalar_lea.vmem %s3062_s10, 4096  ;;  %p3064_p1 = scmp.lt.s32.totalorder %s3963_s21, %s3062_s10 }
 0x186   : > { %2029 = vst.msk [vmem:[%s3660_s17 + $0xd0] sm:$0xff] %vm413_vm0, %v1997_v50  ;;  %2030 = vst.msk [vmem:[%s3660_s17 + $0xd8] sm:$0xff] %vm413_vm0, %v1998_v61  ;;  %v2126_v3 = vmul.f32 0.25, %v2094_v49  ;;  %v1475_v4 = vadd.f32 %v1439_v0, %v545_v62  ;;  %p3065_p2 = scmp.lt.s32.totalorder %s3063_s28, %s3057_s25 }
 0x187   : > { %2157 = vst.msk [vmem:[%s3650_s26 + $0xd0] sm:$0xff] %vm413_vm0, %v2125_v24  ;;  %v1442_v6 = vadd.f32 %v2777_v2, %v2665_v57 }
 0x188   : > { %1966 = vst.msk [vmem:[%s3654_s15 + $0x6c] sm:$0xf] %vm1938_vm1, %v2547_v58  ;;  %v1774_v10 = vld [vmem:[#allocation2 + $0xe0] sm:$0xff]  ;;  %p3066_p3 = por %p3065_p2, %p3064_p1 }
 0x189   : > { %2158 = vst.msk [vmem:[%s3650_s26 + $0xd8] sm:$0xff] %vm413_vm0, %v2126_v3  ;;  %v1806_v12 = vmul.f32 %v3028_v63, %v1774_v10  ;;  %1508 = vst.msk [vmem:[#allocation2 + $0xf0] sm:$0xff] %vm413_vm0, %v1475_v4  ;;  %v1476_v13 = vadd.f32 %v1442_v6, %v546_v1 }
 0x18a   : > { %v1775_v15 = vld [vmem:[#allocation2 + $0xe8] sm:$0xff]  ;;  %p3067_p5 = pnand %p3066_p3, %p3060_p0 }
 0x18b   : > { %v2548_v16 = vpack.c.bf16 %v1806_v12, %v1806_v12  ;;  %v1999_v18 = vadd.f32 %v3053_v17, %v1806_v12  ;;  %v2095_v19 = vadd.f32 %v2063_v9, %v1806_v12  ;;  %v1807_v5 = vmul.f32 %v3030_v7, %v1775_v15  ;;  %1509 = vst.msk [vmem:[#allocation2 + $0xf8] sm:$0xff] %vm413_vm0, %v1476_v13 }
 0x18d   : > { %1967 = vst.msk [vmem:[%s3654_s15 + $0x70] sm:$0xf] %vm1938_vm1, %v2548_v16  ;;  %v2127_v22 = vmul.f32 0.25, %v2095_v19  ;;  %v2549_v23 = vpack.c.bf16 %v1807_v5, %v1807_v5  ;;  %v2000_v55 = vadd.f32 %v3054_v25, %v1807_v5  ;;  %v2096_v26 = vadd.f32 %v2064_v14, %v1807_v5 }
 0x18e   : > { %2031 = vst.msk [vmem:[%s3660_s17 + $0xe0] sm:$0xff] %vm413_vm0, %v1999_v18 }
 0x18f   : > { %2159 = vst.msk [vmem:[%s3650_s26 + $0xe0] sm:$0xff] %vm413_vm0, %v2127_v22  ;;  %2032 = vst.msk [vmem:[%s3660_s17 + $0xe8] sm:$0xff] %vm413_vm0, %v2000_v55  ;;  %v2128_v27 = vmul.f32 0.25, %v2096_v26 }
 0x190   : > { %1968 = vst.msk [vmem:[%s3654_s15 + $0x74] sm:$0xf] %vm1938_vm1, %v2549_v23  ;;  %v1776_v20 = vld [vmem:[#allocation2 + $0xf0] sm:$0xff] }
 0x191   : > { %2160 = vst.msk [vmem:[%s3650_s26 + $0xe8] sm:$0xff] %vm413_vm0, %v2128_v27  ;;  %v1808_v30 = vmul.f32 %v3032_v21, %v1776_v20 }
 0x192   : > { %v1777_v32 = vld [vmem:[#allocation2 + $0xf8] sm:$0xff] }
 0x193   : > { %v2550_v33 = vpack.c.bf16 %v1808_v30, %v1808_v30  ;;  %v2001_v35 = vadd.f32 %v3055_v34, %v1808_v30  ;;  %v2097_v60 = vadd.f32 %v2065_v29, %v1808_v30  ;;  %v1809_v36 = vmul.f32 %v3034_v28, %v1777_v32 }
 0x195   : > { %1969 = vst.msk [vmem:[%s3654_s15 + $0x78] sm:$0xf] %vm1938_vm1, %v2550_v33  ;;  %v2129_v37 = vmul.f32 0.25, %v2097_v60  ;;  %v2551_v38 = vpack.c.bf16 %v1809_v36, %v1809_v36  ;;  %v2002_v40 = vadd.f32 %v3056_v39, %v1809_v36  ;;  %v2098_v48 = vadd.f32 %v2066_v31, %v1809_v36 }
 0x196   : > { %2033 = vst.msk [vmem:[%s3660_s17 + $0xf0] sm:$0xff] %vm413_vm0, %v2001_v35 }
 0x197   : > { %2161 = vst.msk [vmem:[%s3650_s26 + $0xf0] sm:$0xff] %vm413_vm0, %v2129_v37  ;;  %2034 = vst.msk [vmem:[%s3660_s17 + $0xf8] sm:$0xff] %vm413_vm0, %v2002_v40  ;;  %v2130_v41 = vmul.f32 0.25, %v2098_v48 }
 0x198   : > { %1970 = vst.msk [vmem:[%s3654_s15 + $0x7c] sm:$0xf] %vm1938_vm1, %v2551_v38 }
 0x199   : > { %3070 = shalt.err (!%p3067_p5)
}
 0x19a   : > { %s3071_s15 = scalar_lea.hbm %s3957_s27, 2048  ;;  %s3075_s13 = scalar_lea.hbm %s4061_s6, 4096 }
 0x19b   : > { %p3072_p6 = scmp.ne.s32.totalorder %s3957_s27, %s3071_s15  ;;  %p3076_p10 = scmp.lt.u32.totalorder %s3957_s27, %s4061_s6 }
 0x19c   : > { %p3077_p11 = scmp.lt.u32.totalorder %s3075_s13, %s3071_s15  ;;  %p3079_p13 = scmp.lt.u32.totalorder %s3071_s15, %s3957_s27 }
 0x19d   : > { %p3073_p7 = pnand %p3072_p6, %p3264_p4 }
 0x19e   : > { %p3078_p12 = por %p3077_p11, %p3076_p10 }
 0x19f   : > { %p3074_p9 = pneg %p3073_p7 }
 0x1a0   : > { %p3080_p0 = por %p3079_p13, %p3078_p12 }
 0x1a2   : > { %p3081_p1 = pnand %p3080_p0, %p3074_p9 }
 0x1a4   : > { %3084 = shalt.err (!%p3081_p1)
}
 0x1a5   : > { %s3171_s25 = smov 64   ;;  %s3172_s28 = smov 4   ;;  %2162 = vst.msk [vmem:[%s3650_s26 + $0xf8] sm:$0xff] %vm413_vm0, %v2130_v41 }
 0x1a6   : > { %s4066_s22 = scalar_lea.sflag [#allocation5], %s3628_s20  ;;  %s2169_s15 = scalar_lea.sflag [#allocation7], %s3628_s20 }
 0x1a7   : > { %2778 = dma.vmem_to_hbm [thread:$0]  (%p3264_p4), %s3963_s21, 2048, %s3957_s27, %s4066_s22, %s3171_s25, %s3171_s25, %s3172_s28  }
 0x1a8   : > { %s3085_s17 = scalar_lea.vmem %s3975_s5, 4096  ;;  %s3173_s23 = smov [#allocation6]  }
 0x1a9   : > { %p3086_p2 = scmp.ne.s32.totalorder %s3975_s5, %s3085_s17  ;;  %s3089_s13 = sshll.u32 %s3173_s23, 4  ;;  %s3090_s13 = int_to_ptr.vmem [resolvable:$false] %s3089_s13 }
 0x1aa   : > { %s3091_s10 = scalar_lea.vmem %s3090_s13, 8192  ;;  %p3092_p6 = scmp.lt.s32.totalorder %s3975_s5, %s3090_s13 }
 0x1ab   : > { %p3087_p3 = pnand %p3086_p2, %p3264_p4  ;;  %p3093_p7 = scmp.lt.s32.totalorder %s3091_s10, %s3085_s17 }
 0x1ad   : > { %p3088_p5 = pneg %p3087_p3  ;;  %p3094_p9 = por %p3093_p7, %p3092_p6 }
 0x1af   : > { %p3095_p10 = pnand %p3094_p9, %p3088_p5 }
 0x1b1   : > { %3098 = shalt.err (!%p3095_p10)
}
 0x1b2   : > { %s3099_s26 = scalar_lea.hbm %s3973_s24, 4096  ;;  %s3103_s25 = scalar_lea.hbm %s4062_s7, 8192 }
 0x1b3   : > { %p3100_p11 = scmp.ne.s32.totalorder %s3973_s24, %s3099_s26  ;;  %p3104_p0 = scmp.lt.u32.totalorder %s3973_s24, %s4062_s7 }
 0x1b4   : > { %p3105_p1 = scmp.lt.u32.totalorder %s3103_s25, %s3099_s26  ;;  %p3107_p3 = scmp.lt.u32.totalorder %s3099_s26, %s3973_s24 }
 0x1b5   : > { %p3101_p12 = pnand %p3100_p11, %p3264_p4 }
 0x1b6   : > { %p3106_p2 = por %p3105_p1, %p3104_p0 }
 0x1b7   : > { %p3102_p13 = pneg %p3101_p12 }
 0x1b8   : > { %p3108_p5 = por %p3107_p3, %p3106_p2 }
 0x1ba   : > { %p3109_p6 = pnand %p3108_p5, %p3102_p13 }
 0x1bc   : > { %3112 = shalt.err (!%p3109_p6)
}
 0x1bd   : > { %s3174_s17 = smov 128   ;;  %s3175_s23 = smov 8  }
 0x1be   : > { %2779 = dma.vmem_to_hbm [thread:$0]  (%p3264_p4), %s3975_s5, 4096, %s3973_s24, %s2169_s15, %s3174_s17, %s3174_s17, %s3175_s23  }
 0x1bf PF: > { %p2789_p7 = scmp.ge.s32.totalorder %s3167_s12, 2  ;;  %s2222_s13 = sand.u32 1, %s3147_s29  }
 0x1c0   : > { %s2223_s10 = scalar_lea.sflag [#allocation5], %s2222_s13 }
 0x1c1   : > { %p2783_p9 = pnand %p2789_p7, %p3271_p8 }
 0x1c3   : > { %3138 = dma.done.wait (!%p2783_p9), %s2223_s10, 2048  }
 0x1c4   : > { %3140 = vsyncadd (!%p2783_p9), %s2223_s10, 4294965248  ;;  %s2232_s26 = scalar_lea.sflag [#allocation7], %s2222_s13 }
 0x1c5   : > { %3142 = dma.done.wait (!%p2783_p9), %s2232_s26, 4096  }
 0x1c6   : > { %3144 = vsyncadd (!%p2783_p9), %s2232_s26, 4294963200  ;;  %s26_s12 = sadd.s32 1, %s3167_s12   ;;  %s4067_s29 = smov %s3151_s30 }
 0x1c7   : > { %p23_p10 = scmp.ge.s32.totalorder %s26_s12, 4   ;;  %s4068_s30 = smov %s3155_s9 }
 0x1c8   : > { %s4069_s9 = smov %s3277_s19  ;;  %s4070_s10 = smov %s3163_s11 }
 0x1c9   : > { %s4071_s11 = smov %s4073_s14  ;;  %25 = sbr.rel (!%p23_p10) target bundleno = 8 (0x8), region = 123 }
 0x1d0   :  { %2245 = vsyncpa [#allocation5], 1 }
 0x1d1   :  { %2247 = vsyncpa [#allocation5 + $0x1], 1 }
 0x1d2   :  { %2248 = vsyncpa [#allocation7], 1 }
 0x1d3   :  { %2250 = vsyncpa [#allocation7 + $0x1], 1 }

</bundles_post_ra>
